<compile_context>
chip_gen: v6e
topology: v6e:2x2x1
jax: 0.10.0
libtpu: 0.0.40
codegen_flags: <defaults>
</compile_context>

<pallas_src>
import numpy as np
import jax
import jax.numpy as jnp
from jax.experimental import pallas as pl
from jax.experimental.pallas import tpu as pltpu


def _round_up(x, m):
    return (x + m - 1) // m * m


# ----------------------------------------------------------------------------
# Kernel
# ----------------------------------------------------------------------------
def make_gen2_kernel(n_layers: int, time_tile: int, hid_pad: int, b_block: int):
    L, TT, Hp, Bb = n_layers, time_tile, hid_pad, b_block

    def kernel(*refs):
        x_pair_ref = refs[0]                 # (2, Bb, Kx)  f32: step-0 / step>0 inputs
        h0_ref = refs[1]                     # (L, Bb, Hp)  f32
        c0_ref = refs[2]                     # (L, Bb, Hp)  f32
        w_refs = refs[3:3 + L]               # per layer fused [Wih; Whh]^T  bf16
        b_refs = refs[3 + L:3 + 2 * L]       # per layer (1, 4*Hp) bias (b_ih+b_hh) f32
        wout_ref = refs[3 + 2 * L]           # (Hp, Vp) bf16
        bout_ref = refs[4 + 2 * L]           # (1, Vp)  f32
        out_ref = refs[5 + 2 * L]            # (TT, Bb, Vp) f32
        h_sc = refs[6 + 2 * L]               # (L, Bb, Hp)  f32 persistent scratch
        c_sc = refs[7 + 2 * L]               # (L, Bb, Hp)  f32 persistent scratch
        hist_sc = refs[8 + 2 * L]            # (TT, Bb, Hp) f32 chunk history

        chunk = pl.program_id(1)             # time-chunk index (inner, sequential)

        @pl.when(chunk == 0)
        def _():                             # new batch block -> reset recurrent state
            h_sc[...] = h0_ref[...]
            c_sc[...] = c0_ref[...]

        # The two possible step inputs (token 2 at global step 0, token 1 after).
        x_first = x_pair_ref[0]              # (Bb, Kx) f32
        x_rest = x_pair_ref[1]

        def step(tt, carry):
            hs, cs = carry                   # tuples of L arrays, (Bb, Hp) f32
            gstep = chunk * TT + tt
            sel = (gstep == 0).astype(jnp.float32)       # scalar 0/1 select
            layer_in = sel * x_first + (1.0 - sel) * x_rest

            new_hs, new_cs = [], []
            for l in range(L):
                # Fused gate matmul: [x ; h_prev] @ [Wih ; Whh], bf16 in, f32 acc.
                xh = jnp.concatenate([layer_in, hs[l]], axis=-1).astype(jnp.bfloat16)
                gates = (jnp.dot(xh, w_refs[l][...],
                                 preferred_element_type=jnp.float32)
                         + b_refs[l][...])                 # (Bb, 4*Hp) f32
                # Gate columns are pre-permuted to [i, f, o, g]; each slab is Hp
                # lanes -> all slices below are lane-aligned free views.
                sig = jax.nn.sigmoid(gates[:, :3 * Hp])
                i_g = sig[:, 0:Hp]
                f_g = sig[:, Hp:2 * Hp]
                o_g = sig[:, 2 * Hp:3 * Hp]
                g_g = jnp.tanh(gates[:, 3 * Hp:])
                c_new = f_g * cs[l] + i_g * g_g
                h_new = o_g * jnp.tanh(c_new)
                new_hs.append(h_new)
                new_cs.append(c_new)
                # TODO(synk): train-mode dropout (embedding + inter-layer LSTM)
                # omitted; this implements eval-mode (identity) semantics.
                layer_in = h_new

            hist_sc[tt] = layer_in           # stage last-layer h for this chunk
            return tuple(new_hs), tuple(new_cs)

        init = (tuple(h_sc[l] for l in range(L)),
                tuple(c_sc[l] for l in range(L)))
        hs, cs = jax.lax.fori_loop(0, TT, step, init, unroll=True)
        for l in range(L):
            h_sc[l] = hs[l]
            c_sc[l] = cs[l]

        # One batched output projection for the whole time chunk.
        h_all = hist_sc[...].reshape(TT * Bb, Hp).astype(jnp.bfloat16)
        pred = (jnp.dot(h_all, wout_ref[...], preferred_element_type=jnp.float32)
                + bout_ref[...])
        out_ref[...] = pred.reshape(out_ref.shape).astype(out_ref.dtype)

    return kernel


# ----------------------------------------------------------------------------
# Wrapper: padding, gate-permutation, weight fusion, pallas_call
# ----------------------------------------------------------------------------
def generator2_pallas(z, sen, params, *, n_layers, hid_dim, emb_dim, output_dim,
                      time_tile=4):
    L, H, E, V = n_layers, hid_dim, emb_dim, output_dim
    B = z.shape[0]
    T = sen.shape[0] - 1

    Bp = _round_up(B, 8)
    Hp = _round_up(H, 128)
    Vp = _round_up(V, 128)
    Kx = _round_up(E + 2 * H, 128)           # padded layer-0 step-input width
    TT = time_tile
    Tp = _round_up(T, TT)

    # Split the latent into initial (hidden, cell) and per-step conditioning.
    zz = z.reshape(B, L, 2 * H)
    zzz = jnp.transpose(zz, (1, 0, 2))       # (L, B, 2H)
    hidden = zzz[:, :, :H]
    cell = zzz[:, :, H:]
    lat_z = zzz[-1]                          # (B, 2H)

    # Tokens are 2 (<sos>) at the first step and 1 afterwards -> only two
    # distinct step inputs, no per-timestep HBM stream needed.
    emb = params["embedding"]
    x_first = jnp.concatenate([jnp.broadcast_to(emb[2][None], (B, E)), lat_z], axis=1)
    x_rest = jnp.concatenate([jnp.broadcast_to(emb[1][None], (B, E)), lat_z], axis=1)
    x_pair = jnp.stack([x_first, x_rest])                         # (2, B, E+2H)
    x_pair = jnp.pad(x_pair, ((0, 0), (0, Bp - B), (0, Kx - (E + 2 * H))))

    h0 = jnp.pad(hidden, ((0, 0), (0, Bp - B), (0, Hp - H)))
    c0 = jnp.pad(cell, ((0, 0), (0, Bp - B), (0, Hp - H)))

    def permute_and_pad_gates(w):            # (rows, 4H) [i,f,g,o] -> (rows, 4Hp) [i,f,o,g]
        i, f, g, o = jnp.split(w, 4, axis=1)
        parts = [jnp.pad(p, ((0, 0), (0, Hp - H))) for p in (i, f, o, g)]
        return jnp.concatenate(parts, axis=1)

    w_fused, b_fused = [], []
    for l in range(L):
        wih, whh, bih, bhh = params["lstm"][l]
        kin = wih.shape[0]
        kin_p = Kx if l == 0 else Hp
        wih_p = jnp.pad(permute_and_pad_gates(wih), ((0, kin_p - kin), (0, 0)))
        whh_p = jnp.pad(permute_and_pad_gates(whh), ((0, Hp - H), (0, 0)))
        w_fused.append(jnp.concatenate([wih_p, whh_p], axis=0).astype(jnp.bfloat16))
        b_fused.append(permute_and_pad_gates(bih + bhh))          # (1, 4*Hp) f32

    w_out = jnp.pad(params["w_out"], ((0, Hp - H), (0, Vp - V))).astype(jnp.bfloat16)
    b_out = jnp.pad(params["b_out"], ((0, 0), (0, Vp - V)))

    nb = Bp // 8
    nt = Tp // TT
    kernel = make_gen2_kernel(L, TT, Hp, 8)

    w_specs = [pl.BlockSpec(w_fused[l].shape, lambda b, c: (0, 0)) for l in range(L)]
    b_specs = [pl.BlockSpec((1, 4 * Hp), lambda b, c: (0, 0)) for _ in range(L)]

    out = pl.pallas_call(
        kernel,
        out_shape=jax.ShapeDtypeStruct((Tp, Bp, Vp), jnp.float32),
        grid_spec=pltpu.PrefetchScalarGridSpec(
            num_scalar_prefetch=0,
            grid=(nb, nt),                                        # (batch, time-chunk)
            in_specs=[
                pl.BlockSpec((2, 8, Kx), lambda b, c: (0, b, 0)),  # step-input pair
                pl.BlockSpec((L, 8, Hp), lambda b, c: (0, b, 0)),  # h0
                pl.BlockSpec((L, 8, Hp), lambda b, c: (0, b, 0)),  # c0
            ] + w_specs + b_specs + [
                pl.BlockSpec((Hp, Vp), lambda b, c: (0, 0)),       # W_out^T (bf16)
                pl.BlockSpec((1, Vp), lambda b, c: (0, 0)),        # b_out
            ],
            out_specs=pl.BlockSpec((TT, 8, Vp), lambda b, c: (c, b, 0)),
            scratch_shapes=[pltpu.VMEM((L, 8, Hp), jnp.float32),   # h state
                            pltpu.VMEM((L, 8, Hp), jnp.float32),   # c state
                            pltpu.VMEM((TT, 8, Hp), jnp.float32)],  # chunk h history
        ),
        compiler_params=pltpu.CompilerParams(
            dimension_semantics=("parallel", "arbitrary"),         # batch || , time seq
            vmem_limit_bytes=32 * 1024 * 1024),
    )(x_pair, h0, c0, *w_fused, *b_fused, w_out, b_out)

    return out[:T, :B, :V]


# ----------------------------------------------------------------------------
# Pure-JAX reference (same eval-mode math).  matmul_dtype=bfloat16 mirrors the
# kernel's bf16-operand / f32-accumulate matmuls for a tight comparison.
# ----------------------------------------------------------------------------
def generator2_reference(z, sen, params, *, n_layers, hid_dim, emb_dim, output_dim,
                         matmul_dtype=jnp.float32):
    L, H, E = n_layers, hid_dim, emb_dim
    B = z.shape[0]
    T = sen.shape[0] - 1
    zz = z.reshape(B, L, 2 * H)
    zzz = jnp.transpose(zz, (1, 0, 2))
    h = zzz[:, :, :H]
    c = zzz[:, :, H:]
    lat_z = zzz[-1]
    emb = params["embedding"]

    def dot(a, w):
        return jnp.dot(a.astype(matmul_dtype), w.astype(matmul_dtype),
                       preferred_element_type=jnp.float32)

    outs = []
    for t in range(T):
        tok = 2 if t == 0 else 1
        x = jnp.concatenate([jnp.broadcast_to(emb[tok][None], (B, E)), lat_z], axis=1)
        layer_in = x
        new_h, new_c = [], []
        for l in range(L):
            wih, whh, bih, bhh = params["lstm"][l]
            gates = dot(layer_in, wih) + dot(h[l], whh) + bih[0] + bhh[0]
            i, f, g, o = jnp.split(gates, 4, axis=1)
            cn = jax.nn.sigmoid(f) * c[l] + jax.nn.sigmoid(i) * jnp.tanh(g)
            hn = jax.nn.sigmoid(o) * jnp.tanh(cn)
            new_h.append(hn)
            new_c.append(cn)
            layer_in = hn
        h = jnp.stack(new_h)
        c = jnp.stack(new_c)
        outs.append(dot(layer_in, params["w_out"]) + params["b_out"][0])
    return jnp.stack(outs)


# ----------------------------------------------------------------------------
# Deterministic parameter init (shapes from Generator2.__init__)
# ----------------------------------------------------------------------------
def init_params(key, output_dim, emb_dim, hid_dim, n_layers):
    ks = jax.random.split(key, 3 + 4 * n_layers)
    scale = 1.0 / np.sqrt(hid_dim)
    emb = jax.random.normal(ks[0], (output_dim, emb_dim), jnp.float32)
    emb = emb.at[0].set(0.0)                       # padding_idx=0
    lstm = []
    idx = 1
    for l in range(n_layers):
        in_l = emb_dim + 2 * hid_dim if l == 0 else hid_dim
        wih = jax.random.uniform(ks[idx], (in_l, 4 * hid_dim), jnp.float32, -scale, scale); idx += 1
        whh = jax.random.uniform(ks[idx], (hid_dim, 4 * hid_dim), jnp.float32, -scale, scale); idx += 1
        bih = jax.random.uniform(ks[idx], (1, 4 * hid_dim), jnp.float32, -scale, scale); idx += 1
        bhh = jax.random.uniform(ks[idx], (1, 4 * hid_dim), jnp.float32, -scale, scale); idx += 1
        lstm.append((wih, whh, bih, bhh))
    w_out = jax.random.uniform(ks[idx], (hid_dim, output_dim), jnp.float32, -scale, scale)
    b_out = jax.random.uniform(ks[idx + 1], (1, output_dim), jnp.float32, -scale, scale)
    return {"embedding": emb, "lstm": lstm, "w_out": w_out, "b_out": b_out}


if __name__ == "__main__":
    OUTPUT_DIM, EMB_DIM, HID_DIM, N_LAYERS = 16, 8, 32, 2
    B, MAX_LEN = 2, 8

    key = jax.random.PRNGKey(0)
    kp, kz = jax.random.split(key)
    params = init_params(kp, OUTPUT_DIM, EMB_DIM, HID_DIM, N_LAYERS)

    # `input` to forward(): [B, layer_dim * 2*hid_dim]; `sen`: only shape[0] is used.
    z = jax.random.normal(kz, (B, N_LAYERS * 2 * HID_DIM), jnp.float32)
    sen = jnp.zeros((MAX_LEN, B), jnp.int32)

    out = generator2_pallas(z, sen, params, n_layers=N_LAYERS, hid_dim=HID_DIM,
                            emb_dim=EMB_DIM, output_dim=OUTPUT_DIM)
    out = jax.block_until_ready(out)
    assert out.shape == (MAX_LEN - 1, B, OUTPUT_DIM), out.shape

    # The kernel uses bf16 weights/matmul operands with f32 accumulation, so
    # compare against a reference that applies the same operand casts.
    ref = generator2_reference(z, sen, params, n_layers=N_LAYERS, hid_dim=HID_DIM,
                               emb_dim=EMB_DIM, output_dim=OUTPUT_DIM,
                               matmul_dtype=jnp.bfloat16)
    np.testing.assert_allclose(np.asarray(out), np.asarray(ref), rtol=2e-3, atol=2e-3)
    print("KERNEL_OK")
</pallas_src>

<mosaic_0001>
module attributes {stable_mosaic.version = 11 : i64} {
  func.func @kernel(%arg0: i32, %arg1: i32, %arg2: memref<2x8x128xf32, #tpu.memory_space<vmem>>, %arg3: memref<2x8x128xf32, #tpu.memory_space<vmem>>, %arg4: memref<2x8x128xf32, #tpu.memory_space<vmem>>, %arg5: memref<256x512xbf16, #tpu.memory_space<vmem>>, %arg6: memref<256x512xbf16, #tpu.memory_space<vmem>>, %arg7: memref<1x512xf32, #tpu.memory_space<vmem>>, %arg8: memref<1x512xf32, #tpu.memory_space<vmem>>, %arg9: memref<128x128xbf16, #tpu.memory_space<vmem>>, %arg10: memref<1x128xf32, #tpu.memory_space<vmem>>, %arg11: memref<4x8x128xf32, #tpu.memory_space<vmem>>, %arg12: memref<2x8x128xf32, #tpu.memory_space<vmem>>, %arg13: memref<2x8x128xf32, #tpu.memory_space<vmem>>, %arg14: memref<4x8x128xf32, #tpu.memory_space<vmem>>) attributes {dimension_semantics = [#tpu.dimension_semantics<parallel>, #tpu.dimension_semantics<arbitrary>], iteration_bounds = array<i64: 1, 2>, scalar_prefetch = 0 : i64, scratch_operands = 3 : i64, tpu.core_type = #tpu.core_type<tc>, window_params = [{transform_indices = @transform_0, window_bounds = array<i64: 2, 8, 128>}, {transform_indices = @transform_1, window_bounds = array<i64: 2, 8, 128>}, {transform_indices = @transform_2, window_bounds = array<i64: 2, 8, 128>}, {pipeline_mode = #tpu.pipeline_mode<synchronous>, transform_indices = @transform_3, window_bounds = array<i64: 256, 512>}, {pipeline_mode = #tpu.pipeline_mode<synchronous>, transform_indices = @transform_4, window_bounds = array<i64: 256, 512>}, {pipeline_mode = #tpu.pipeline_mode<synchronous>, transform_indices = @transform_5, window_bounds = array<i64: 1, 512>}, {pipeline_mode = #tpu.pipeline_mode<synchronous>, transform_indices = @transform_6, window_bounds = array<i64: 1, 512>}, {pipeline_mode = #tpu.pipeline_mode<synchronous>, transform_indices = @transform_7, window_bounds = array<i64: 128, 128>}, {pipeline_mode = #tpu.pipeline_mode<synchronous>, transform_indices = @transform_8, window_bounds = array<i64: 1, 128>}, {transform_indices = @transform_9, window_bounds = array<i64: 4, 8, 128>}]} {
    %c0_i32 = arith.constant 0 : i32
    %0 = arith.cmpi eq, %arg1, %c0_i32 : i32
    %1 = arith.extui %0 : i1 to i32
    %c0_i32_0 = arith.constant 0 : i32
    %2 = arith.cmpi ne, %1, %c0_i32_0 : i32
    scf.if %2 {
      %c0_108 = arith.constant 0 : index
      %c0_109 = arith.constant 0 : index
      %c0_110 = arith.constant 0 : index
      %281 = vector.load %arg3[%c0_108, %c0_109, %c0_110] : memref<2x8x128xf32, #tpu.memory_space<vmem>>, vector<2x8x128xf32>
      %c0_111 = arith.constant 0 : index
      %c0_112 = arith.constant 0 : index
      %c0_113 = arith.constant 0 : index
      %282 = vector.load %arg12[%c0_111, %c0_112, %c0_113] : memref<2x8x128xf32, #tpu.memory_space<vmem>>, vector<2x8x128xf32>
      tpu.vector_store %arg12[%c0_111, %c0_112, %c0_113], %281 {strides = array<i32>} : memref<2x8x128xf32, #tpu.memory_space<vmem>>, vector<2x8x128xf32>,
      %c0_114 = arith.constant 0 : index
      %c0_115 = arith.constant 0 : index
      %c0_116 = arith.constant 0 : index
      %283 = vector.load %arg4[%c0_114, %c0_115, %c0_116] : memref<2x8x128xf32, #tpu.memory_space<vmem>>, vector<2x8x128xf32>
      %c0_117 = arith.constant 0 : index
      %c0_118 = arith.constant 0 : index
      %c0_119 = arith.constant 0 : index
      %284 = vector.load %arg13[%c0_117, %c0_118, %c0_119] : memref<2x8x128xf32, #tpu.memory_space<vmem>>, vector<2x8x128xf32>
      tpu.vector_store %arg13[%c0_117, %c0_118, %c0_119], %283 {strides = array<i32>} : memref<2x8x128xf32, #tpu.memory_space<vmem>>, vector<2x8x128xf32>,
    } else {
    }
    %c0 = arith.constant 0 : index
    %c0_1 = arith.constant 0 : index
    %c0_2 = arith.constant 0 : index
    %3 = vector.load %arg2[%c0, %c0_1, %c0_2] : memref<2x8x128xf32, #tpu.memory_space<vmem>>, vector<1x8x128xf32>
    %4 = vector.shape_cast %3 : vector<1x8x128xf32> to vector<8x128xf32>
    %c1 = arith.constant 1 : index
    %c0_3 = arith.constant 0 : index
    %c0_4 = arith.constant 0 : index
    %5 = vector.load %arg2[%c1, %c0_3, %c0_4] : memref<2x8x128xf32, #tpu.memory_space<vmem>>, vector<1x8x128xf32>
    %6 = vector.shape_cast %5 : vector<1x8x128xf32> to vector<8x128xf32>
    %c0_5 = arith.constant 0 : index
    %c0_6 = arith.constant 0 : index
    %c0_7 = arith.constant 0 : index
    %7 = vector.load %arg12[%c0_5, %c0_6, %c0_7] : memref<2x8x128xf32, #tpu.memory_space<vmem>>, vector<1x8x128xf32>
    %8 = vector.shape_cast %7 : vector<1x8x128xf32> to vector<8x128xf32>
    %c1_8 = arith.constant 1 : index
    %c0_9 = arith.constant 0 : index
    %c0_10 = arith.constant 0 : index
    %9 = vector.load %arg12[%c1_8, %c0_9, %c0_10] : memref<2x8x128xf32, #tpu.memory_space<vmem>>, vector<1x8x128xf32>
    %10 = vector.shape_cast %9 : vector<1x8x128xf32> to vector<8x128xf32>
    %c0_11 = arith.constant 0 : index
    %c0_12 = arith.constant 0 : index
    %c0_13 = arith.constant 0 : index
    %11 = vector.load %arg13[%c0_11, %c0_12, %c0_13] : memref<2x8x128xf32, #tpu.memory_space<vmem>>, vector<1x8x128xf32>
    %12 = vector.shape_cast %11 : vector<1x8x128xf32> to vector<8x128xf32>
    %c1_14 = arith.constant 1 : index
    %c0_15 = arith.constant 0 : index
    %c0_16 = arith.constant 0 : index
    %13 = vector.load %arg13[%c1_14, %c0_15, %c0_16] : memref<2x8x128xf32, #tpu.memory_space<vmem>>, vector<1x8x128xf32>
    %14 = vector.shape_cast %13 : vector<1x8x128xf32> to vector<8x128xf32>
    %c0_i32_17 = arith.constant 0 : i32
    %c4_i32 = arith.constant 4 : i32
    %15 = arith.muli %arg1, %c4_i32 : i32
    %16 = arith.addi %15, %c0_i32_17 : i32
    %c0_i32_18 = arith.constant 0 : i32
    %17 = arith.cmpi eq, %16, %c0_i32_18 : i32
    %18 = arith.extui %17 : i1 to i32
    %19 = arith.sitofp %18 : i32 to f32
    %20 = vector.broadcast %19 : f32 to vector<8x128xf32>
    %21 = arith.mulf %20, %4 : vector<8x128xf32>
    %cst = arith.constant 1.000000e+00 : f32
    %22 = arith.subf %cst, %19 : f32
    %23 = vector.broadcast %22 : f32 to vector<8x128xf32>
    %24 = arith.mulf %23, %6 : vector<8x128xf32>
    %25 = arith.addf %21, %24 : vector<8x128xf32>
    %26 = tpu.concatenate %25, %8 in 1 : vector<8x128xf32>, vector<8x128xf32> -> vector<8x256xf32>
    %27 = arith.truncf %26 : vector<8x256xf32> to vector<8x256xbf16>
    %c0_19 = arith.constant 0 : index
    %c0_20 = arith.constant 0 : index
    %28 = vector.load %arg5[%c0_19, %c0_20] : memref<256x512xbf16, #tpu.memory_space<vmem>>, vector<256x512xbf16>
    %cst_21 = arith.constant dense<0.000000e+00> : vector<8x512xf32>
    %29 = tpu.matmul %27, %28, %cst_21 {dimension_numbers = #tpu.dot_dimension_numbers<[1], [0], [0], [1], [0, 0, 1, 1], [], []>} : vector<8x256xbf16>, vector<256x512xbf16>, vector<8x512xf32> -> vector<8x512xf32>
    %c0_22 = arith.constant 0 : index
    %c0_23 = arith.constant 0 : index
    %30 = vector.load %arg7[%c0_22, %c0_23] : memref<1x512xf32, #tpu.memory_space<vmem>>, vector<1x512xf32>
    %31 = vector.broadcast %30 : vector<1x512xf32> to vector<8x512xf32>
    %32 = arith.addf %29, %31 : vector<8x512xf32>
    %33 = vector.extract_strided_slice %32 {offsets = [0, 0], sizes = [8, 384], strides = [1, 1]} : vector<8x512xf32> to vector<8x384xf32>
    %34 = arith.negf %33 : vector<8x384xf32>
    %35 = math.exp %34 : vector<8x384xf32>
    %cst_24 = arith.constant 1.000000e+00 : f32
    %36 = vector.broadcast %cst_24 : f32 to vector<8x384xf32>
    %37 = arith.addf %36, %35 : vector<8x384xf32>
    %38 = arith.divf %36, %37 : vector<8x384xf32>
    %39 = vector.extract_strided_slice %38 {offsets = [0, 0], sizes = [8, 128], strides = [1, 1]} : vector<8x384xf32> to vector<8x128xf32>
    %40 = vector.extract_strided_slice %38 {offsets = [0, 128], sizes = [8, 128], strides = [1, 1]} : vector<8x384xf32> to vector<8x128xf32>
    %41 = vector.extract_strided_slice %38 {offsets = [0, 256], sizes = [8, 128], strides = [1, 1]} : vector<8x384xf32> to vector<8x128xf32>
    %42 = vector.extract_strided_slice %32 {offsets = [0, 384], sizes = [8, 128], strides = [1, 1]} : vector<8x512xf32> to vector<8x128xf32>
    %43 = math.tanh %42 : vector<8x128xf32>
    %44 = arith.mulf %40, %12 : vector<8x128xf32>
    %45 = arith.mulf %39, %43 : vector<8x128xf32>
    %46 = arith.addf %44, %45 : vector<8x128xf32>
    %47 = math.tanh %46 : vector<8x128xf32>
    %48 = arith.mulf %41, %47 : vector<8x128xf32>
    %49 = tpu.concatenate %48, %10 in 1 : vector<8x128xf32>, vector<8x128xf32> -> vector<8x256xf32>
    %50 = arith.truncf %49 : vector<8x256xf32> to vector<8x256xbf16>
    %c0_25 = arith.constant 0 : index
    %c0_26 = arith.constant 0 : index
    %51 = vector.load %arg6[%c0_25, %c0_26] : memref<256x512xbf16, #tpu.memory_space<vmem>>, vector<256x512xbf16>
    %cst_27 = arith.constant dense<0.000000e+00> : vector<8x512xf32>
    %52 = tpu.matmul %50, %51, %cst_27 {dimension_numbers = #tpu.dot_dimension_numbers<[1], [0], [0], [1], [0, 0, 1, 1], [], []>} : vector<8x256xbf16>, vector<256x512xbf16>, vector<8x512xf32> -> vector<8x512xf32>
    %c0_28 = arith.constant 0 : index
    %c0_29 = arith.constant 0 : index
    %53 = vector.load %arg8[%c0_28, %c0_29] : memref<1x512xf32, #tpu.memory_space<vmem>>, vector<1x512xf32>
    %54 = vector.broadcast %53 : vector<1x512xf32> to vector<8x512xf32>
    %55 = arith.addf %52, %54 : vector<8x512xf32>
    %56 = vector.extract_strided_slice %55 {offsets = [0, 0], sizes = [8, 384], strides = [1, 1]} : vector<8x512xf32> to vector<8x384xf32>
    %57 = arith.negf %56 : vector<8x384xf32>
    %58 = math.exp %57 : vector<8x384xf32>
    %cst_30 = arith.constant 1.000000e+00 : f32
    %59 = vector.broadcast %cst_30 : f32 to vector<8x384xf32>
    %60 = arith.addf %59, %58 : vector<8x384xf32>
    %61 = arith.divf %59, %60 : vector<8x384xf32>
    %62 = vector.extract_strided_slice %61 {offsets = [0, 0], sizes = [8, 128], strides = [1, 1]} : vector<8x384xf32> to vector<8x128xf32>
    %63 = vector.extract_strided_slice %61 {offsets = [0, 128], sizes = [8, 128], strides = [1, 1]} : vector<8x384xf32> to vector<8x128xf32>
    %64 = vector.extract_strided_slice %61 {offsets = [0, 256], sizes = [8, 128], strides = [1, 1]} : vector<8x384xf32> to vector<8x128xf32>
    %65 = vector.extract_strided_slice %55 {offsets = [0, 384], sizes = [8, 128], strides = [1, 1]} : vector<8x512xf32> to vector<8x128xf32>
    %66 = math.tanh %65 : vector<8x128xf32>
    %67 = arith.mulf %63, %14 : vector<8x128xf32>
    %68 = arith.mulf %62, %66 : vector<8x128xf32>
    %69 = arith.addf %67, %68 : vector<8x128xf32>
    %70 = math.tanh %69 : vector<8x128xf32>
    %71 = arith.mulf %64, %70 : vector<8x128xf32>
    %72 = arith.index_cast %c0_i32_17 : i32 to index
    %c0_31 = arith.constant 0 : index
    %c0_32 = arith.constant 0 : index
    %73 = vector.load %arg14[%72, %c0_31, %c0_32] : memref<4x8x128xf32, #tpu.memory_space<vmem>>, vector<1x8x128xf32>
    %74 = vector.shape_cast %73 : vector<1x8x128xf32> to vector<8x128xf32>
    %75 = vector.shape_cast %71 : vector<8x128xf32> to vector<1x8x128xf32>
    tpu.vector_store %arg14[%72, %c0_31, %c0_32], %75 {strides = array<i32>} : memref<4x8x128xf32, #tpu.memory_space<vmem>>, vector<1x8x128xf32>,
    %c1_i32 = arith.constant 1 : i32
    %c4_i32_33 = arith.constant 4 : i32
    %76 = arith.muli %arg1, %c4_i32_33 : i32
    %77 = arith.addi %76, %c1_i32 : i32
    %c0_i32_34 = arith.constant 0 : i32
    %78 = arith.cmpi eq, %77, %c0_i32_34 : i32
    %79 = arith.extui %78 : i1 to i32
    %80 = arith.sitofp %79 : i32 to f32
    %81 = vector.broadcast %80 : f32 to vector<8x128xf32>
    %82 = arith.mulf %81, %4 : vector<8x128xf32>
    %cst_35 = arith.constant 1.000000e+00 : f32
    %83 = arith.subf %cst_35, %80 : f32
    %84 = vector.broadcast %83 : f32 to vector<8x128xf32>
    %85 = arith.mulf %84, %6 : vector<8x128xf32>
    %86 = arith.addf %82, %85 : vector<8x128xf32>
    %87 = tpu.concatenate %86, %48 in 1 : vector<8x128xf32>, vector<8x128xf32> -> vector<8x256xf32>
    %88 = arith.truncf %87 : vector<8x256xf32> to vector<8x256xbf16>
    %c0_36 = arith.constant 0 : index
    %c0_37 = arith.constant 0 : index
    %89 = vector.load %arg5[%c0_36, %c0_37] : memref<256x512xbf16, #tpu.memory_space<vmem>>, vector<256x512xbf16>
    %cst_38 = arith.constant dense<0.000000e+00> : vector<8x512xf32>
    %90 = tpu.matmul %88, %89, %cst_38 {dimension_numbers = #tpu.dot_dimension_numbers<[1], [0], [0], [1], [0, 0, 1, 1], [], []>} : vector<8x256xbf16>, vector<256x512xbf16>, vector<8x512xf32> -> vector<8x512xf32>
    %c0_39 = arith.constant 0 : index
    %c0_40 = arith.constant 0 : index
    %91 = vector.load %arg7[%c0_39, %c0_40] : memref<1x512xf32, #tpu.memory_space<vmem>>, vector<1x512xf32>
    %92 = vector.broadcast %91 : vector<1x512xf32> to vector<8x512xf32>
    %93 = arith.addf %90, %92 : vector<8x512xf32>
    %94 = vector.extract_strided_slice %93 {offsets = [0, 0], sizes = [8, 384], strides = [1, 1]} : vector<8x512xf32> to vector<8x384xf32>
    %95 = arith.negf %94 : vector<8x384xf32>
    %96 = math.exp %95 : vector<8x384xf32>
    %cst_41 = arith.constant 1.000000e+00 : f32
    %97 = vector.broadcast %cst_41 : f32 to vector<8x384xf32>
    %98 = arith.addf %97, %96 : vector<8x384xf32>
    %99 = arith.divf %97, %98 : vector<8x384xf32>
    %100 = vector.extract_strided_slice %99 {offsets = [0, 0], sizes = [8, 128], strides = [1, 1]} : vector<8x384xf32> to vector<8x128xf32>
    %101 = vector.extract_strided_slice %99 {offsets = [0, 128], sizes = [8, 128], strides = [1, 1]} : vector<8x384xf32> to vector<8x128xf32>
    %102 = vector.extract_strided_slice %99 {offsets = [0, 256], sizes = [8, 128], strides = [1, 1]} : vector<8x384xf32> to vector<8x128xf32>
    %103 = vector.extract_strided_slice %93 {offsets = [0, 384], sizes = [8, 128], strides = [1, 1]} : vector<8x512xf32> to vector<8x128xf32>
    %104 = math.tanh %103 : vector<8x128xf32>
    %105 = arith.mulf %101, %46 : vector<8x128xf32>
    %106 = arith.mulf %100, %104 : vector<8x128xf32>
    %107 = arith.addf %105, %106 : vector<8x128xf32>
    %108 = math.tanh %107 : vector<8x128xf32>
    %109 = arith.mulf %102, %108 : vector<8x128xf32>
    %110 = tpu.concatenate %109, %71 in 1 : vector<8x128xf32>, vector<8x128xf32> -> vector<8x256xf32>
    %111 = arith.truncf %110 : vector<8x256xf32> to vector<8x256xbf16>
    %c0_42 = arith.constant 0 : index
    %c0_43 = arith.constant 0 : index
    %112 = vector.load %arg6[%c0_42, %c0_43] : memref<256x512xbf16, #tpu.memory_space<vmem>>, vector<256x512xbf16>
    %cst_44 = arith.constant dense<0.000000e+00> : vector<8x512xf32>
    %113 = tpu.matmul %111, %112, %cst_44 {dimension_numbers = #tpu.dot_dimension_numbers<[1], [0], [0], [1], [0, 0, 1, 1], [], []>} : vector<8x256xbf16>, vector<256x512xbf16>, vector<8x512xf32> -> vector<8x512xf32>
    %c0_45 = arith.constant 0 : index
    %c0_46 = arith.constant 0 : index
    %114 = vector.load %arg8[%c0_45, %c0_46] : memref<1x512xf32, #tpu.memory_space<vmem>>, vector<1x512xf32>
    %115 = vector.broadcast %114 : vector<1x512xf32> to vector<8x512xf32>
    %116 = arith.addf %113, %115 : vector<8x512xf32>
    %117 = vector.extract_strided_slice %116 {offsets = [0, 0], sizes = [8, 384], strides = [1, 1]} : vector<8x512xf32> to vector<8x384xf32>
    %118 = arith.negf %117 : vector<8x384xf32>
    %119 = math.exp %118 : vector<8x384xf32>
    %cst_47 = arith.constant 1.000000e+00 : f32
    %120 = vector.broadcast %cst_47 : f32 to vector<8x384xf32>
    %121 = arith.addf %120, %119 : vector<8x384xf32>
    %122 = arith.divf %120, %121 : vector<8x384xf32>
    %123 = vector.extract_strided_slice %122 {offsets = [0, 0], sizes = [8, 128], strides = [1, 1]} : vector<8x384xf32> to vector<8x128xf32>
    %124 = vector.extract_strided_slice %122 {offsets = [0, 128], sizes = [8, 128], strides = [1, 1]} : vector<8x384xf32> to vector<8x128xf32>
    %125 = vector.extract_strided_slice %122 {offsets = [0, 256], sizes = [8, 128], strides = [1, 1]} : vector<8x384xf32> to vector<8x128xf32>
    %126 = vector.extract_strided_slice %116 {offsets = [0, 384], sizes = [8, 128], strides = [1, 1]} : vector<8x512xf32> to vector<8x128xf32>
    %127 = math.tanh %126 : vector<8x128xf32>
    %128 = arith.mulf %124, %69 : vector<8x128xf32>
    %129 = arith.mulf %123, %127 : vector<8x128xf32>
    %130 = arith.addf %128, %129 : vector<8x128xf32>
    %131 = math.tanh %130 : vector<8x128xf32>
    %132 = arith.mulf %125, %131 : vector<8x128xf32>
    %133 = arith.index_cast %c1_i32 : i32 to index
    %c0_48 = arith.constant 0 : index
    %c0_49 = arith.constant 0 : index
    %134 = vector.load %arg14[%133, %c0_48, %c0_49] : memref<4x8x128xf32, #tpu.memory_space<vmem>>, vector<1x8x128xf32>
    %135 = vector.shape_cast %134 : vector<1x8x128xf32> to vector<8x128xf32>
    %136 = vector.shape_cast %132 : vector<8x128xf32> to vector<1x8x128xf32>
    tpu.vector_store %arg14[%133, %c0_48, %c0_49], %136 {strides = array<i32>} : memref<4x8x128xf32, #tpu.memory_space<vmem>>, vector<1x8x128xf32>,
    %c2_i32 = arith.constant 2 : i32
    %c4_i32_50 = arith.constant 4 : i32
    %137 = arith.muli %arg1, %c4_i32_50 : i32
    %138 = arith.addi %137, %c2_i32 : i32
    %c0_i32_51 = arith.constant 0 : i32
    %139 = arith.cmpi eq, %138, %c0_i32_51 : i32
    %140 = arith.extui %139 : i1 to i32
    %141 = arith.sitofp %140 : i32 to f32
    %142 = vector.broadcast %141 : f32 to vector<8x128xf32>
    %143 = arith.mulf %142, %4 : vector<8x128xf32>
    %cst_52 = arith.constant 1.000000e+00 : f32
    %144 = arith.subf %cst_52, %141 : f32
    %145 = vector.broadcast %144 : f32 to vector<8x128xf32>
    %146 = arith.mulf %145, %6 : vector<8x128xf32>
    %147 = arith.addf %143, %146 : vector<8x128xf32>
    %148 = tpu.concatenate %147, %109 in 1 : vector<8x128xf32>, vector<8x128xf32> -> vector<8x256xf32>
    %149 = arith.truncf %148 : vector<8x256xf32> to vector<8x256xbf16>
    %c0_53 = arith.constant 0 : index
    %c0_54 = arith.constant 0 : index
    %150 = vector.load %arg5[%c0_53, %c0_54] : memref<256x512xbf16, #tpu.memory_space<vmem>>, vector<256x512xbf16>
    %cst_55 = arith.constant dense<0.000000e+00> : vector<8x512xf32>
    %151 = tpu.matmul %149, %150, %cst_55 {dimension_numbers = #tpu.dot_dimension_numbers<[1], [0], [0], [1], [0, 0, 1, 1], [], []>} : vector<8x256xbf16>, vector<256x512xbf16>, vector<8x512xf32> -> vector<8x512xf32>
    %c0_56 = arith.constant 0 : index
    %c0_57 = arith.constant 0 : index
    %152 = vector.load %arg7[%c0_56, %c0_57] : memref<1x512xf32, #tpu.memory_space<vmem>>, vector<1x512xf32>
    %153 = vector.broadcast %152 : vector<1x512xf32> to vector<8x512xf32>
    %154 = arith.addf %151, %153 : vector<8x512xf32>
    %155 = vector.extract_strided_slice %154 {offsets = [0, 0], sizes = [8, 384], strides = [1, 1]} : vector<8x512xf32> to vector<8x384xf32>
    %156 = arith.negf %155 : vector<8x384xf32>
    %157 = math.exp %156 : vector<8x384xf32>
    %cst_58 = arith.constant 1.000000e+00 : f32
    %158 = vector.broadcast %cst_58 : f32 to vector<8x384xf32>
    %159 = arith.addf %158, %157 : vector<8x384xf32>
    %160 = arith.divf %158, %159 : vector<8x384xf32>
    %161 = vector.extract_strided_slice %160 {offsets = [0, 0], sizes = [8, 128], strides = [1, 1]} : vector<8x384xf32> to vector<8x128xf32>
    %162 = vector.extract_strided_slice %160 {offsets = [0, 128], sizes = [8, 128], strides = [1, 1]} : vector<8x384xf32> to vector<8x128xf32>
    %163 = vector.extract_strided_slice %160 {offsets = [0, 256], sizes = [8, 128], strides = [1, 1]} : vector<8x384xf32> to vector<8x128xf32>
    %164 = vector.extract_strided_slice %154 {offsets = [0, 384], sizes = [8, 128], strides = [1, 1]} : vector<8x512xf32> to vector<8x128xf32>
    %165 = math.tanh %164 : vector<8x128xf32>
    %166 = arith.mulf %162, %107 : vector<8x128xf32>
    %167 = arith.mulf %161, %165 : vector<8x128xf32>
    %168 = arith.addf %166, %167 : vector<8x128xf32>
    %169 = math.tanh %168 : vector<8x128xf32>
    %170 = arith.mulf %163, %169 : vector<8x128xf32>
    %171 = tpu.concatenate %170, %132 in 1 : vector<8x128xf32>, vector<8x128xf32> -> vector<8x256xf32>
    %172 = arith.truncf %171 : vector<8x256xf32> to vector<8x256xbf16>
    %c0_59 = arith.constant 0 : index
    %c0_60 = arith.constant 0 : index
    %173 = vector.load %arg6[%c0_59, %c0_60] : memref<256x512xbf16, #tpu.memory_space<vmem>>, vector<256x512xbf16>
    %cst_61 = arith.constant dense<0.000000e+00> : vector<8x512xf32>
    %174 = tpu.matmul %172, %173, %cst_61 {dimension_numbers = #tpu.dot_dimension_numbers<[1], [0], [0], [1], [0, 0, 1, 1], [], []>} : vector<8x256xbf16>, vector<256x512xbf16>, vector<8x512xf32> -> vector<8x512xf32>
    %c0_62 = arith.constant 0 : index
    %c0_63 = arith.constant 0 : index
    %175 = vector.load %arg8[%c0_62, %c0_63] : memref<1x512xf32, #tpu.memory_space<vmem>>, vector<1x512xf32>
    %176 = vector.broadcast %175 : vector<1x512xf32> to vector<8x512xf32>
    %177 = arith.addf %174, %176 : vector<8x512xf32>
    %178 = vector.extract_strided_slice %177 {offsets = [0, 0], sizes = [8, 384], strides = [1, 1]} : vector<8x512xf32> to vector<8x384xf32>
    %179 = arith.negf %178 : vector<8x384xf32>
    %180 = math.exp %179 : vector<8x384xf32>
    %cst_64 = arith.constant 1.000000e+00 : f32
    %181 = vector.broadcast %cst_64 : f32 to vector<8x384xf32>
    %182 = arith.addf %181, %180 : vector<8x384xf32>
    %183 = arith.divf %181, %182 : vector<8x384xf32>
    %184 = vector.extract_strided_slice %183 {offsets = [0, 0], sizes = [8, 128], strides = [1, 1]} : vector<8x384xf32> to vector<8x128xf32>
    %185 = vector.extract_strided_slice %183 {offsets = [0, 128], sizes = [8, 128], strides = [1, 1]} : vector<8x384xf32> to vector<8x128xf32>
    %186 = vector.extract_strided_slice %183 {offsets = [0, 256], sizes = [8, 128], strides = [1, 1]} : vector<8x384xf32> to vector<8x128xf32>
    %187 = vector.extract_strided_slice %177 {offsets = [0, 384], sizes = [8, 128], strides = [1, 1]} : vector<8x512xf32> to vector<8x128xf32>
    %188 = math.tanh %187 : vector<8x128xf32>
    %189 = arith.mulf %185, %130 : vector<8x128xf32>
    %190 = arith.mulf %184, %188 : vector<8x128xf32>
    %191 = arith.addf %189, %190 : vector<8x128xf32>
    %192 = math.tanh %191 : vector<8x128xf32>
    %193 = arith.mulf %186, %192 : vector<8x128xf32>
    %194 = arith.index_cast %c2_i32 : i32 to index
    %c0_65 = arith.constant 0 : index
    %c0_66 = arith.constant 0 : index
    %195 = vector.load %arg14[%194, %c0_65, %c0_66] : memref<4x8x128xf32, #tpu.memory_space<vmem>>, vector<1x8x128xf32>
    %196 = vector.shape_cast %195 : vector<1x8x128xf32> to vector<8x128xf32>
    %197 = vector.shape_cast %193 : vector<8x128xf32> to vector<1x8x128xf32>
    tpu.vector_store %arg14[%194, %c0_65, %c0_66], %197 {strides = array<i32>} : memref<4x8x128xf32, #tpu.memory_space<vmem>>, vector<1x8x128xf32>,
    %c3_i32 = arith.constant 3 : i32
    %c4_i32_67 = arith.constant 4 : i32
    %198 = arith.muli %arg1, %c4_i32_67 : i32
    %199 = arith.addi %198, %c3_i32 : i32
    %c0_i32_68 = arith.constant 0 : i32
    %200 = arith.cmpi eq, %199, %c0_i32_68 : i32
    %201 = arith.extui %200 : i1 to i32
    %202 = arith.sitofp %201 : i32 to f32
    %203 = vector.broadcast %202 : f32 to vector<8x128xf32>
    %204 = arith.mulf %203, %4 : vector<8x128xf32>
    %cst_69 = arith.constant 1.000000e+00 : f32
    %205 = arith.subf %cst_69, %202 : f32
    %206 = vector.broadcast %205 : f32 to vector<8x128xf32>
    %207 = arith.mulf %206, %6 : vector<8x128xf32>
    %208 = arith.addf %204, %207 : vector<8x128xf32>
    %209 = tpu.concatenate %208, %170 in 1 : vector<8x128xf32>, vector<8x128xf32> -> vector<8x256xf32>
    %210 = arith.truncf %209 : vector<8x256xf32> to vector<8x256xbf16>
    %c0_70 = arith.constant 0 : index
    %c0_71 = arith.constant 0 : index
    %211 = vector.load %arg5[%c0_70, %c0_71] : memref<256x512xbf16, #tpu.memory_space<vmem>>, vector<256x512xbf16>
    %cst_72 = arith.constant dense<0.000000e+00> : vector<8x512xf32>
    %212 = tpu.matmul %210, %211, %cst_72 {dimension_numbers = #tpu.dot_dimension_numbers<[1], [0], [0], [1], [0, 0, 1, 1], [], []>} : vector<8x256xbf16>, vector<256x512xbf16>, vector<8x512xf32> -> vector<8x512xf32>
    %c0_73 = arith.constant 0 : index
    %c0_74 = arith.constant 0 : index
    %213 = vector.load %arg7[%c0_73, %c0_74] : memref<1x512xf32, #tpu.memory_space<vmem>>, vector<1x512xf32>
    %214 = vector.broadcast %213 : vector<1x512xf32> to vector<8x512xf32>
    %215 = arith.addf %212, %214 : vector<8x512xf32>
    %216 = vector.extract_strided_slice %215 {offsets = [0, 0], sizes = [8, 384], strides = [1, 1]} : vector<8x512xf32> to vector<8x384xf32>
    %217 = arith.negf %216 : vector<8x384xf32>
    %218 = math.exp %217 : vector<8x384xf32>
    %cst_75 = arith.constant 1.000000e+00 : f32
    %219 = vector.broadcast %cst_75 : f32 to vector<8x384xf32>
    %220 = arith.addf %219, %218 : vector<8x384xf32>
    %221 = arith.divf %219, %220 : vector<8x384xf32>
    %222 = vector.extract_strided_slice %221 {offsets = [0, 0], sizes = [8, 128], strides = [1, 1]} : vector<8x384xf32> to vector<8x128xf32>
    %223 = vector.extract_strided_slice %221 {offsets = [0, 128], sizes = [8, 128], strides = [1, 1]} : vector<8x384xf32> to vector<8x128xf32>
    %224 = vector.extract_strided_slice %221 {offsets = [0, 256], sizes = [8, 128], strides = [1, 1]} : vector<8x384xf32> to vector<8x128xf32>
    %225 = vector.extract_strided_slice %215 {offsets = [0, 384], sizes = [8, 128], strides = [1, 1]} : vector<8x512xf32> to vector<8x128xf32>
    %226 = math.tanh %225 : vector<8x128xf32>
    %227 = arith.mulf %223, %168 : vector<8x128xf32>
    %228 = arith.mulf %222, %226 : vector<8x128xf32>
    %229 = arith.addf %227, %228 : vector<8x128xf32>
    %230 = math.tanh %229 : vector<8x128xf32>
    %231 = arith.mulf %224, %230 : vector<8x128xf32>
    %232 = tpu.concatenate %231, %193 in 1 : vector<8x128xf32>, vector<8x128xf32> -> vector<8x256xf32>
    %233 = arith.truncf %232 : vector<8x256xf32> to vector<8x256xbf16>
    %c0_76 = arith.constant 0 : index
    %c0_77 = arith.constant 0 : index
    %234 = vector.load %arg6[%c0_76, %c0_77] : memref<256x512xbf16, #tpu.memory_space<vmem>>, vector<256x512xbf16>
    %cst_78 = arith.constant dense<0.000000e+00> : vector<8x512xf32>
    %235 = tpu.matmul %233, %234, %cst_78 {dimension_numbers = #tpu.dot_dimension_numbers<[1], [0], [0], [1], [0, 0, 1, 1], [], []>} : vector<8x256xbf16>, vector<256x512xbf16>, vector<8x512xf32> -> vector<8x512xf32>
    %c0_79 = arith.constant 0 : index
    %c0_80 = arith.constant 0 : index
    %236 = vector.load %arg8[%c0_79, %c0_80] : memref<1x512xf32, #tpu.memory_space<vmem>>, vector<1x512xf32>
    %237 = vector.broadcast %236 : vector<1x512xf32> to vector<8x512xf32>
    %238 = arith.addf %235, %237 : vector<8x512xf32>
    %239 = vector.extract_strided_slice %238 {offsets = [0, 0], sizes = [8, 384], strides = [1, 1]} : vector<8x512xf32> to vector<8x384xf32>
    %240 = arith.negf %239 : vector<8x384xf32>
    %241 = math.exp %240 : vector<8x384xf32>
    %cst_81 = arith.constant 1.000000e+00 : f32
    %242 = vector.broadcast %cst_81 : f32 to vector<8x384xf32>
    %243 = arith.addf %242, %241 : vector<8x384xf32>
    %244 = arith.divf %242, %243 : vector<8x384xf32>
    %245 = vector.extract_strided_slice %244 {offsets = [0, 0], sizes = [8, 128], strides = [1, 1]} : vector<8x384xf32> to vector<8x128xf32>
    %246 = vector.extract_strided_slice %244 {offsets = [0, 128], sizes = [8, 128], strides = [1, 1]} : vector<8x384xf32> to vector<8x128xf32>
    %247 = vector.extract_strided_slice %244 {offsets = [0, 256], sizes = [8, 128], strides = [1, 1]} : vector<8x384xf32> to vector<8x128xf32>
    %248 = vector.extract_strided_slice %238 {offsets = [0, 384], sizes = [8, 128], strides = [1, 1]} : vector<8x512xf32> to vector<8x128xf32>
    %249 = math.tanh %248 : vector<8x128xf32>
    %250 = arith.mulf %246, %191 : vector<8x128xf32>
    %251 = arith.mulf %245, %249 : vector<8x128xf32>
    %252 = arith.addf %250, %251 : vector<8x128xf32>
    %253 = math.tanh %252 : vector<8x128xf32>
    %254 = arith.mulf %247, %253 : vector<8x128xf32>
    %255 = arith.index_cast %c3_i32 : i32 to index
    %c0_82 = arith.constant 0 : index
    %c0_83 = arith.constant 0 : index
    %256 = vector.load %arg14[%255, %c0_82, %c0_83] : memref<4x8x128xf32, #tpu.memory_space<vmem>>, vector<1x8x128xf32>
    %257 = vector.shape_cast %256 : vector<1x8x128xf32> to vector<8x128xf32>
    %258 = vector.shape_cast %254 : vector<8x128xf32> to vector<1x8x128xf32>
    tpu.vector_store %arg14[%255, %c0_82, %c0_83], %258 {strides = array<i32>} : memref<4x8x128xf32, #tpu.memory_space<vmem>>, vector<1x8x128xf32>,
    %c4_i32_84 = arith.constant 4 : i32
    %c0_85 = arith.constant 0 : index
    %c0_86 = arith.constant 0 : index
    %c0_87 = arith.constant 0 : index
    %259 = vector.load %arg12[%c0_85, %c0_86, %c0_87] : memref<2x8x128xf32, #tpu.memory_space<vmem>>, vector<1x8x128xf32>
    %260 = vector.shape_cast %259 : vector<1x8x128xf32> to vector<8x128xf32>
    %261 = vector.shape_cast %231 : vector<8x128xf32> to vector<1x8x128xf32>
    tpu.vector_store %arg12[%c0_85, %c0_86, %c0_87], %261 {strides = array<i32>} : memref<2x8x128xf32, #tpu.memory_space<vmem>>, vector<1x8x128xf32>,
    %c0_88 = arith.constant 0 : index
    %c0_89 = arith.constant 0 : index
    %c0_90 = arith.constant 0 : index
    %262 = vector.load %arg13[%c0_88, %c0_89, %c0_90] : memref<2x8x128xf32, #tpu.memory_space<vmem>>, vector<1x8x128xf32>
    %263 = vector.shape_cast %262 : vector<1x8x128xf32> to vector<8x128xf32>
    %264 = vector.shape_cast %229 : vector<8x128xf32> to vector<1x8x128xf32>
    tpu.vector_store %arg13[%c0_88, %c0_89, %c0_90], %264 {strides = array<i32>} : memref<2x8x128xf32, #tpu.memory_space<vmem>>, vector<1x8x128xf32>,
    %c1_91 = arith.constant 1 : index
    %c0_92 = arith.constant 0 : index
    %c0_93 = arith.constant 0 : index
    %265 = vector.load %arg12[%c1_91, %c0_92, %c0_93] : memref<2x8x128xf32, #tpu.memory_space<vmem>>, vector<1x8x128xf32>
    %266 = vector.shape_cast %265 : vector<1x8x128xf32> to vector<8x128xf32>
    %267 = vector.shape_cast %254 : vector<8x128xf32> to vector<1x8x128xf32>
    tpu.vector_store %arg12[%c1_91, %c0_92, %c0_93], %267 {strides = array<i32>} : memref<2x8x128xf32, #tpu.memory_space<vmem>>, vector<1x8x128xf32>,
    %c1_94 = arith.constant 1 : index
    %c0_95 = arith.constant 0 : index
    %c0_96 = arith.constant 0 : index
    %268 = vector.load %arg13[%c1_94, %c0_95, %c0_96] : memref<2x8x128xf32, #tpu.memory_space<vmem>>, vector<1x8x128xf32>
    %269 = vector.shape_cast %268 : vector<1x8x128xf32> to vector<8x128xf32>
    %270 = vector.shape_cast %252 : vector<8x128xf32> to vector<1x8x128xf32>
    tpu.vector_store %arg13[%c1_94, %c0_95, %c0_96], %270 {strides = array<i32>} : memref<2x8x128xf32, #tpu.memory_space<vmem>>, vector<1x8x128xf32>,
    %c0_97 = arith.constant 0 : index
    %c0_98 = arith.constant 0 : index
    %c0_99 = arith.constant 0 : index
    %271 = vector.load %arg14[%c0_97, %c0_98, %c0_99] : memref<4x8x128xf32, #tpu.memory_space<vmem>>, vector<4x8x128xf32>
    %272 = vector.shape_cast %271 : vector<4x8x128xf32> to vector<32x128xf32>
    %273 = arith.truncf %272 : vector<32x128xf32> to vector<32x128xbf16>
    %c0_100 = arith.constant 0 : index
    %c0_101 = arith.constant 0 : index
    %274 = vector.load %arg9[%c0_100, %c0_101] : memref<128x128xbf16, #tpu.memory_space<vmem>>, vector<128x128xbf16>
    %cst_102 = arith.constant dense<0.000000e+00> : vector<32x128xf32>
    %275 = tpu.matmul %273, %274, %cst_102 {dimension_numbers = #tpu.dot_dimension_numbers<[1], [0], [0], [1], [0, 0, 1, 1], [], []>} : vector<32x128xbf16>, vector<128x128xbf16>, vector<32x128xf32> -> vector<32x128xf32>
    %c0_103 = arith.constant 0 : index
    %c0_104 = arith.constant 0 : index
    %276 = vector.load %arg10[%c0_103, %c0_104] : memref<1x128xf32, #tpu.memory_space<vmem>>, vector<1x128xf32>
    %277 = vector.broadcast %276 : vector<1x128xf32> to vector<32x128xf32>
    %278 = arith.addf %275, %277 : vector<32x128xf32>
    %279 = vector.shape_cast %278 : vector<32x128xf32> to vector<4x8x128xf32>
    %c0_105 = arith.constant 0 : index
    %c0_106 = arith.constant 0 : index
    %c0_107 = arith.constant 0 : index
    %280 = vector.load %arg11[%c0_105, %c0_106, %c0_107] : memref<4x8x128xf32, #tpu.memory_space<vmem>>, vector<4x8x128xf32>
    tpu.vector_store %arg11[%c0_105, %c0_106, %c0_107], %279 {strides = array<i32>} : memref<4x8x128xf32, #tpu.memory_space<vmem>>, vector<4x8x128xf32>,
    return
  }
  func.func @transform_0(%arg0: i32, %arg1: i32) -> (i32, i32, i32) {
    %c0_i32 = arith.constant 0 : i32
    %c0_i32_0 = arith.constant 0 : i32
    %c0_i32_1 = arith.constant 0 : i32
    return %c0_i32, %arg0, %c0_i32_0 : i32, i32, i32
  }
  func.func @transform_1(%arg0: i32, %arg1: i32) -> (i32, i32, i32) {
    %c0_i32 = arith.constant 0 : i32
    %c0_i32_0 = arith.constant 0 : i32
    %c0_i32_1 = arith.constant 0 : i32
    return %c0_i32, %arg0, %c0_i32_0 : i32, i32, i32
  }
  func.func @transform_2(%arg0: i32, %arg1: i32) -> (i32, i32, i32) {
    %c0_i32 = arith.constant 0 : i32
    %c0_i32_0 = arith.constant 0 : i32
    %c0_i32_1 = arith.constant 0 : i32
    return %c0_i32, %arg0, %c0_i32_0 : i32, i32, i32
  }
  func.func @transform_3(%arg0: i32, %arg1: i32) -> (i32, i32) {
    %c0_i32 = arith.constant 0 : i32
    %c0_i32_0 = arith.constant 0 : i32
    %c0_i32_1 = arith.constant 0 : i32
    return %c0_i32, %c0_i32_0 : i32, i32
  }
  func.func @transform_4(%arg0: i32, %arg1: i32) -> (i32, i32) {
    %c0_i32 = arith.constant 0 : i32
    %c0_i32_0 = arith.constant 0 : i32
    %c0_i32_1 = arith.constant 0 : i32
    return %c0_i32, %c0_i32_0 : i32, i32
  }
  func.func @transform_5(%arg0: i32, %arg1: i32) -> (i32, i32) {
    %c0_i32 = arith.constant 0 : i32
    %c0_i32_0 = arith.constant 0 : i32
    %c0_i32_1 = arith.constant 0 : i32
    return %c0_i32, %c0_i32_0 : i32, i32
  }
  func.func @transform_6(%arg0: i32, %arg1: i32) -> (i32, i32) {
    %c0_i32 = arith.constant 0 : i32
    %c0_i32_0 = arith.constant 0 : i32
    %c0_i32_1 = arith.constant 0 : i32
    return %c0_i32, %c0_i32_0 : i32, i32
  }
  func.func @transform_7(%arg0: i32, %arg1: i32) -> (i32, i32) {
    %c0_i32 = arith.constant 0 : i32
    %c0_i32_0 = arith.constant 0 : i32
    %c0_i32_1 = arith.constant 0 : i32
    return %c0_i32, %c0_i32_0 : i32, i32
  }
  func.func @transform_8(%arg0: i32, %arg1: i32) -> (i32, i32) {
    %c0_i32 = arith.constant 0 : i32
    %c0_i32_0 = arith.constant 0 : i32
    %c0_i32_1 = arith.constant 0 : i32
    return %c0_i32, %c0_i32_0 : i32, i32
  }
  func.func @transform_9(%arg0: i32, %arg1: i32) -> (i32, i32, i32) {
    %c0_i32 = arith.constant 0 : i32
    %c0_i32_0 = arith.constant 0 : i32
    return %arg1, %arg0, %c0_i32 : i32, i32, i32
  }
}

</mosaic_0001>

<bundles_post_ra>
// kernel: tpu_custom_call.1
= control target key start
LH: loop header
LB: loop body
LE: loop exit
PB: predicated region body
PF: predicated region fallthrough
CT: control target
= control target key end

     0   :  { %s7712_s0 = inlined_call_operand.hbm [shape: f32[2,8,128], index: 0, kind: input, shape index: {}]   ;;  %s7713_s1 = inlined_call_operand.hbm [shape: f32[2,8,128], index: 1, kind: input, shape index: {}]   ;;  %s7714_s2 = inlined_call_operand.hbm [shape: f32[2,8,128], index: 2, kind: input, shape index: {}]   ;;  %s7715_s3 = inlined_call_operand.hbm [shape: bf16[256,512], index: 3, kind: input, shape index: {}]   ;;  %s7716_s4 = inlined_call_operand.hbm [shape: bf16[256,512], index: 4, kind: input, shape index: {}]   ;;  %s7717_s5 = inlined_call_operand.vmem [shape: f32[1,512], index: 5, kind: input, shape index: {}]   ;;  %s7718_s6 = inlined_call_operand.vmem [shape: f32[1,512], index: 6, kind: input, shape index: {}]   ;;  %s7719_s7 = inlined_call_operand.hbm [shape: bf16[128,128], index: 7, kind: input, shape index: {}]   ;;  %s7720_s8 = inlined_call_operand.vmem [shape: f32[1,128], index: 8, kind: input, shape index: {}]   ;;  %s7721_s9 = inlined_call_operand.hbm [shape: f32[8,8,128], index: 9, kind: output, shape index: {}]  }
   0x1   :  { %7873 = sst [smem:[#allocation117_spill]] %s7713_s1 }
   0x2   :  { %14 = vsyncpa [#allocation6], 0 }
   0x3   :  { %15 = vsyncpa [#allocation9], 0 }
   0x4   :  { %16 = vsyncpa [#allocation12], 0 }
   0x5   :  { %17 = vsyncpa [#allocation15], 0 }
   0x6   :  { %18 = vsyncpa [#allocation7], 0 }
   0x7   :  { %20 = vsyncpa [#allocation7 + $0x1], 0  ;;  %s6490_s30 = smov 0   ;;  %s6492_s10 = smov 0  }
   0x8   :  { %s6494_s11 = smov 0   ;;  %s6496_s12 = smov 0  }
   0x9   :  { %s6498_s13 = smov 0   ;;  %s6500_s14 = smov 0  }
   0xa LB: > { %7874 = sst [smem:[#allocation22_spill]] %s6419_s13  ;;  %s4888_s15 = sadd.s32 4294967295, %s6423_s14   ;;  %s6423_s14 = sphi %s6500_s14, %s26_s14   ;;  %s6419_s13 = sphi %s6498_s13, %s8173_s13   ;;  %s6415_s12 = sphi %s6496_s12, %s8172_s12   ;;  %s6411_s11 = sphi %s6494_s11, %s8176_s11   ;;  %s6407_s10 = sphi %s6492_s10, %s8175_s10   ;;  %s6403_s30 = sphi %s6490_s30, %s8174_s30  }
   0xb   : > { %s4889_s16 = sadd.s32 4294967294, %s6423_s14   ;;  %s35_s17 = sadd.s32 1, %s6419_s13 }
   0xc   : > { %s251_s18 = sadd.s32 1, %s6411_s11  ;;  %p36_p0 = scmp.ge.s32.totalorder %s35_s17, 2 }
   0xd   : > { %p261_p1 = scmp.ne.s32.totalorder %s6411_s11, %s6407_s10  ;;  %p262_p2 = scmp.eq.s32.totalorder %s4888_s15, 1 }
   0xe   : > { %p267_p3 = scmp.ne.s32.totalorder %s6407_s10, %s6403_s30  ;;  %s8178_s17 = smov (%p36_p0, %s35_s17), 0 }
   0xf   : > { %7875 = sst [smem:[#allocation23_spill]] %s8178_s17  ;;  %p6530_p4 = por %p262_p2, %p261_p1 }
  0x10   : > { %p268_p5 = scmp.eq.s32.totalorder %s4889_s16, 1  ;;  %s246_s20 = ssub.s32 %s6419_s13, %s8178_s17 }
  0x11   : > { %p4890_p6 = scmp.ge.s32.totalorder %s6423_s14, 1  ;;  %p249_p7 = scmp.eq.s32.totalorder %s246_s20, 0 }
  0x12   : > { %p6537_p8 = por %p268_p5, %p267_p3  ;;  %p275_p9 = scmp.lt.s32.totalorder %s6423_s14, 3 }
  0x13   : > { %s6543_s22 = scalar_select %p249_p7, %s6411_s11, %s251_s18  }
  0x14   : > { %s7877_s21 = scalar_select %p6537_p8, 1, 0 }
  0x15   : > { %7878 = sst [smem:[#allocation24_spill]] %s6543_s22  ;;  %p6545_p10 = pnand %p4890_p6, %p275_p9 }
  0x16   : > { %p6549_p11 = scmp.eq.s32.totalorder %s4888_s15, 0  ;;  %s6425_s25 = smov [#allocation8]  }
  0x17   : > { %p5514_p12 = pneg %p6545_p10  ;;  %s304_s26 = sshll.u32 %s6425_s25, 4  ;;  %s305_s26 = int_to_ptr.vmem [resolvable:$true] %s304_s26 }
  0x18   : > { %s6426_s28 = smov [#allocation11]   ;;  %s6186_s16 = scalar_lea.vmem %s305_s26, 256 }
  0x19   : > { %p6557_p13 = pnand %p6549_p11, %p5514_p12  ;;  %s332_s29 = sshll.u32 %s6426_s28, 4  ;;  %s333_s29 = int_to_ptr.vmem [resolvable:$true] %s332_s29 }
  0x1a   : > { %p6187_p1 = scmp.ne.s32.totalorder %s305_s26, %s6186_s16  ;;  %p6194_p5 = scmp.lt.s32.totalorder %s305_s26, %s305_s26 }
  0x1b   : > { %p6563_p0 = pneg %p6557_p13  ;;  %p6195_p6 = scmp.lt.s32.totalorder %s6186_s16, %s6186_s16 }
  0x1d   : > { %p6189_p2 = pnand %p6187_p1, %p6563_p0  ;;  %p6196_p7 = por %p6195_p6, %p6194_p5 }
  0x1f   : > { %p6190_p3 = pneg %p6189_p2 }
  0x21   : > { %p6197_p9 = pnand %p6196_p7, %p6190_p3 }
  0x23   : > { %6200 = shalt.err (!%p6197_p9)
}
  0x24   : > { %s7724_s18 = smov 128   ;;  %s7726_s20 = smov 8  }
  0x25   : > { %s7883_s1 = sld [smem:[#allocation117_spill]]  ;;  %s6212_s17 = scalar_lea.vmem %s333_s29, 8192 }
  0x26   : > { %p6213_p12 = scmp.ne.s32.totalorder %s333_s29, %s6212_s17  ;;  %p6220_p5 = scmp.lt.s32.totalorder %s333_s29, %s333_s29 }
  0x27   : > { %p6221_p3 = scmp.lt.s32.totalorder %s6212_s17, %s6212_s17 }
  0x28   : > { %p6215_p1 = pnand %p6213_p12, %p6563_p0 }
  0x29   : > { %p6222_p6 = por %p6221_p3, %p6220_p5 }
  0x2a   : > { %p6216_p2 = pneg %p6215_p1 }
  0x2b   : > { %5520 = dma.hbm_to_vmem [thread:$0]  (!%p6557_p13), %s7883_s1, 256, %s305_s26, [#allocation9], %s7724_s18, %s7724_s18, %s7726_s20  }
  0x2c   : > { %p6223_p7 = pnand %p6222_p6, %p6216_p2 }
  0x2e   : > { %6226 = shalt.err (!%p6223_p7)
}
  0x2f   : > { %s7728_s16 = smov 256   ;;  %s7729_s13 = smov 16  }
  0x30   : > { %5526 = dma.hbm_to_vmem [thread:$0]  (!%p6557_p13), %s7715_s3, 8192, %s333_s29, [#allocation12], %s7728_s16, %s7728_s16, %s7729_s13  }
  0x31   : > { %s6431_s28 = smov [#allocation5]   ;;  %s6432_s20 = smov [#allocation10]  }
  0x32   : > { %s289_s18 = sshll.u32 %s6431_s28, 4  ;;  %s319_s17 = sshll.u32 %s6432_s20, 4  ;;  %s290_s18 = int_to_ptr.vmem [resolvable:$true] %s289_s18  ;;  %s320_s17 = int_to_ptr.vmem [resolvable:$true] %s319_s17 }
  0x33   : > { %s6238_s1 = scalar_lea.vmem %s290_s18, 256  ;;  %p6246_p2 = scmp.lt.s32.totalorder %s290_s18, %s290_s18 }
  0x34   : > { %p6239_p9 = scmp.ne.s32.totalorder %s290_s18, %s6238_s1  ;;  %p6247_p5 = scmp.lt.s32.totalorder %s6238_s1, %s6238_s1 }
  0x36   : > { %p6241_p12 = pnand %p6239_p9, %p6563_p0  ;;  %p6248_p3 = por %p6247_p5, %p6246_p2 }
  0x38   : > { %p6242_p1 = pneg %p6241_p12 }
  0x3a   : > { %p6249_p6 = pnand %p6248_p3, %p6242_p1 }
  0x3c   : > { %6252 = shalt.err (!%p6249_p6)
}
  0x3d   : > { %s7884_s22 = smov 8   ;;  %s7885_s25 = smov 128  }
  0x3e   : > { %5517 = dma.hbm_to_vmem [thread:$0]  (!%p6557_p13), %s7712_s0, 256, %s290_s18, [#allocation6], %s7885_s25, %s7885_s25, %s7884_s22  }
  0x3f   : > { %s6264_s20 = scalar_lea.vmem %s320_s17, 256  ;;  %p6272_p8 = scmp.lt.s32.totalorder %s320_s17, %s320_s17 }
  0x40   : > { %p6265_p7 = scmp.ne.s32.totalorder %s320_s17, %s6264_s20  ;;  %p6273_p2 = scmp.lt.s32.totalorder %s6264_s20, %s6264_s20 }
  0x42   : > { %p6267_p9 = pnand %p6265_p7, %p6563_p0  ;;  %p6274_p1 = por %p6273_p2, %p6272_p8 }
  0x44   : > { %p6268_p12 = pneg %p6267_p9 }
  0x46   : > { %p6275_p5 = pnand %p6274_p1, %p6268_p12 }
  0x48   : > { %6278 = shalt.err (!%p6275_p5)
}
  0x49   : > { %5523 = dma.hbm_to_vmem [thread:$0]  (!%p6557_p13), %s7714_s2, 256, %s320_s17, [#allocation9], %s7885_s25, %s7885_s25, %s7884_s22  }
  0x4a   : > { %s6433_s18 = smov [#allocation13]   ;;  %s6434_s26 = smov [#allocation14]  }
  0x4b   : > { %s345_s29 = sshll.u32 %s6433_s18, 4  ;;  %s364_s16 = sshll.u32 %s6434_s26, 4  ;;  %s346_s29 = int_to_ptr.vmem [resolvable:$true] %s345_s29  ;;  %s365_s16 = int_to_ptr.vmem [resolvable:$true] %s364_s16 }
  0x4c   : > { %s6290_s13 = scalar_lea.vmem %s346_s29, 8192  ;;  %p6298_p7 = scmp.lt.s32.totalorder %s346_s29, %s346_s29 }
  0x4d   : > { %p6291_p3 = scmp.ne.s32.totalorder %s346_s29, %s6290_s13  ;;  %p6299_p9 = scmp.lt.s32.totalorder %s6290_s13, %s6290_s13 }
  0x4f   : > { %p6293_p8 = pnand %p6291_p3, %p6563_p0  ;;  %p6300_p12 = por %p6299_p9, %p6298_p7 }
  0x51   : > { %p6294_p6 = pneg %p6293_p8 }
  0x53   : > { %p6301_p2 = pnand %p6300_p12, %p6294_p6 }
  0x55   : > { %6304 = shalt.err (!%p6301_p2)
}
  0x56   : > { %s7886_s20 = smov 16   ;;  %s7887_s1 = smov 256  }
  0x57   : > { %5529 = dma.hbm_to_vmem [thread:$0]  (!%p6557_p13), %s7716_s4, 8192, %s346_s29, [#allocation12], %s7887_s1, %s7887_s1, %s7886_s20  }
  0x58   : > { %s6316_s25 = scalar_lea.vmem %s365_s16, 1024  ;;  %p6324_p8 = scmp.lt.s32.totalorder %s365_s16, %s365_s16 }
  0x59   : > { %p6317_p1 = scmp.ne.s32.totalorder %s365_s16, %s6316_s25  ;;  %p6325_p7 = scmp.lt.s32.totalorder %s6316_s25, %s6316_s25 }
  0x5b   : > { %p6319_p5 = pnand %p6317_p1, %p6563_p0  ;;  %p6326_p6 = por %p6325_p7, %p6324_p8 }
  0x5d   : > { %p6320_p3 = pneg %p6319_p5 }
  0x5f   : > { %p6327_p9 = pnand %p6326_p6, %p6320_p3 }
  0x61   : > { %6330 = shalt.err (!%p6327_p9)
}
  0x62   : > { %s6435_s13 = smov 64   ;;  %s6436_s28 = smov 4  }
  0x63   : > { %5532 = dma.hbm_to_vmem [thread:$0]  (!%p6557_p13), %s7719_s7, 1024, %s365_s16, [#allocation15], %s6435_s13, %s6435_s13, %s6436_s28  }
  0x64   : > { %383 = sbr.rel (%p6545_p10) target bundleno = 1849 (0x739), region = 56 }
  0x69   : > { %6382 = dma.done.wait (%p6549_p11), [#allocation6], 256  }
  0x6a   : > { %6384 = vsyncadd (%p6549_p11), [#allocation6], 4294967040 }
  0x6b   : > { %6386 = dma.done.wait (%p6549_p11), [#allocation9], 512  }
  0x6c   : > { %6388 = vsyncadd (%p6549_p11), [#allocation9], 4294966784 }
  0x6d   : > { %6390 = dma.done.wait (%p6549_p11), [#allocation12], 16384  }
  0x6e   : > { %6392 = vsyncadd (%p6549_p11), [#allocation12], 4294950912 }
  0x6f   : > { %6394 = dma.done.wait (%p6549_p11), [#allocation15], 1024  }
  0x70   : > { %6396 = vsyncadd (%p6549_p11), [#allocation15], 4294966272  ;;  %s431_s23 = sand.u32 1, %s6407_s10   ;;  %p4905_p10 = scmp.ne.s32.totalorder %s6415_s12, 0 }
  0x71   : > { %s4904_s27 = sshll.u32 %s431_s23, 5 }
  0x72   : > { %s6645_s15 = scalar_lea.vmem [#allocation16], %s4904_s27  ;;  %439 = sbr.rel (%p4905_p10) target bundleno = 122 (0x7a), region = 84 }
  0x77   : > { %v440_v0 = vld [vmem:[#allocation8] sm:$0xff]  ;;  %v441_v1 = vld [vmem:[#allocation8 + $0x8] sm:$0xff]  ;;  %v444_v2 = vld [vmem:[#allocation10] sm:$0xff] }
  0x78   : > { %442 = vst [vmem:[#allocation2] sm:$0xff] %v440_v0  ;;  %443 = vst [vmem:[#allocation2 + $0x8] sm:$0xff] %v441_v1  ;;  %v445_v3 = vld [vmem:[#allocation10 + $0x8] sm:$0xff] }
  0x79   : > { %446 = vst [vmem:[#allocation3 + $0x8] sm:$0xff] %v444_v2  ;;  %447 = vst [vmem:[#allocation3] sm:$0xff] %v445_v3 }
  0x7a PF: > { %v5612_v4 = vld [vmem:[#allocation11 + $0xe4] ss:$16 sps:$4 sm:$0xff]   ;;  %v5614_v5 = vld [vmem:[#allocation11 + $0xe0] ss:$16 sps:$4 sm:$0xff]   ;;  %v5623_v9 = vld [vmem:[#allocation11 + $0xec] ss:$16 sps:$4 sm:$0xff]  }
  0x7b   : > { %875 = vmatprep.subr.bf16.mxu0 %v5612_v4  ;;  %v5615_v6 = vld [vmem:[#allocation11 + $0xc4] ss:$16 sps:$4 sm:$0xff]   ;;  %v5617_v7 = vld [vmem:[#allocation11 + $0xc0] ss:$16 sps:$4 sm:$0xff]   ;;  %v5626_v10 = vld [vmem:[#allocation11 + $0xe8] ss:$16 sps:$4 sm:$0xff]   ;;  %916 = vmatprep.subr.bf16.mxu1 %v5623_v9 }
  0x7c   : > { %876 = vmatpush1.bf16.msra.mxu0 %v5614_v5  ;;  %v5618_v8 = vld [vmem:[#allocation11 + $0xa4] ss:$16 sps:$4 sm:$0xff]   ;;  %v5620_v11 = vld [vmem:[#allocation11 + $0xa0] ss:$16 sps:$4 sm:$0xff]   ;;  %917 = vmatpush1.bf16.msra.mxu1 %v5626_v10  ;;  %v5629_v13 = vld [vmem:[#allocation11 + $0xcc] ss:$16 sps:$4 sm:$0xff]  }
  0x7d   : > { %877 = vmatprep.subr.bf16.mxu0 %v5615_v6  ;;  %v5621_v12 = vld [vmem:[#allocation11 + $0x84] ss:$16 sps:$4 sm:$0xff]   ;;  %v5632_v14 = vld [vmem:[#allocation11 + $0xc8] ss:$16 sps:$4 sm:$0xff]   ;;  %918 = vmatprep.subr.bf16.mxu1 %v5629_v13  ;;  %v5625_v15 = vld [vmem:[#allocation11 + $0x80] ss:$16 sps:$4 sm:$0xff]  }
  0x7e   : > { %v5627_v16 = vld [vmem:[#allocation11 + $0x64] ss:$16 sps:$4 sm:$0xff]   ;;  %v5635_v17 = vld [vmem:[#allocation11 + $0xac] ss:$16 sps:$4 sm:$0xff]   ;;  %v5638_v18 = vld [vmem:[#allocation11 + $0xa8] ss:$16 sps:$4 sm:$0xff]  }
  0x7f   : > { %v5641_v19 = vld [vmem:[#allocation11 + $0x8c] ss:$16 sps:$4 sm:$0xff]   ;;  %v5631_v20 = vld [vmem:[#allocation11 + $0x60] ss:$16 sps:$4 sm:$0xff]   ;;  %v5633_v21 = vld [vmem:[#allocation11 + $0x44] ss:$16 sps:$4 sm:$0xff]  }
  0x80   : > { %878 = vmatpush1.bf16.msra.mxu0 %v5617_v7  ;;  %919 = vmatpush1.bf16.msra.mxu1 %v5632_v14  ;;  %v5644_v22 = vld [vmem:[#allocation11 + $0x88] ss:$16 sps:$4 sm:$0xff]   ;;  %v5647_v23 = vld [vmem:[#allocation11 + $0x6c] ss:$16 sps:$4 sm:$0xff]   ;;  %v5637_v24 = vld [vmem:[#allocation11 + $0x40] ss:$16 sps:$4 sm:$0xff]  }
  0x81   : > { %879 = vmatprep.subr.bf16.mxu0 %v5618_v8  ;;  %920 = vmatprep.subr.bf16.mxu1 %v5635_v17  ;;  %v5639_v25 = vld [vmem:[#allocation11 + $0x24] ss:$16 sps:$4 sm:$0xff]   ;;  %v5650_v26 = vld [vmem:[#allocation11 + $0x68] ss:$16 sps:$4 sm:$0xff]   ;;  %v5653_v27 = vld [vmem:[#allocation11 + $0x4c] ss:$16 sps:$4 sm:$0xff]  }
  0x82   : > { %v5643_v28 = vld [vmem:[#allocation11 + $0x20] ss:$16 sps:$4 sm:$0xff]   ;;  %v5645_v29 = vld [vmem:[#allocation11 + $0x4] ss:$16 sps:$4 sm:$0xff]   ;;  %v5656_v30 = vld [vmem:[#allocation11 + $0x48] ss:$16 sps:$4 sm:$0xff]  }
  0x83   : > { %v5659_v31 = vld [vmem:[#allocation11 + $0x2c] ss:$16 sps:$4 sm:$0xff]   ;;  %v5649_v32 = vld [vmem:[#allocation11] ss:$16 sps:$4 sm:$0xff]   ;;  %v5651_v33 = vld [vmem:[#allocation11 + $0x1e4] ss:$16 sps:$4 sm:$0xff]  }
  0x84   : > { %880 = vmatpush1.bf16.msra.mxu0 %v5620_v11  ;;  %921 = vmatpush1.bf16.msra.mxu1 %v5638_v18  ;;  %v5662_v34 = vld [vmem:[#allocation11 + $0x28] ss:$16 sps:$4 sm:$0xff]   ;;  %v5665_v35 = vld [vmem:[#allocation11 + $0xc] ss:$16 sps:$4 sm:$0xff]   ;;  %v5655_v36 = vld [vmem:[#allocation11 + $0x1e0] ss:$16 sps:$4 sm:$0xff]  }
  0x85   : > { %881 = vmatprep.subr.bf16.mxu0 %v5621_v12  ;;  %922 = vmatprep.subr.bf16.mxu1 %v5641_v19  ;;  %v5657_v37 = vld [vmem:[#allocation11 + $0x1c4] ss:$16 sps:$4 sm:$0xff]   ;;  %v5668_v38 = vld [vmem:[#allocation11 + $0x8] ss:$16 sps:$4 sm:$0xff]   ;;  %s6649_s24 = sshll.u32 %s6415_s12, 2  ;;  %s5457_s26 = sshll.u32 %s6415_s12, 9 }
  0x86   : > { %v5671_v39 = vld [vmem:[#allocation11 + $0x1ec] ss:$16 sps:$4 sm:$0xff]   ;;  %v5661_v40 = vld [vmem:[#allocation11 + $0x1c0] ss:$16 sps:$4 sm:$0xff]   ;;  %v5663_v41 = vld [vmem:[#allocation11 + $0x1a4] ss:$16 sps:$4 sm:$0xff]  }
  0x87   : > { %p458_p11 = scmp.eq.s32.totalorder %s6649_s24, 0  ;;  %v5674_v42 = vld [vmem:[#allocation11 + $0x1e8] ss:$16 sps:$4 sm:$0xff]   ;;  %v5677_v43 = vld [vmem:[#allocation11 + $0x1cc] ss:$16 sps:$4 sm:$0xff]   ;;  %v451_v44 = vld [vmem:[#allocation2] sm:$0xff] }
  0x88   : > { %882 = vmatpush1.bf16.msra.mxu0 %v5625_v15  ;;  %923 = vmatpush1.bf16.msra.mxu1 %v5644_v22  ;;  %v5667_v45 = vld [vmem:[#allocation11 + $0x1a0] ss:$16 sps:$4 sm:$0xff]   ;;  %v468_v46 = vpack.c.bf16 %v451_v44, %v451_v44  ;;  %v6654_v47 = vld [vmem:[#allocation11 + $0x184] ss:$16 sps:$4 sm:$0xff]   ;;  %v6656_v48 = vld [vmem:[#allocation11 + $0x1c8] ss:$16 sps:$4 sm:$0xff]  }
  0x89   : > { %883 = vmatprep.subr.bf16.mxu0 %v5627_v16  ;;  %924 = vmatprep.subr.bf16.mxu1 %v5647_v23  ;;  %s6652_s16 = scalar_select %p458_p11, 1, 0  ;;  %v6658_v49 = vld [vmem:[#allocation11 + $0x1ac] ss:$16 sps:$4 sm:$0xff]   ;;  %v6660_v50 = vld [vmem:[#allocation11 + $0x180] ss:$16 sps:$4 sm:$0xff]  }
  0x8a   : > { %907 = vmatprep.mubr.bf16.mxu0 %v468_v46  ;;  %948 = vmatprep.mubr.bf16.mxu1 %v468_v46  ;;  %v6664_v51 = vld [vmem:[#allocation11 + $0x164] ss:$16 sps:$4 sm:$0xff]   ;;  %v6667_v52 = vld [vmem:[#allocation11 + $0x1a8] ss:$16 sps:$4 sm:$0xff]   ;;  %v6670_v53 = vld [vmem:[#allocation11 + $0x18c] ss:$16 sps:$4 sm:$0xff]  }
  0x8b   : > { %s460_s29 = scvt.s32.f32 %s6652_s16  ;;  %v6673_v54 = vld [vmem:[#allocation11 + $0x160] ss:$16 sps:$4 sm:$0xff]   ;;  %v6675_v55 = vld [vmem:[#allocation11 + $0x144] ss:$16 sps:$4 sm:$0xff]   ;;  %v6679_v56 = vld [vmem:[#allocation11 + $0x188] ss:$16 sps:$4 sm:$0xff]  }
  0x8c   : > { %884 = vmatpush1.bf16.msra.mxu0 %v5631_v20  ;;  %925 = vmatpush1.bf16.msra.mxu1 %v5650_v26  ;;  %v6681_v57 = vld [vmem:[#allocation11 + $0x16c] ss:$16 sps:$4 sm:$0xff]   ;;  %v6683_v58 = vld [vmem:[#allocation11 + $0x140] ss:$16 sps:$4 sm:$0xff]   ;;  %v6690_v61 = vld [vmem:[#allocation11 + $0x124] ss:$16 sps:$4 sm:$0xff]  }
  0x8d   : > { %885 = vmatprep.subr.bf16.mxu0 %v5633_v21  ;;  %926 = vmatprep.subr.bf16.mxu1 %v5653_v27  ;;  %s463_s20 = ssub.f32 1.0, %s460_s29  ;;  %v6686_v59 = vld [vmem:[#allocation5] sm:$0xff]  ;;  %v6688_v60 = vld [vmem:[#allocation5 + $0x8] sm:$0xff]  ;;  %v461_v63 = vstv %s460_s29  ;;  %s1496_s17 = sadd.s32 1, %s6649_s24 }
  0x8e   : > { %v6692_v62 = vld [vmem:[#allocation11 + $0x168] ss:$16 sps:$4 sm:$0xff]   ;;  %v6695_v1 = vld [vmem:[#allocation11 + $0x14c] ss:$16 sps:$4 sm:$0xff]   ;;  %v6699_v2 = vld [vmem:[#allocation11 + $0x120] ss:$16 sps:$4 sm:$0xff]   ;;  %v462_v4 = vmul.f32 %v461_v63, %v6686_v59 }
  0x8f   : > { %v464_v0 = vstv %s463_s20  ;;  %v6702_v3 = vld [vmem:[#allocation11 + $0x104] ss:$16 sps:$4 sm:$0xff]   ;;  %v6706_v6 = vld [vmem:[#allocation11 + $0x148] ss:$16 sps:$4 sm:$0xff]   ;;  %v6709_v7 = vld [vmem:[#allocation11 + $0x12c] ss:$16 sps:$4 sm:$0xff]  }
  0x90   : > { %886 = vmatpush1.bf16.msra.mxu0 %v5637_v24  ;;  %927 = vmatpush1.bf16.msra.mxu1 %v5656_v30  ;;  %v465_v5 = vmul.f32 %v464_v0, %v6688_v60  ;;  %v6713_v8 = vld [vmem:[#allocation11 + $0x100] ss:$16 sps:$4 sm:$0xff]   ;;  %v6716_v10 = vld [vmem:[#allocation11 + $0x128] ss:$16 sps:$4 sm:$0xff]   ;;  %v6718_v11 = vld [vmem:[#allocation13 + $0xe4] ss:$16 sps:$4 sm:$0xff]  }
  0x91   : > { %887 = vmatprep.subr.bf16.mxu0 %v5639_v25  ;;  %928 = vmatprep.subr.bf16.mxu1 %v5659_v31  ;;  %v6721_v12 = vld [vmem:[#allocation11 + $0x10c] ss:$16 sps:$4 sm:$0xff]   ;;  %v6726_v13 = vld [vmem:[#allocation13 + $0xe0] ss:$16 sps:$4 sm:$0xff]   ;;  %v6728_v15 = vld [vmem:[#allocation11 + $0x108] ss:$16 sps:$4 sm:$0xff]  }
  0x92   : > { %v466_v9 = vadd.f32 %v465_v5, %v462_v4  ;;  %v6730_v16 = vld [vmem:[#allocation13 + $0xc4] ss:$16 sps:$4 sm:$0xff]   ;;  %v6733_v17 = vld [vmem:[#allocation13 + $0xec] ss:$16 sps:$4 sm:$0xff]   ;;  %v6738_v18 = vld [vmem:[#allocation13 + $0xc0] ss:$16 sps:$4 sm:$0xff]  }
  0x93   : > { %v6740_v19 = vld [vmem:[#allocation13 + $0xe8] ss:$16 sps:$4 sm:$0xff]   ;;  %v6743_v20 = vld [vmem:[#allocation13 + $0xcc] ss:$16 sps:$4 sm:$0xff]   ;;  %v6754_v22 = vld [vmem:[#allocation13 + $0xa4] ss:$16 sps:$4 sm:$0xff]  }
  0x94   : > { %888 = vmatpush1.bf16.msra.mxu0 %v5643_v28  ;;  %929 = vmatpush1.bf16.msra.mxu1 %v5662_v34  ;;  %v467_v14 = vpack.c.bf16 %v466_v9, %v466_v9  ;;  %v6748_v21 = vld [vmem:[#allocation13 + $0xc8] ss:$16 sps:$4 sm:$0xff]   ;;  %v6756_v23 = vld [vmem:[#allocation13 + $0xa0] ss:$16 sps:$4 sm:$0xff]   ;;  %v6758_v24 = vld [vmem:[#allocation13 + $0xac] ss:$16 sps:$4 sm:$0xff]  }
  0x95   : > { %889 = vmatprep.subr.bf16.mxu0 %v5645_v29  ;;  %930 = vmatprep.subr.bf16.mxu1 %v5665_v35  ;;  %v6761_v25 = vld [vmem:[#allocation13 + $0xa8] ss:$16 sps:$4 sm:$0xff]   ;;  %v6766_v26 = vld [vmem:[#allocation13 + $0x84] ss:$16 sps:$4 sm:$0xff]   ;;  %v6768_v27 = vld [vmem:[#allocation13 + $0x80] ss:$16 sps:$4 sm:$0xff]  }
  0x96   : > { %v6770_v28 = vld [vmem:[#allocation13 + $0x8c] ss:$16 sps:$4 sm:$0xff]   ;;  %v6773_v29 = vld [vmem:[#allocation13 + $0x88] ss:$16 sps:$4 sm:$0xff]   ;;  %v6778_v30 = vld [vmem:[#allocation13 + $0x64] ss:$16 sps:$4 sm:$0xff]  }
  0x97   : > { %v6780_v31 = vld [vmem:[#allocation13 + $0x60] ss:$16 sps:$4 sm:$0xff]   ;;  %v6790_v34 = vld [vmem:[#allocation13 + $0x44] ss:$16 sps:$4 sm:$0xff]   ;;  %v6818_v44 = vld [vmem:[#allocation13 + $0xc] ss:$16 sps:$4 sm:$0xff]  }
  0x98   : > { %890 = vmatpush1.bf16.msra.mxu0 %v5649_v32  ;;  %931 = vmatpush1.bf16.msra.mxu1 %v5668_v38  ;;  %v6782_v32 = vld [vmem:[#allocation13 + $0x6c] ss:$16 sps:$4 sm:$0xff]   ;;  %7889 = vst [vmem:[#allocation26_spill] sm:$0xff] %v6790_v34  ;;  %v6792_v35 = vld [vmem:[#allocation13 + $0x40] ss:$16 sps:$4 sm:$0xff]   ;;  %7899 = vst [vmem:[#allocation36_spill] sm:$0xff] %v6818_v44 }
  0x99   : > { %891 = vmatprep.subr.bf16.mxu0 %v5651_v33  ;;  %932 = vmatprep.subr.bf16.mxu1 %v5671_v39  ;;  %v6785_v33 = vld [vmem:[#allocation13 + $0x68] ss:$16 sps:$4 sm:$0xff]   ;;  %7890 = vst [vmem:[#allocation27_spill] sm:$0xff] %v6792_v35  ;;  %v6802_v38 = vld [vmem:[#allocation13 + $0x24] ss:$16 sps:$4 sm:$0xff]   ;;  %p6941_p13 = scmp.eq.s32.totalorder %s1496_s17, 0 }
  0x9a   : > { %7888 = vst [vmem:[#allocation25_spill] sm:$0xff] %v6785_v33  ;;  %7893 = vst [vmem:[#allocation30_spill] sm:$0xff] %v6802_v38  ;;  %v6804_v39 = vld [vmem:[#allocation13 + $0x20] ss:$16 sps:$4 sm:$0xff]   ;;  %v6826_v46 = vld [vmem:[#allocation13 + $0x1e4] ss:$16 sps:$4 sm:$0xff]  }
  0x9b   : > { %7894 = vst [vmem:[#allocation31_spill] sm:$0xff] %v6804_v39  ;;  %7901 = vst [vmem:[#allocation38_spill] sm:$0xff] %v6826_v46  ;;  %v6828_v63 = vld [vmem:[#allocation13 + $0x1e0] ss:$16 sps:$4 sm:$0xff]   ;;  %v6830_v0 = vld [vmem:[#allocation13 + $0x1ec] ss:$16 sps:$4 sm:$0xff]  }
  0x9c   : > { %892 = vmatpush2.bf16.msra.mxu0 %v5655_v36  ;;  %933 = vmatpush2.bf16.msra.mxu1 %v5674_v42  ;;  %v6794_v36 = vld [vmem:[#allocation13 + $0x4c] ss:$16 sps:$4 sm:$0xff]   ;;  %v6814_v42 = vld [vmem:[#allocation13 + $0x4] ss:$16 sps:$4 sm:$0xff]   ;;  %7902 = vst [vmem:[#allocation39_spill] sm:$0xff] %v6828_v63  ;;  %7903 = vst [vmem:[#allocation40_spill] sm:$0xff] %v6830_v0 }
  0x9d   : > { %893 = vmatprep.subr.bf16.mxu0 %v5657_v37  ;;  %934 = vmatprep.subr.bf16.mxu1 %v5677_v43  ;;  %7891 = vst [vmem:[#allocation28_spill] sm:$0xff] %v6794_v36  ;;  %v6797_v37 = vld [vmem:[#allocation13 + $0x48] ss:$16 sps:$4 sm:$0xff]   ;;  %7897 = vst [vmem:[#allocation34_spill] sm:$0xff] %v6814_v42  ;;  %v6816_v43 = vld [vmem:[#allocation13] ss:$16 sps:$4 sm:$0xff]  }
  0x9e   : > { %7892 = vst [vmem:[#allocation29_spill] sm:$0xff] %v6797_v37  ;;  %7898 = vst [vmem:[#allocation35_spill] sm:$0xff] %v6816_v43  ;;  %v6833_v4 = vld [vmem:[#allocation13 + $0x1e8] ss:$16 sps:$4 sm:$0xff]   ;;  %v6838_v5 = vld [vmem:[#allocation13 + $0x1c4] ss:$16 sps:$4 sm:$0xff]  }
  0x9f   : > { %7904 = vst [vmem:[#allocation41_spill] sm:$0xff] %v6833_v4  ;;  %7905 = vst [vmem:[#allocation42_spill] sm:$0xff] %v6838_v5  ;;  %v6840_v9 = vld [vmem:[#allocation13 + $0x1c0] ss:$16 sps:$4 sm:$0xff]   ;;  %s1498_s13 = scalar_select %p6941_p13, 1, 0 }
  0xa0   : > { %894 = vmatpush2.bf16.msra.mxu0 %v5661_v40  ;;  %935 = vmatpush2.bf16.msra.mxu1 %v6656_v48  ;;  %v6806_v40 = vld [vmem:[#allocation13 + $0x2c] ss:$16 sps:$4 sm:$0xff]   ;;  %7906 = vst [vmem:[#allocation43_spill] sm:$0xff] %v6840_v9  ;;  %s2535_s20 = sadd.s32 2, %s6649_s24  ;;  %s3574_s27 = sadd.s32 3, %s6649_s24 }
  0xa1   : > { %895 = vmatprep.subr.bf16.mxu0 %v5663_v41  ;;  %936 = vmatprep.subr.bf16.mxu1 %v6658_v49  ;;  %7895 = vst [vmem:[#allocation32_spill] sm:$0xff] %v6806_v40  ;;  %v6809_v41 = vld [vmem:[#allocation13 + $0x28] ss:$16 sps:$4 sm:$0xff]   ;;  %s1499_s28 = scvt.s32.f32 %s1498_s13  ;;  %p7175_p0 = scmp.eq.s32.totalorder %s2535_s20, 0 }
  0xa2   : > { %7896 = vst [vmem:[#allocation33_spill] sm:$0xff] %v6809_v41  ;;  %p3575_p12 = scmp.eq.s32.totalorder %s3574_s27, 0  ;;  %s4762_s27 = sshll.u32 %s6645_s15, 4  ;;  %s7661_s27 = int_to_ptr.vmem [resolvable:$true] %s4762_s27 }
  0xa3   : > { %s1502_s18 = ssub.f32 1.0, %s1499_s28  ;;  %s7667_s12 = scalar_lea.sflag [#allocation7], %s431_s23 }
  0xa4   : > { %896 = vmatpush2.bf16.msra.mxu0 %v5667_v45  ;;  %937 = vmatpush2.bf16.msra.mxu1 %v6667_v52  ;;  %v6821_v45 = vld [vmem:[#allocation13 + $0x8] ss:$16 sps:$4 sm:$0xff]   ;;  %s2537_s22 = scalar_select %p7175_p0, 1, 0 }
  0xa5   : > { %897 = vmatprep.subr.bf16.mxu0 %v6654_v47  ;;  %938 = vmatprep.subr.bf16.mxu1 %v6670_v53  ;;  %7900 = vst [vmem:[#allocation37_spill] sm:$0xff] %v6821_v45  ;;  %s3576_s16 = scalar_select %p3575_p12, 1, 0 }
  0xa6   : > { %s2538_s17 = scvt.s32.f32 %s2537_s22  ;;  %s6331_s20 = scalar_lea.vmem %s7661_s27, 512 }
  0xa7   : > { %s3577_s24 = scvt.s32.f32 %s3576_s16  ;;  %p6332_p2 = scmp.ne.s32.totalorder %s7661_s27, %s6331_s20 }
  0xa8   : > { %898 = vmatpush2.bf16.msra.mxu0 %v6660_v50  ;;  %939 = vmatpush2.bf16.msra.mxu1 %v6679_v56  ;;  %s2541_s25 = ssub.f32 1.0, %s2538_s17  ;;  %s6437_s1 = smov [#allocation16]  }
  0xa9   : > { %899 = vmatprep.subr.bf16.mxu0 %v6664_v51  ;;  %940 = vmatprep.subr.bf16.mxu1 %v6681_v57  ;;  %s3580_s29 = ssub.f32 1.0, %s3577_s24  ;;  %p6333_p1 = pnand %p6332_p2, %p6530_p4 }
  0xaa   : > { %s6335_s22 = sshll.u32 %s6437_s1, 4  ;;  %s6336_s22 = int_to_ptr.vmem [resolvable:$false] %s6335_s22 }
  0xab   : > { %p6334_p5 = pneg %p6333_p1  ;;  %p6338_p3 = scmp.lt.s32.totalorder %s7661_s27, %s6336_s22 }
  0xac   : > { %900 = vmatpush2.bf16.msra.mxu0 %v6673_v54  ;;  %941 = vmatpush2.bf16.msra.mxu1 %v6692_v62 }
  0xad   : > { %901 = vmatprep.subr.bf16.mxu0 %v6675_v55  ;;  %942 = vmatprep.subr.bf16.mxu1 %v6695_v1 }
  0xb0   : > { %902 = vmatpush2.bf16.msra.mxu0 %v6683_v58  ;;  %943 = vmatpush2.bf16.msra.mxu1 %v6706_v6 }
  0xb1   : > { %903 = vmatprep.subr.bf16.mxu0 %v6690_v61  ;;  %944 = vmatprep.subr.bf16.mxu1 %v6709_v7 }
  0xb4   : > { %904 = vmatpush2.bf16.msra.mxu0 %v6699_v2  ;;  %945 = vmatpush2.bf16.msra.mxu1 %v6716_v10 }
  0xb5   : > { %905 = vmatprep.subr.bf16.mxu0 %v6702_v3  ;;  %946 = vmatprep.subr.bf16.mxu1 %v6721_v12 }
  0xb8   : > { %906 = vmatpush2.bf16.msra.mxu0 %v6713_v8  ;;  %947 = vmatpush2.bf16.msra.mxu1 %v6728_v15 }
  0xb9   : > { %1389 = vmatprep.subr.bf16.mxu0 %v6718_v11  ;;  %1430 = vmatprep.subr.bf16.mxu1 %v6733_v17 }
  0xbb   : > { %908 = vmatmul.mubr.bf16.vlgmr.msra.gmra.mxu0 %v467_v14  ;;  %949 = vmatmul.mubr.bf16.vlgmr.msra.gmra.mxu1 %v467_v14  ;;  %v6842_v14 = vld [vmem:[#allocation13 + $0x1cc] ss:$16 sps:$4 sm:$0xff]  }
  0xbc   : > { %1390 = vmatpush1.bf16.msra.mxu0 %v6726_v13  ;;  %1431 = vmatpush1.bf16.msra.mxu1 %v6740_v19  ;;  %7907 = vst [vmem:[#allocation44_spill] sm:$0xff] %v6842_v14 }
  0xbd   : > { %1391 = vmatprep.subr.bf16.mxu0 %v6730_v16  ;;  %1432 = vmatprep.subr.bf16.mxu1 %v6743_v20 }
  0xc0   : > { %1392 = vmatpush1.bf16.msra.mxu0 %v6738_v18  ;;  %1433 = vmatpush1.bf16.msra.mxu1 %v6748_v21 }
  0xc1   : > { %1393 = vmatprep.subr.bf16.mxu0 %v6754_v22  ;;  %1434 = vmatprep.subr.bf16.mxu1 %v6758_v24 }
  0xc4   : > { %1394 = vmatpush1.bf16.msra.mxu0 %v6756_v23  ;;  %1435 = vmatpush1.bf16.msra.mxu1 %v6761_v25 }
  0xc5   : > { %1395 = vmatprep.subr.bf16.mxu0 %v6766_v26  ;;  %1436 = vmatprep.subr.bf16.mxu1 %v6770_v28 }
  0xc8   : > { %1396 = vmatpush1.bf16.msra.mxu0 %v6768_v27  ;;  %1437 = vmatpush1.bf16.msra.mxu1 %v6773_v29 }
  0xc9   : > { %1397 = vmatprep.subr.bf16.mxu0 %v6778_v30  ;;  %1438 = vmatprep.subr.bf16.mxu1 %v6782_v32 }
  0xcc   : > { %1398 = vmatpush1.bf16.msra.mxu0 %v6780_v31  ;;  %1439 = vmatpush1.bf16.msra.mxu1 %v6785_v33 }
  0xcd   : > { %1399 = vmatprep.subr.bf16.mxu0 %v6790_v34  ;;  %1440 = vmatprep.subr.bf16.mxu1 %v6794_v36 }
  0xd0   : > { %1400 = vmatpush1.bf16.msra.mxu0 %v6792_v35  ;;  %1441 = vmatpush1.bf16.msra.mxu1 %v6797_v37 }
  0xd1   : > { %1401 = vmatprep.subr.bf16.mxu0 %v6802_v38  ;;  %1442 = vmatprep.subr.bf16.mxu1 %v6806_v40 }
  0xd4   : > { %1402 = vmatpush1.bf16.msra.mxu0 %v6804_v39  ;;  %1443 = vmatpush1.bf16.msra.mxu1 %v6809_v41  ;;  %v6910_v41 = vld [vmem:[#allocation13 + $0x10c] ss:$16 sps:$4 sm:$0xff]  }
  0xd5   : > { %1403 = vmatprep.subr.bf16.mxu0 %v6814_v42  ;;  %1444 = vmatprep.subr.bf16.mxu1 %v6818_v44  ;;  %v453_v44 = vld [vmem:[#allocation2 + $0x8] sm:$0xff]  ;;  %7930 = vst [vmem:[#allocation67_spill] sm:$0xff] %v6910_v41 }
  0xd8   : > { %1404 = vmatpush1.bf16.msra.mxu0 %v6816_v43  ;;  %1445 = vmatpush1.bf16.msra.mxu1 %v6821_v45  ;;  %v6845_v45 = vld [vmem:[#allocation13 + $0x1c8] ss:$16 sps:$4 sm:$0xff]   ;;  %v6883_v43 = vld [vmem:[#allocation13 + $0x144] ss:$16 sps:$4 sm:$0xff]  }
  0xd9   : > { %1405 = vmatprep.subr.bf16.mxu0 %v6826_v46  ;;  %1446 = vmatprep.subr.bf16.mxu1 %v6830_v0  ;;  %7908 = vst [vmem:[#allocation45_spill] sm:$0xff] %v6845_v45  ;;  %v6852_v0 = vld [vmem:[#allocation13 + $0x1a0] ss:$16 sps:$4 sm:$0xff]   ;;  %v6857_v46 = vld [vmem:[#allocation13 + $0x1a8] ss:$16 sps:$4 sm:$0xff]   ;;  %7921 = vst [vmem:[#allocation58_spill] sm:$0xff] %v6883_v43 }
  0xda   : > { %7910 = vst [vmem:[#allocation47_spill] sm:$0xff] %v6852_v0  ;;  %7912 = vst [vmem:[#allocation49_spill] sm:$0xff] %v6857_v46 }
  0xdc   : > { %1406 = vmatpush2.bf16.msra.mxu0 %v6828_v63  ;;  %1447 = vmatpush2.bf16.msra.mxu1 %v6833_v4  ;;  %v6850_v63 = vld [vmem:[#allocation13 + $0x1a4] ss:$16 sps:$4 sm:$0xff]   ;;  %v6854_v4 = vld [vmem:[#allocation13 + $0x1ac] ss:$16 sps:$4 sm:$0xff]  }
  0xdd   : > { %1407 = vmatprep.subr.bf16.mxu0 %v6838_v5  ;;  %1448 = vmatprep.subr.bf16.mxu1 %v6842_v14  ;;  %7909 = vst [vmem:[#allocation46_spill] sm:$0xff] %v6850_v63  ;;  %7911 = vst [vmem:[#allocation48_spill] sm:$0xff] %v6854_v4  ;;  %v6864_v14 = vld [vmem:[#allocation13 + $0x180] ss:$16 sps:$4 sm:$0xff]   ;;  %v6869_v5 = vld [vmem:[#allocation13 + $0x188] ss:$16 sps:$4 sm:$0xff]  }
  0xde   : > { %7914 = vst [vmem:[#allocation51_spill] sm:$0xff] %v6864_v14  ;;  %7916 = vst [vmem:[#allocation53_spill] sm:$0xff] %v6869_v5 }
  0xe0   : > { %1408 = vmatpush2.bf16.msra.mxu0 %v6840_v9  ;;  %1449 = vmatpush2.bf16.msra.mxu1 %v6845_v45  ;;  %v6862_v9 = vld [vmem:[#allocation13 + $0x184] ss:$16 sps:$4 sm:$0xff]   ;;  %v6866_v45 = vld [vmem:[#allocation13 + $0x18c] ss:$16 sps:$4 sm:$0xff]  }
  0xe1   : > { %1409 = vmatprep.subr.bf16.mxu0 %v6850_v63  ;;  %1450 = vmatprep.subr.bf16.mxu1 %v6854_v4  ;;  %7913 = vst [vmem:[#allocation50_spill] sm:$0xff] %v6862_v9  ;;  %7915 = vst [vmem:[#allocation52_spill] sm:$0xff] %v6866_v45  ;;  %v6876_v4 = vld [vmem:[#allocation13 + $0x160] ss:$16 sps:$4 sm:$0xff]   ;;  %v6880_v63 = vld [vmem:[#allocation13 + $0x16c] ss:$16 sps:$4 sm:$0xff]  }
  0xe2   : > { %7918 = vst [vmem:[#allocation55_spill] sm:$0xff] %v6876_v4  ;;  %7920 = vst [vmem:[#allocation57_spill] sm:$0xff] %v6880_v63 }
  0xe4   : > { %1410 = vmatpush2.bf16.msra.mxu0 %v6852_v0  ;;  %1451 = vmatpush2.bf16.msra.mxu1 %v6857_v46  ;;  %v6874_v0 = vld [vmem:[#allocation13 + $0x164] ss:$16 sps:$4 sm:$0xff]   ;;  %v6878_v46 = vld [vmem:[#allocation13 + $0x168] ss:$16 sps:$4 sm:$0xff]  }
  0xe5   : > { %1411 = vmatprep.subr.bf16.mxu0 %v6862_v9  ;;  %1452 = vmatprep.subr.bf16.mxu1 %v6866_v45  ;;  %7917 = vst [vmem:[#allocation54_spill] sm:$0xff] %v6874_v0  ;;  %7919 = vst [vmem:[#allocation56_spill] sm:$0xff] %v6878_v46  ;;  %v6889_v45 = vld [vmem:[#allocation13 + $0x14c] ss:$16 sps:$4 sm:$0xff]   ;;  %v6895_v9 = vld [vmem:[#allocation13 + $0x124] ss:$16 sps:$4 sm:$0xff]  }
  0xe6   : > { %7923 = vst [vmem:[#allocation60_spill] sm:$0xff] %v6889_v45  ;;  %7925 = vst [vmem:[#allocation62_spill] sm:$0xff] %v6895_v9 }
  0xe8   : > { %1412 = vmatpush2.bf16.msra.mxu0 %v6864_v14  ;;  %1453 = vmatpush2.bf16.msra.mxu1 %v6869_v5  ;;  %v6887_v14 = vld [vmem:[#allocation13 + $0x140] ss:$16 sps:$4 sm:$0xff]   ;;  %v6893_v5 = vld [vmem:[#allocation13 + $0x148] ss:$16 sps:$4 sm:$0xff]  }
  0xe9   : > { %1413 = vmatprep.subr.bf16.mxu0 %v6874_v0  ;;  %1454 = vmatprep.subr.bf16.mxu1 %v6880_v63  ;;  %7922 = vst [vmem:[#allocation59_spill] sm:$0xff] %v6887_v14  ;;  %7924 = vst [vmem:[#allocation61_spill] sm:$0xff] %v6893_v5  ;;  %v6898_v0 = vld [vmem:[#allocation13 + $0x12c] ss:$16 sps:$4 sm:$0xff]   ;;  %v982_v63 = vpack.c.bf16 %v453_v44, %v453_v44  ;;  %v6917_v44 = vld [vmem:[#allocation13 + $0x108] ss:$16 sps:$4 sm:$0xff]  }
  0xea   : > { %7926 = vst [vmem:[#allocation63_spill] sm:$0xff] %v6898_v0  ;;  %7932 = vst [vmem:[#allocation69_spill] sm:$0xff] %v6917_v44 }
  0xeb   : > { %1421 = vmatprep.mubr.bf16.mxu0 %v982_v63  ;;  %1462 = vmatprep.mubr.bf16.mxu1 %v982_v63  ;;  %v535_v63 = vlaneseq }
  0xec   : > { %1414 = vmatpush2.bf16.msra.mxu0 %v6876_v4  ;;  %1455 = vmatpush2.bf16.msra.mxu1 %v6878_v46  ;;  %v6901_v4 = vld [vmem:[#allocation13 + $0x120] ss:$16 sps:$4 sm:$0xff]   ;;  %v6905_v46 = vld [vmem:[#allocation13 + $0x128] ss:$16 sps:$4 sm:$0xff]  }
  0xed   : > { %1415 = vmatprep.subr.bf16.mxu0 %v6883_v43  ;;  %1456 = vmatprep.subr.bf16.mxu1 %v6889_v45  ;;  %7927 = vst [vmem:[#allocation64_spill] sm:$0xff] %v6901_v4  ;;  %7928 = vst [vmem:[#allocation65_spill] sm:$0xff] %v6905_v46  ;;  %v6907_v43 = vld [vmem:[#allocation13 + $0x104] ss:$16 sps:$4 sm:$0xff]  }
  0xee   : > { %7929 = vst [vmem:[#allocation66_spill] sm:$0xff] %v6907_v43 }
  0xf0   : > { %1416 = vmatpush2.bf16.msra.mxu0 %v6887_v14  ;;  %1457 = vmatpush2.bf16.msra.mxu1 %v6893_v5  ;;  %v6913_v14 = vld [vmem:[#allocation13 + $0x100] ss:$16 sps:$4 sm:$0xff]   ;;  %v6133_v5 = vld [vmem:[#allocation11 + $0xec] ss:$16 sps:$4 sm:$0xff]  }
  0xf1   : > { %1417 = vmatprep.subr.bf16.mxu0 %v6895_v9  ;;  %1458 = vmatprep.subr.bf16.mxu1 %v6898_v0  ;;  %7931 = vst [vmem:[#allocation68_spill] sm:$0xff] %v6913_v14  ;;  %v6132_v0 = vld [vmem:[#allocation11 + $0xe4] ss:$16 sps:$4 sm:$0xff]  }
  0xf4   : > { %1418 = vmatpush2.bf16.msra.mxu0 %v6901_v4  ;;  %1459 = vmatpush2.bf16.msra.mxu1 %v6905_v46  ;;  %v536_v4 = vshrl.u32 %v535_v63, 7  ;;  %v533_v46 = vld [vmem:[%s7717_s5] sm:$0xf] }
  0xf5   : > { %1419 = vmatprep.subr.bf16.mxu0 %v6907_v43  ;;  %1460 = vmatprep.subr.bf16.mxu1 %v6910_v41 }
  0xf6   : > { %v6922_v9 = vsub.s32 0, %v536_v4  ;;  %v6927_v43 = vsub.s32 1, %v536_v4  ;;  %v6934_v33 = vsub.s32 3, %v536_v4 }
  0xf8   : > { %1420 = vmatpush2.bf16.msra.mxu0 %v6913_v14  ;;  %1461 = vmatpush2.bf16.msra.mxu1 %v6917_v44  ;;  %7933 = vst [vmem:[#allocation70_spill] sm:$0xff] %v6922_v9  ;;  %7934 = vst [vmem:[#allocation71_spill] sm:$0xff] %v6927_v43  ;;  %v538_v41 = vrot.slane %v533_v46, %v6922_v9  ;;  %v542_v14 = vrot.slane %v533_v46, %v6927_v43 }
  0xf9   : > { %1913 = vmatprep.subr.bf16.mxu0 %v6132_v0  ;;  %1954 = vmatprep.subr.bf16.mxu1 %v6133_v5  ;;  %v6931_v5 = vsub.s32 2, %v536_v4  ;;  %v454_v4 = vld [vmem:[#allocation3 + $0x8] sm:$0xff] }
  0xfb   : > { %7935 = vst [vmem:[#allocation72_spill] sm:$0xff] %v6931_v5  ;;  %v546_v35 = vrot.slane %v533_v46, %v6931_v5 }
 0x17b   : > { %v909_v45 = vpop.f32.mrf.mxu0  ;;  %v950_v37 = vpop.f32.mrf.mxu1 }
 0x17c   : > { %v910_v44 = vadd.f32 %v909_v45, %v538_v41  ;;  %v951_v43 = vadd.f32 %v950_v37, %v546_v35  ;;  %v550_v41 = vrot.slane %v533_v46, %v6934_v33 }
 0x17d   : > { %v911_v42 = vpop.f32.mrf.mxu0  ;;  %v952_v36 = vpop.f32.mrf.mxu1 }
 0x17e   : > { %v4971_v0 = vmul.f32 -1.442695, %v910_v44  ;;  %v912_v39 = vadd.f32 %v911_v42, %v542_v14  ;;  %v4973_v45 = vmul.f32 -1.442695, %v951_v43  ;;  %v953_v42 = vadd.f32 %v952_v36, %v550_v41 }
 0x17f   : > { %v913_v63 = vpop.f32.mrf.mxu0  ;;  %v954_v9 = vpop.f32.mrf.mxu1 }
 0x180   : > { %6004 = vpow2.f32 %v4971_v0  ;;  %v4972_v40 = vmul.f32 -1.442695, %v912_v39 }
 0x181   : > { %v914_v38 = vpop.f32.mrf.mxu0  ;;  %v955_v34 = vpop.f32.mrf.mxu1 }
 0x182   : > { %6006 = vpow2.f32 %v4972_v40 }
 0x183   : > { %6008 = vpow2.f32 %v4973_v45  ;;  %v6134_v45 = vld [vmem:[#allocation11 + $0xe0] ss:$16 sps:$4 sm:$0xff]  }
 0x184   : > { %6010 = vtanh.f32 %v953_v42  ;;  %v6135_v42 = vld [vmem:[#allocation11 + $0xc4] ss:$16 sps:$4 sm:$0xff]  }
 0x18d   : > { %v6005_v14 = vpop.eup %6004 }
 0x18e   : > { %v966_v44 = vadd.f32 1.0, %v6005_v14  ;;  %v6136_v14 = vld [vmem:[#allocation11 + $0xe8] ss:$16 sps:$4 sm:$0xff]  }
 0x18f   : > { %v6007_v0 = vpop.eup %6006 }
 0x190   : > { %6012 = vrcp.f32 %v966_v44  ;;  %v967_v38 = vadd.f32 1.0, %v6007_v0  ;;  %v6009_v39 = vpop.eup %6008  ;;  %v6138_v44 = vld [vmem:[#allocation11 + $0xc0] ss:$16 sps:$4 sm:$0xff]   ;;  %v6139_v0 = vld [vmem:[#allocation11 + $0xa4] ss:$16 sps:$4 sm:$0xff]  }
 0x191   : > { %v6011_v40 = vpop.eup %6010  ;;  %v968_v9 = vadd.f32 1.0, %v6009_v39  ;;  %v6141_v39 = vld [vmem:[#allocation11 + $0xac] ss:$16 sps:$4 sm:$0xff]  }
 0x192   : > { %6014 = vrcp.f32 %v967_v38  ;;  %v6140_v38 = vld [vmem:[#allocation11 + $0xc8] ss:$16 sps:$4 sm:$0xff]  }
 0x193   : > { %6016 = vrcp.f32 %v968_v9  ;;  %v6145_v9 = vld [vmem:[#allocation11 + $0x8c] ss:$16 sps:$4 sm:$0xff]  }
 0x19d   : > { %v6013_v63 = vpop.eup %6012 }
 0x19e   : > { %v977_v34 = vmul.f32 %v6013_v63, %v6011_v40  ;;  %v6142_v40 = vld [vmem:[#allocation11 + $0xa0] ss:$16 sps:$4 sm:$0xff]   ;;  %v6143_v63 = vld [vmem:[#allocation11 + $0x84] ss:$16 sps:$4 sm:$0xff]  }
 0x19f   : > { %v6015_v5 = vpop.eup %6014 }
 0x1a0   : > { %v976_v35 = vmul.f32 %v6015_v5, %v454_v4  ;;  %v6017_v36 = vpop.eup %6016  ;;  %v6137_v5 = vld [vmem:[#allocation11 + $0xcc] ss:$16 sps:$4 sm:$0xff]   ;;  %v6144_v4 = vld [vmem:[#allocation11 + $0xa8] ss:$16 sps:$4 sm:$0xff]  }
 0x1a2   : > { %v6937_v37 = vadd.f32 %v977_v34, %v976_v35  ;;  %v6146_v35 = vld [vmem:[#allocation11 + $0x80] ss:$16 sps:$4 sm:$0xff]   ;;  %v6147_v34 = vld [vmem:[#allocation11 + $0x64] ss:$16 sps:$4 sm:$0xff]  }
 0x1a4   : > { %6018 = vtanh.f32 %v6937_v37 }
 0x1b1   : > { %v6019_v43 = vpop.eup %6018 }
 0x1b2   : > { %v980_v46 = vmul.f32 %v6019_v43, %v6017_v36  ;;  %v6148_v36 = vld [vmem:[#allocation11 + $0x88] ss:$16 sps:$4 sm:$0xff]   ;;  %v6149_v43 = vld [vmem:[#allocation11 + $0x6c] ss:$16 sps:$4 sm:$0xff]  }
 0x1b4   : > { %v981_v41 = vpack.c.bf16 %v980_v46, %v980_v46  ;;  %v6150_v46 = vld [vmem:[#allocation11 + $0x60] ss:$16 sps:$4 sm:$0xff]  }
 0x1b6   : > { %1422 = vmatmul.mubr.bf16.vlgmr.msra.gmra.mxu0 %v981_v41  ;;  %1463 = vmatmul.mubr.bf16.vlgmr.msra.gmra.mxu1 %v981_v41 }
 0x1b7   : > { %1914 = vmatpush1.bf16.msra.mxu0 %v6134_v45  ;;  %1945 = vmatprep.mubr.bf16.mxu0 %v981_v41  ;;  %v6152_v45 = vld [vmem:[#allocation11 + $0x68] ss:$16 sps:$4 sm:$0xff]  }
 0x1b8   : > { %1986 = vmatprep.mubr.bf16.mxu1 %v981_v41  ;;  %1915 = vmatprep.subr.bf16.mxu0 %v6135_v42  ;;  %v6151_v41 = vld [vmem:[#allocation11 + $0x44] ss:$16 sps:$4 sm:$0xff]   ;;  %v6153_v42 = vld [vmem:[#allocation11 + $0x4c] ss:$16 sps:$4 sm:$0xff]  }
 0x1b9   : > { %1955 = vmatpush1.bf16.msra.mxu1 %v6136_v14  ;;  %v6154_v14 = vld [vmem:[#allocation11 + $0x40] ss:$16 sps:$4 sm:$0xff]  }
 0x1ba   : > { %1956 = vmatprep.subr.bf16.mxu1 %v6137_v5  ;;  %v6155_v5 = vld [vmem:[#allocation11 + $0x24] ss:$16 sps:$4 sm:$0xff]  }
 0x1bb   : > { %1916 = vmatpush1.bf16.msra.mxu0 %v6138_v44  ;;  %v6156_v44 = vld [vmem:[#allocation11 + $0x48] ss:$16 sps:$4 sm:$0xff]  }
 0x1bc   : > { %1917 = vmatprep.subr.bf16.mxu0 %v6139_v0  ;;  %v6157_v0 = vld [vmem:[#allocation11 + $0x2c] ss:$16 sps:$4 sm:$0xff]  }
 0x1bd   : > { %1957 = vmatpush1.bf16.msra.mxu1 %v6140_v38  ;;  %v6158_v38 = vld [vmem:[#allocation11 + $0x20] ss:$16 sps:$4 sm:$0xff]  }
 0x1be   : > { %1958 = vmatprep.subr.bf16.mxu1 %v6141_v39  ;;  %v6159_v39 = vld [vmem:[#allocation11 + $0x4] ss:$16 sps:$4 sm:$0xff]  }
 0x1bf   : > { %1918 = vmatpush1.bf16.msra.mxu0 %v6142_v40  ;;  %v6160_v40 = vld [vmem:[#allocation11 + $0x28] ss:$16 sps:$4 sm:$0xff]  }
 0x1c0   : > { %1919 = vmatprep.subr.bf16.mxu0 %v6143_v63  ;;  %v6161_v63 = vld [vmem:[#allocation11 + $0xc] ss:$16 sps:$4 sm:$0xff]  }
 0x1c1   : > { %1959 = vmatpush1.bf16.msra.mxu1 %v6144_v4  ;;  %v6162_v4 = vld [vmem:[#allocation11] ss:$16 sps:$4 sm:$0xff]  }
 0x1c2   : > { %1960 = vmatprep.subr.bf16.mxu1 %v6145_v9  ;;  %v6163_v9 = vld [vmem:[#allocation11 + $0x1e4] ss:$16 sps:$4 sm:$0xff]  }
 0x1c3   : > { %1920 = vmatpush1.bf16.msra.mxu0 %v6146_v35  ;;  %v6164_v35 = vld [vmem:[#allocation11 + $0x8] ss:$16 sps:$4 sm:$0xff]  }
 0x1c4   : > { %1921 = vmatprep.subr.bf16.mxu0 %v6147_v34  ;;  %v6165_v34 = vld [vmem:[#allocation11 + $0x1ec] ss:$16 sps:$4 sm:$0xff]  }
 0x1c5   : > { %1961 = vmatpush1.bf16.msra.mxu1 %v6148_v36  ;;  %v6166_v36 = vld [vmem:[#allocation11 + $0x1e0] ss:$16 sps:$4 sm:$0xff]  }
 0x1c6   : > { %1962 = vmatprep.subr.bf16.mxu1 %v6149_v43  ;;  %v6167_v43 = vld [vmem:[#allocation11 + $0x1c4] ss:$16 sps:$4 sm:$0xff]  }
 0x1c7   : > { %1922 = vmatpush1.bf16.msra.mxu0 %v6150_v46  ;;  %v6168_v46 = vld [vmem:[#allocation11 + $0x1e8] ss:$16 sps:$4 sm:$0xff]  }
 0x1c8   : > { %1923 = vmatprep.subr.bf16.mxu0 %v6151_v41  ;;  %v6169_v41 = vld [vmem:[#allocation11 + $0x1cc] ss:$16 sps:$4 sm:$0xff]  }
 0x1c9   : > { %1963 = vmatpush1.bf16.msra.mxu1 %v6152_v45  ;;  %v6170_v45 = vld [vmem:[#allocation11 + $0x1c0] ss:$16 sps:$4 sm:$0xff]  }
 0x1ca   : > { %1964 = vmatprep.subr.bf16.mxu1 %v6153_v42  ;;  %v6171_v42 = vld [vmem:[#allocation11 + $0x1a4] ss:$16 sps:$4 sm:$0xff]  }
 0x1cb   : > { %1924 = vmatpush1.bf16.msra.mxu0 %v6154_v14  ;;  %v6172_v14 = vld [vmem:[#allocation11 + $0x1a0] ss:$16 sps:$4 sm:$0xff]  }
 0x1cc   : > { %1925 = vmatprep.subr.bf16.mxu0 %v6155_v5  ;;  %v7975_v5 = vld [vmem:[#allocation63_spill] sm:$0xff] }
 0x1cd   : > { %1965 = vmatpush1.bf16.msra.mxu1 %v6156_v44  ;;  %v7976_v44 = vld [vmem:[#allocation64_spill] sm:$0xff] }
 0x1ce   : > { %1966 = vmatprep.subr.bf16.mxu1 %v6157_v0  ;;  %v7977_v0 = vld [vmem:[#allocation66_spill] sm:$0xff] }
 0x1cf   : > { %1926 = vmatpush1.bf16.msra.mxu0 %v6158_v38  ;;  %v7978_v38 = vld [vmem:[#allocation65_spill] sm:$0xff] }
 0x1d0   : > { %1927 = vmatprep.subr.bf16.mxu0 %v6159_v39  ;;  %v7979_v39 = vld [vmem:[#allocation67_spill] sm:$0xff] }
 0x1d1   : > { %1967 = vmatpush1.bf16.msra.mxu1 %v6160_v40  ;;  %v7980_v40 = vld [vmem:[#allocation68_spill] sm:$0xff] }
 0x1d2   : > { %1968 = vmatprep.subr.bf16.mxu1 %v6161_v63  ;;  %v7981_v63 = vld [vmem:[#allocation69_spill] sm:$0xff] }
 0x1d3   : > { %1928 = vmatpush1.bf16.msra.mxu0 %v6162_v4  ;;  %v7036_v4 = vld [vmem:[#allocation11 + $0xe4] ss:$16 sps:$4 sm:$0xff]  }
 0x1d4   : > { %1929 = vmatprep.subr.bf16.mxu0 %v6163_v9  ;;  %v1047_v9 = vld [vmem:[%s7718_s6] sm:$0xf] }
 0x1d5   : > { %1969 = vmatpush1.bf16.msra.mxu1 %v6164_v35  ;;  %v7982_v35 = vld [vmem:[#allocation70_spill] sm:$0xff] }
 0x1d6   : > { %1970 = vmatprep.subr.bf16.mxu1 %v6165_v34  ;;  %v1052_v34 = vrot.slane %v1047_v9, %v7982_v35 }
 0x1d7   : > { %1930 = vmatpush2.bf16.msra.mxu0 %v6166_v36  ;;  %v7983_v36 = vld [vmem:[#allocation71_spill] sm:$0xff] }
 0x1d8   : > { %1931 = vmatprep.subr.bf16.mxu0 %v6167_v43  ;;  %v1056_v43 = vrot.slane %v1047_v9, %v7983_v36 }
 0x1d9   : > { %1971 = vmatpush2.bf16.msra.mxu1 %v6168_v46 }
 0x1da   : > { %1972 = vmatprep.subr.bf16.mxu1 %v6169_v41 }
 0x1db   : > { %1932 = vmatpush2.bf16.msra.mxu0 %v6170_v45 }
 0x1dc   : > { %1933 = vmatprep.subr.bf16.mxu0 %v6171_v42 }
 0x1dd   : > { %1973 = vmatpush2.bf16.msra.mxu1 %v6656_v48  ;;  %v1500_v48 = vstv %s1499_s28 }
 0x1de   : > { %1974 = vmatprep.subr.bf16.mxu1 %v6658_v49  ;;  %v1503_v49 = vstv %s1502_s18 }
 0x1df   : > { %1934 = vmatpush2.bf16.msra.mxu0 %v6172_v14 }
 0x1e0   : > { %1935 = vmatprep.subr.bf16.mxu0 %v6654_v47  ;;  %v1501_v47 = vmul.f32 %v1500_v48, %v6686_v59  ;;  %v7943_v59 = vld [vmem:[#allocation32_spill] sm:$0xff] }
 0x1e1   : > { %1975 = vmatpush2.bf16.msra.mxu1 %v6667_v52  ;;  %v1504_v52 = vmul.f32 %v1503_v49, %v6688_v60  ;;  %v7944_v60 = vld [vmem:[#allocation31_spill] sm:$0xff] }
 0x1e2   : > { %1976 = vmatprep.subr.bf16.mxu1 %v6670_v53  ;;  %v7937_v53 = vld [vmem:[#allocation26_spill] sm:$0xff] }
 0x1e3   : > { %1936 = vmatpush2.bf16.msra.mxu0 %v6660_v50  ;;  %v1505_v50 = vadd.f32 %v1504_v52, %v1501_v47 }
 0x1e4   : > { %1937 = vmatprep.subr.bf16.mxu0 %v6664_v51 }
 0x1e5   : > { %1977 = vmatpush2.bf16.msra.mxu1 %v6679_v56  ;;  %v1506_v51 = vpack.c.bf16 %v1505_v50, %v1505_v50  ;;  %v7940_v56 = vld [vmem:[#allocation27_spill] sm:$0xff] }
 0x1e6   : > { %1978 = vmatprep.subr.bf16.mxu1 %v6681_v57  ;;  %v7941_v57 = vld [vmem:[#allocation30_spill] sm:$0xff] }
 0x1e7   : > { %1938 = vmatpush2.bf16.msra.mxu0 %v6673_v54  ;;  %v7938_v54 = vld [vmem:[#allocation25_spill] sm:$0xff] }
 0x1e8   : > { %1939 = vmatprep.subr.bf16.mxu0 %v6675_v55  ;;  %v7939_v55 = vld [vmem:[#allocation28_spill] sm:$0xff] }
 0x1e9   : > { %1979 = vmatpush2.bf16.msra.mxu1 %v6692_v62  ;;  %v7946_v62 = vld [vmem:[#allocation33_spill] sm:$0xff] }
 0x1ea   : > { %1980 = vmatprep.subr.bf16.mxu1 %v6695_v1  ;;  %v7947_v1 = vld [vmem:[#allocation36_spill] sm:$0xff] }
 0x1eb   : > { %1940 = vmatpush2.bf16.msra.mxu0 %v6683_v58  ;;  %v7942_v58 = vld [vmem:[#allocation29_spill] sm:$0xff] }
 0x1ec   : > { %1941 = vmatprep.subr.bf16.mxu0 %v6690_v61  ;;  %v7945_v61 = vld [vmem:[#allocation34_spill] sm:$0xff] }
 0x1ed   : > { %1981 = vmatpush2.bf16.msra.mxu1 %v6706_v6  ;;  %v7950_v6 = vld [vmem:[#allocation37_spill] sm:$0xff] }
 0x1ee   : > { %1982 = vmatprep.subr.bf16.mxu1 %v6709_v7  ;;  %v7951_v7 = vld [vmem:[#allocation40_spill] sm:$0xff] }
 0x1ef   : > { %1942 = vmatpush2.bf16.msra.mxu0 %v6699_v2  ;;  %v7948_v2 = vld [vmem:[#allocation35_spill] sm:$0xff] }
 0x1f0   : > { %1943 = vmatprep.subr.bf16.mxu0 %v6702_v3  ;;  %v7949_v3 = vld [vmem:[#allocation38_spill] sm:$0xff] }
 0x1f1   : > { %1983 = vmatpush2.bf16.msra.mxu1 %v6716_v10  ;;  %v7953_v10 = vld [vmem:[#allocation42_spill] sm:$0xff] }
 0x1f2   : > { %1984 = vmatprep.subr.bf16.mxu1 %v6721_v12  ;;  %v7955_v12 = vld [vmem:[#allocation44_spill] sm:$0xff] }
 0x1f3   : > { %1944 = vmatpush2.bf16.msra.mxu0 %v6713_v8  ;;  %v7952_v8 = vld [vmem:[#allocation39_spill] sm:$0xff] }
 0x1f4   : > { %2427 = vmatprep.subr.bf16.mxu0 %v6718_v11  ;;  %v7954_v11 = vld [vmem:[#allocation41_spill] sm:$0xff] }
 0x1f5   : > { %1985 = vmatpush2.bf16.msra.mxu1 %v6728_v15  ;;  %v7957_v15 = vld [vmem:[#allocation46_spill] sm:$0xff] }
 0x1f6   : > { %1946 = vmatmul.mubr.bf16.vlgmr.msra.gmra.mxu0 %v1506_v51  ;;  %2468 = vmatprep.subr.bf16.mxu1 %v6733_v17  ;;  %v7959_v17 = vld [vmem:[#allocation48_spill] sm:$0xff] }
 0x1f7   : > { %2428 = vmatpush1.bf16.msra.mxu0 %v6726_v13  ;;  %v7956_v13 = vld [vmem:[#allocation43_spill] sm:$0xff] }
 0x1f8   : > { %1987 = vmatmul.mubr.bf16.vlgmr.msra.gmra.mxu1 %v1506_v51  ;;  %2429 = vmatprep.subr.bf16.mxu0 %v6730_v16  ;;  %v7958_v16 = vld [vmem:[#allocation45_spill] sm:$0xff]  ;;  %v7044_v51 = vld [vmem:[#allocation11 + $0xec] ss:$16 sps:$4 sm:$0xff]  }
 0x1f9   : > { %2469 = vmatpush1.bf16.msra.mxu1 %v6740_v19  ;;  %v7961_v19 = vld [vmem:[#allocation50_spill] sm:$0xff] }
 0x1fa   : > { %2470 = vmatprep.subr.bf16.mxu1 %v6743_v20  ;;  %v7962_v20 = vld [vmem:[#allocation49_spill] sm:$0xff] }
 0x1fb   : > { %2430 = vmatpush1.bf16.msra.mxu0 %v6738_v18  ;;  %v7960_v18 = vld [vmem:[#allocation47_spill] sm:$0xff] }
 0x1fc   : > { %2431 = vmatprep.subr.bf16.mxu0 %v6754_v22  ;;  %v7964_v22 = vld [vmem:[#allocation51_spill] sm:$0xff] }
 0x1fd   : > { %2471 = vmatpush1.bf16.msra.mxu1 %v6748_v21  ;;  %v7963_v21 = vld [vmem:[#allocation52_spill] sm:$0xff] }
 0x1fe   : > { %2472 = vmatprep.subr.bf16.mxu1 %v6758_v24  ;;  %v7966_v24 = vld [vmem:[#allocation53_spill] sm:$0xff] }
 0x1ff   : > { %2432 = vmatpush1.bf16.msra.mxu0 %v6756_v23  ;;  %v7965_v23 = vld [vmem:[#allocation54_spill] sm:$0xff] }
 0x200   : > { %2433 = vmatprep.subr.bf16.mxu0 %v6766_v26  ;;  %v7968_v26 = vld [vmem:[#allocation55_spill] sm:$0xff] }
 0x201   : > { %2473 = vmatpush1.bf16.msra.mxu1 %v6761_v25  ;;  %v7967_v25 = vld [vmem:[#allocation57_spill] sm:$0xff] }
 0x202   : > { %2474 = vmatprep.subr.bf16.mxu1 %v6770_v28  ;;  %v7970_v28 = vld [vmem:[#allocation56_spill] sm:$0xff] }
 0x203   : > { %2434 = vmatpush1.bf16.msra.mxu0 %v6768_v27  ;;  %v7969_v27 = vld [vmem:[#allocation58_spill] sm:$0xff] }
 0x204   : > { %2435 = vmatprep.subr.bf16.mxu0 %v6778_v30  ;;  %v7972_v30 = vld [vmem:[#allocation59_spill] sm:$0xff] }
 0x205   : > { %2475 = vmatpush1.bf16.msra.mxu1 %v6773_v29  ;;  %v7971_v29 = vld [vmem:[#allocation60_spill] sm:$0xff] }
 0x206   : > { %2476 = vmatprep.subr.bf16.mxu1 %v6782_v32  ;;  %v7974_v32 = vld [vmem:[#allocation61_spill] sm:$0xff] }
 0x207   : > { %2436 = vmatpush1.bf16.msra.mxu0 %v6780_v31  ;;  %v7973_v31 = vld [vmem:[#allocation62_spill] sm:$0xff] }
 0x208   : > { %2437 = vmatprep.subr.bf16.mxu0 %v7937_v53 }
 0x209   : > { %2477 = vmatpush1.bf16.msra.mxu1 %v7938_v54 }
 0x20a   : > { %2478 = vmatprep.subr.bf16.mxu1 %v7939_v55  ;;  %v7984_v55 = vld [vmem:[#allocation72_spill] sm:$0xff] }
 0x20b   : > { %2438 = vmatpush1.bf16.msra.mxu0 %v7940_v56  ;;  %v1060_v56 = vrot.slane %v1047_v9, %v7984_v55 }
 0x20c   : > { %2439 = vmatprep.subr.bf16.mxu0 %v7941_v57 }
 0x20d   : > { %2479 = vmatpush1.bf16.msra.mxu1 %v7942_v58  ;;  %v1064_v58 = vrot.slane %v1047_v9, %v6934_v33 }
 0x20e   : > { %2480 = vmatprep.subr.bf16.mxu1 %v7943_v59 }
 0x20f   : > { %2440 = vmatpush1.bf16.msra.mxu0 %v7944_v60 }
 0x210   : > { %2441 = vmatprep.subr.bf16.mxu0 %v7945_v61 }
 0x211   : > { %2481 = vmatpush1.bf16.msra.mxu1 %v7946_v62 }
 0x212   : > { %2482 = vmatprep.subr.bf16.mxu1 %v7947_v1 }
 0x213   : > { %2442 = vmatpush1.bf16.msra.mxu0 %v7948_v2 }
 0x214   : > { %2443 = vmatprep.subr.bf16.mxu0 %v7949_v3 }
 0x215   : > { %2483 = vmatpush1.bf16.msra.mxu1 %v7950_v6 }
 0x216   : > { %2484 = vmatprep.subr.bf16.mxu1 %v7951_v7  ;;  %v456_v7 = vld [vmem:[#allocation3] sm:$0xff] }
 0x217   : > { %2444 = vmatpush2.bf16.msra.mxu0 %v7952_v8 }
 0x218   : > { %2445 = vmatprep.subr.bf16.mxu0 %v7953_v10 }
 0x219   : > { %2485 = vmatpush2.bf16.msra.mxu1 %v7954_v11 }
 0x21a   : > { %2486 = vmatprep.subr.bf16.mxu1 %v7955_v12 }
 0x21b   : > { %2446 = vmatpush2.bf16.msra.mxu0 %v7956_v13 }
 0x21c   : > { %2447 = vmatprep.subr.bf16.mxu0 %v7957_v15 }
 0x21d   : > { %2487 = vmatpush2.bf16.msra.mxu1 %v7958_v16 }
 0x21e   : > { %2488 = vmatprep.subr.bf16.mxu1 %v7959_v17 }
 0x21f   : > { %2448 = vmatpush2.bf16.msra.mxu0 %v7960_v18 }
 0x220   : > { %2449 = vmatprep.subr.bf16.mxu0 %v7961_v19 }
 0x221   : > { %2489 = vmatpush2.bf16.msra.mxu1 %v7962_v20  ;;  %v1571_v20 = vld [vmem:[%s7717_s5] sm:$0xf] }
 0x222   : > { %2490 = vmatprep.subr.bf16.mxu1 %v7963_v21  ;;  %v1576_v21 = vrot.slane %v1571_v20, %v7982_v35 }
 0x223   : > { %2450 = vmatpush2.bf16.msra.mxu0 %v7964_v22  ;;  %v1580_v22 = vrot.slane %v1571_v20, %v7983_v36 }
 0x224   : > { %2451 = vmatprep.subr.bf16.mxu0 %v7965_v23 }
 0x225   : > { %2491 = vmatpush2.bf16.msra.mxu1 %v7966_v24 }
 0x226   : > { %2492 = vmatprep.subr.bf16.mxu1 %v7967_v25 }
 0x227   : > { %2452 = vmatpush2.bf16.msra.mxu0 %v7968_v26 }
 0x228   : > { %2453 = vmatprep.subr.bf16.mxu0 %v7969_v27 }
 0x229   : > { %2493 = vmatpush2.bf16.msra.mxu1 %v7970_v28 }
 0x22a   : > { %2494 = vmatprep.subr.bf16.mxu1 %v7971_v29 }
 0x22b   : > { %2454 = vmatpush2.bf16.msra.mxu0 %v7972_v30 }
 0x22c   : > { %2455 = vmatprep.subr.bf16.mxu0 %v7973_v31 }
 0x22d   : > { %2495 = vmatpush2.bf16.msra.mxu1 %v7974_v32 }
 0x22e   : > { %2496 = vmatprep.subr.bf16.mxu1 %v7975_v5 }
 0x22f   : > { %2456 = vmatpush2.bf16.msra.mxu0 %v7976_v44  ;;  %v1584_v44 = vrot.slane %v1571_v20, %v7984_v55 }
 0x230   : > { %2457 = vmatprep.subr.bf16.mxu0 %v7977_v0 }
 0x231   : > { %2497 = vmatpush2.bf16.msra.mxu1 %v7978_v38 }
 0x232   : > { %2498 = vmatprep.subr.bf16.mxu1 %v7979_v39  ;;  %v1588_v39 = vrot.slane %v1571_v20, %v6934_v33  ;;  %v7124_v20 = vld [vmem:[#allocation11 + $0x40] ss:$16 sps:$4 sm:$0xff]  }
 0x233   : > { %2458 = vmatpush2.bf16.msra.mxu0 %v7980_v40 }
 0x234   : > { %2952 = vmatprep.subr.bf16.mxu0 %v7036_v4 }
 0x235   : > { %2499 = vmatpush2.bf16.msra.mxu1 %v7981_v63 }
 0x236   : > { %2993 = vmatprep.subr.bf16.mxu1 %v7044_v51 }
 0x276   : > { %v1423_v46 = vpop.f32.mrf.mxu0  ;;  %v1464_v41 = vpop.f32.mrf.mxu1 }
 0x277   : > { %v1424_v45 = vadd.f32 %v1423_v46, %v1052_v34  ;;  %v1465_v57 = vadd.f32 %v1464_v41, %v1060_v56  ;;  %v7067_v56 = vld [vmem:[#allocation11 + $0xe0] ss:$16 sps:$4 sm:$0xff]  }
 0x278   : > { %v1425_v42 = vpop.f32.mrf.mxu0  ;;  %v1466_v14 = vpop.f32.mrf.mxu1 }
 0x279   : > { %v5038_v48 = vmul.f32 -1.442695, %v1424_v45  ;;  %v1426_v49 = vadd.f32 %v1425_v42, %v1056_v43  ;;  %v5040_v59 = vmul.f32 -1.442695, %v1465_v57  ;;  %v1467_v61 = vadd.f32 %v1466_v14, %v1064_v58  ;;  %v7069_v58 = vld [vmem:[#allocation11 + $0xc4] ss:$16 sps:$4 sm:$0xff]  }
 0x27a   : > { %v1427_v47 = vpop.f32.mrf.mxu0  ;;  %v1468_v52 = vpop.f32.mrf.mxu1 }
 0x27b   : > { %6020 = vpow2.f32 %v5038_v48  ;;  %v5039_v50 = vmul.f32 -1.442695, %v1426_v49 }
 0x27c   : > { %v1428_v53 = vpop.f32.mrf.mxu0  ;;  %v1469_v54 = vpop.f32.mrf.mxu1 }
 0x27d   : > { %6022 = vpow2.f32 %v5039_v50 }
 0x27e   : > { %6024 = vpow2.f32 %v5040_v59  ;;  %v7071_v59 = vld [vmem:[#allocation11 + $0xe8] ss:$16 sps:$4 sm:$0xff]  }
 0x288   : > { %v6021_v60 = vpop.eup %6020 }
 0x289   : > { %v1480_v62 = vadd.f32 1.0, %v6021_v60  ;;  %v7073_v60 = vld [vmem:[#allocation11 + $0xcc] ss:$16 sps:$4 sm:$0xff]  }
 0x28a   : > { %v6023_v1 = vpop.eup %6022 }
 0x28b   : > { %6026 = vrcp.f32 %v1480_v62  ;;  %v1481_v2 = vadd.f32 1.0, %v6023_v1  ;;  %v6025_v3 = vpop.eup %6024  ;;  %v7082_v62 = vld [vmem:[#allocation11 + $0xc8] ss:$16 sps:$4 sm:$0xff]   ;;  %v7085_v1 = vld [vmem:[#allocation11 + $0xac] ss:$16 sps:$4 sm:$0xff]  }
 0x28c   : > { %6028 = vtanh.f32 %v1467_v61  ;;  %v1482_v11 = vadd.f32 1.0, %v6025_v3  ;;  %v7079_v61 = vld [vmem:[#allocation11 + $0xa4] ss:$16 sps:$4 sm:$0xff]  }
 0x28d   : > { %6030 = vrcp.f32 %v1481_v2  ;;  %v7088_v2 = vld [vmem:[#allocation11 + $0xa0] ss:$16 sps:$4 sm:$0xff]   ;;  %v7091_v3 = vld [vmem:[#allocation11 + $0x84] ss:$16 sps:$4 sm:$0xff]  }
 0x28e   : > { %6032 = vrcp.f32 %v1482_v11  ;;  %v7106_v11 = vld [vmem:[#allocation11 + $0x88] ss:$16 sps:$4 sm:$0xff]  }
 0x298   : > { %v6027_v6 = vpop.eup %6026 }
 0x299   : > { %v6029_v8 = vpop.eup %6028 }
 0x29a   : > { %v6031_v10 = vpop.eup %6030  ;;  %v1491_v13 = vmul.f32 %v6029_v8, %v6027_v6  ;;  %v7094_v6 = vld [vmem:[#allocation11 + $0xa8] ss:$16 sps:$4 sm:$0xff]   ;;  %v7100_v8 = vld [vmem:[#allocation11 + $0x80] ss:$16 sps:$4 sm:$0xff]  }
 0x29b   : > { %v1490_v12 = vmul.f32 %v6031_v10, %v456_v7  ;;  %v6033_v16 = vpop.eup %6032  ;;  %v7097_v7 = vld [vmem:[#allocation11 + $0x8c] ss:$16 sps:$4 sm:$0xff]   ;;  %v7103_v10 = vld [vmem:[#allocation11 + $0x64] ss:$16 sps:$4 sm:$0xff]  }
 0x29d   : > { %v7049_v15 = vadd.f32 %v1491_v13, %v1490_v12  ;;  %v7109_v12 = vld [vmem:[#allocation11 + $0x6c] ss:$16 sps:$4 sm:$0xff]   ;;  %v7112_v13 = vld [vmem:[#allocation11 + $0x60] ss:$16 sps:$4 sm:$0xff]  }
 0x29f   : > { %6034 = vtanh.f32 %v7049_v15 }
 0x2ac   : > { %v6035_v17 = vpop.eup %6034 }
 0x2ad   : > { %v7052_v18 = vmul.f32 %v6035_v17, %v6033_v16  ;;  %v7115_v16 = vld [vmem:[#allocation11 + $0x44] ss:$16 sps:$4 sm:$0xff]   ;;  %v7118_v17 = vld [vmem:[#allocation11 + $0x68] ss:$16 sps:$4 sm:$0xff]  }
 0x2af   : > { %7985 = vst [vmem:[#allocation26_spill] sm:$0xff] %v7052_v18  ;;  %v2020_v19 = vpack.c.bf16 %v7052_v18, %v7052_v18  ;;  %v7230_v18 = vld [vmem:[#allocation11 + $0x124] ss:$16 sps:$4 sm:$0xff]  }
 0x2b0   : > { %8003 = vst [vmem:[#allocation41_spill] sm:$0xff] %v7230_v18 }
 0x2b1   : > { %2459 = vmatprep.mubr.bf16.mxu0 %v2020_v19  ;;  %2500 = vmatprep.mubr.bf16.mxu1 %v2020_v19  ;;  %v7121_v19 = vld [vmem:[#allocation11 + $0x4c] ss:$16 sps:$4 sm:$0xff]  }
 0x2b6   : > { %v1947_v23 = vpop.f32.mrf.mxu0 }
 0x2b7   : > { %v1948_v24 = vadd.f32 %v1947_v23, %v1576_v21  ;;  %v7127_v21 = vld [vmem:[#allocation11 + $0x24] ss:$16 sps:$4 sm:$0xff]   ;;  %v7133_v23 = vld [vmem:[#allocation11 + $0x2c] ss:$16 sps:$4 sm:$0xff]  }
 0x2b8   : > { %v1949_v25 = vpop.f32.mrf.mxu0  ;;  %v1988_v26 = vpop.f32.mrf.mxu1 }
 0x2b9   : > { %v5105_v27 = vmul.f32 -1.442695, %v1948_v24  ;;  %v1950_v28 = vadd.f32 %v1949_v25, %v1580_v22  ;;  %v1989_v38 = vadd.f32 %v1988_v26, %v1584_v44  ;;  %v7130_v22 = vld [vmem:[#allocation11 + $0x48] ss:$16 sps:$4 sm:$0xff]   ;;  %v7136_v24 = vld [vmem:[#allocation11 + $0x20] ss:$16 sps:$4 sm:$0xff]  }
 0x2ba   : > { %v1951_v29 = vpop.f32.mrf.mxu0  ;;  %v1990_v30 = vpop.f32.mrf.mxu1  ;;  %v7139_v25 = vld [vmem:[#allocation11 + $0x4] ss:$16 sps:$4 sm:$0xff]   ;;  %v7142_v26 = vld [vmem:[#allocation11 + $0x28] ss:$16 sps:$4 sm:$0xff]  }
 0x2bb   : > { %6036 = vpow2.f32 %v5105_v27  ;;  %v5106_v31 = vmul.f32 -1.442695, %v1950_v28  ;;  %v5107_v40 = vmul.f32 -1.442695, %v1989_v38  ;;  %v1991_v63 = vadd.f32 %v1990_v30, %v1588_v39  ;;  %v7145_v27 = vld [vmem:[#allocation11 + $0xc] ss:$16 sps:$4 sm:$0xff]  }
 0x2bc   : > { %v1952_v32 = vpop.f32.mrf.mxu0  ;;  %v1992_v5 = vpop.f32.mrf.mxu1  ;;  %v7148_v28 = vld [vmem:[#allocation11] ss:$16 sps:$4 sm:$0xff]   ;;  %v7151_v29 = vld [vmem:[#allocation11 + $0x1e4] ss:$16 sps:$4 sm:$0xff]   ;;  %v7154_v30 = vld [vmem:[#allocation11 + $0x8] ss:$16 sps:$4 sm:$0xff]  }
 0x2bd   : > { %6038 = vpow2.f32 %v5106_v31  ;;  %v7157_v31 = vld [vmem:[#allocation11 + $0x1ec] ss:$16 sps:$4 sm:$0xff]   ;;  %v7160_v32 = vld [vmem:[#allocation11 + $0x1e0] ss:$16 sps:$4 sm:$0xff]   ;;  %v7163_v5 = vld [vmem:[#allocation11 + $0x1c4] ss:$16 sps:$4 sm:$0xff]  }
 0x2be   : > { %v1993_v0 = vpop.f32.mrf.mxu1  ;;  %6040 = vpow2.f32 %v5107_v40  ;;  %v7167_v44 = vld [vmem:[#allocation11 + $0x1e8] ss:$16 sps:$4 sm:$0xff]   ;;  %v7173_v38 = vld [vmem:[#allocation11 + $0x1c0] ss:$16 sps:$4 sm:$0xff]   ;;  %v7180_v39 = vld [vmem:[#allocation11 + $0x1a4] ss:$16 sps:$4 sm:$0xff]  }
 0x2bf   : > { %6042 = vtanh.f32 %v1991_v63  ;;  %v7170_v0 = vld [vmem:[#allocation11 + $0x1cc] ss:$16 sps:$4 sm:$0xff]   ;;  %7987 = vst [vmem:[#allocation25_spill] sm:$0xff] %v7180_v39  ;;  %v7183_v40 = vld [vmem:[#allocation11 + $0x1c8] ss:$16 sps:$4 sm:$0xff]  }
 0x2c0   : > { %7988 = vst [vmem:[#allocation28_spill] sm:$0xff] %v7183_v40  ;;  %v7186_v63 = vld [vmem:[#allocation11 + $0x1ac] ss:$16 sps:$4 sm:$0xff]  }
 0x2c1   : > { %7989 = vst [vmem:[#allocation27_spill] sm:$0xff] %v7186_v63 }
 0x2c8   : > { %v6037_v9 = vpop.eup %6036 }
 0x2c9   : > { %v2004_v34 = vadd.f32 1.0, %v6037_v9  ;;  %v7189_v9 = vld [vmem:[#allocation11 + $0x1a0] ss:$16 sps:$4 sm:$0xff]  }
 0x2ca   : > { %v6039_v43 = vpop.eup %6038  ;;  %7990 = vst [vmem:[#allocation30_spill] sm:$0xff] %v7189_v9 }
 0x2cb   : > { %6044 = vrcp.f32 %v2004_v34  ;;  %v2005_v46 = vadd.f32 1.0, %v6039_v43  ;;  %v6041_v41 = vpop.eup %6040  ;;  %v7194_v34 = vld [vmem:[#allocation11 + $0x184] ss:$16 sps:$4 sm:$0xff]   ;;  %v7197_v43 = vld [vmem:[#allocation11 + $0x1a8] ss:$16 sps:$4 sm:$0xff]  }
 0x2cc   : > { %v6043_v45 = vpop.eup %6042  ;;  %v2006_v48 = vadd.f32 1.0, %v6041_v41  ;;  %7991 = vst [vmem:[#allocation29_spill] sm:$0xff] %v7194_v34  ;;  %7992 = vst [vmem:[#allocation32_spill] sm:$0xff] %v7197_v43  ;;  %v7203_v41 = vld [vmem:[#allocation11 + $0x180] ss:$16 sps:$4 sm:$0xff]  }
 0x2cd   : > { %6046 = vrcp.f32 %v2005_v46  ;;  %v7200_v46 = vld [vmem:[#allocation11 + $0x18c] ss:$16 sps:$4 sm:$0xff]   ;;  %7994 = vst [vmem:[#allocation34_spill] sm:$0xff] %v7203_v41 }
 0x2ce   : > { %6048 = vrcp.f32 %v2006_v48  ;;  %7993 = vst [vmem:[#allocation31_spill] sm:$0xff] %v7200_v46  ;;  %v7215_v48 = vld [vmem:[#allocation11 + $0x160] ss:$16 sps:$4 sm:$0xff]  }
 0x2cf   : > { %7998 = vst [vmem:[#allocation38_spill] sm:$0xff] %v7215_v48 }
 0x2d8   : > { %v6045_v42 = vpop.eup %6044 }
 0x2d9   : > { %v2015_v47 = vmul.f32 %v6045_v42, %v6043_v45  ;;  %v7206_v45 = vld [vmem:[#allocation11 + $0x164] ss:$16 sps:$4 sm:$0xff]   ;;  %v7209_v42 = vld [vmem:[#allocation11 + $0x188] ss:$16 sps:$4 sm:$0xff]  }
 0x2da   : > { %v6047_v14 = vpop.eup %6046  ;;  %7995 = vst [vmem:[#allocation33_spill] sm:$0xff] %v7206_v45  ;;  %7996 = vst [vmem:[#allocation36_spill] sm:$0xff] %v7209_v42 }
 0x2db   : > { %v2014_v49 = vmul.f32 %v6047_v14, %v6937_v37  ;;  %v6049_v50 = vpop.eup %6048  ;;  %v7076_v37 = vld [vmem:[#allocation11 + $0xc0] ss:$16 sps:$4 sm:$0xff]   ;;  %v7212_v14 = vld [vmem:[#allocation11 + $0x16c] ss:$16 sps:$4 sm:$0xff]  }
 0x2dc   : > { %7997 = vst [vmem:[#allocation35_spill] sm:$0xff] %v7212_v14 }
 0x2dd   : > { %v7064_v52 = vadd.f32 %v2015_v47, %v2014_v49  ;;  %v7218_v49 = vld [vmem:[#allocation11 + $0x144] ss:$16 sps:$4 sm:$0xff]   ;;  %v7221_v47 = vld [vmem:[#allocation11 + $0x168] ss:$16 sps:$4 sm:$0xff]  }
 0x2de   : > { %7999 = vst [vmem:[#allocation37_spill] sm:$0xff] %v7218_v49  ;;  %8000 = vst [vmem:[#allocation40_spill] sm:$0xff] %v7221_v47 }
 0x2df   : > { %6050 = vtanh.f32 %v7064_v52 }
 0x2ec   : > { %v6051_v53 = vpop.eup %6050 }
 0x2ed   : > { %v2018_v54 = vmul.f32 %v6051_v53, %v6049_v50  ;;  %v7224_v50 = vld [vmem:[#allocation11 + $0x14c] ss:$16 sps:$4 sm:$0xff]   ;;  %v7227_v53 = vld [vmem:[#allocation11 + $0x140] ss:$16 sps:$4 sm:$0xff]  }
 0x2ee   : > { %8001 = vst [vmem:[#allocation39_spill] sm:$0xff] %v7224_v50  ;;  %8002 = vst [vmem:[#allocation42_spill] sm:$0xff] %v7227_v53 }
 0x2ef   : > { %v2019_v57 = vpack.c.bf16 %v2018_v54, %v2018_v54  ;;  %v2539_v54 = vstv %s2538_s17  ;;  %s6337_s17 = scalar_lea.vmem %s6336_s22, 1024 }
 0x2f0   : > { %p6339_p8 = scmp.lt.s32.totalorder %s6337_s17, %s6331_s20 }
 0x2f1   : > { %2460 = vmatmul.mubr.bf16.vlgmr.msra.gmra.mxu0 %v2019_v57  ;;  %2501 = vmatmul.mubr.bf16.vlgmr.msra.gmra.mxu1 %v2019_v57 }
 0x2f2   : > { %2953 = vmatpush1.bf16.msra.mxu0 %v7067_v56  ;;  %2984 = vmatprep.mubr.bf16.mxu0 %v2019_v57  ;;  %p6340_p7 = por %p6339_p8, %p6338_p3 }
 0x2f3   : > { %3025 = vmatprep.mubr.bf16.mxu1 %v2019_v57  ;;  %2954 = vmatprep.subr.bf16.mxu0 %v7069_v58  ;;  %v2542_v57 = vstv %s2541_s25 }
 0x2f4   : > { %2994 = vmatpush1.bf16.msra.mxu1 %v7071_v59  ;;  %p6341_p6 = pnand %p6340_p7, %p6334_p5 }
 0x2f5   : > { %2995 = vmatprep.subr.bf16.mxu1 %v7073_v60 }
 0x2f6   : > { %2955 = vmatpush1.bf16.msra.mxu0 %v7076_v37 }
 0x2f7   : > { %2956 = vmatprep.subr.bf16.mxu0 %v7079_v61 }
 0x2f8   : > { %2996 = vmatpush1.bf16.msra.mxu1 %v7082_v62 }
 0x2f9   : > { %2997 = vmatprep.subr.bf16.mxu1 %v7085_v1 }
 0x2fa   : > { %2957 = vmatpush1.bf16.msra.mxu0 %v7088_v2 }
 0x2fb   : > { %2958 = vmatprep.subr.bf16.mxu0 %v7091_v3 }
 0x2fc   : > { %2998 = vmatpush1.bf16.msra.mxu1 %v7094_v6 }
 0x2fd   : > { %2999 = vmatprep.subr.bf16.mxu1 %v7097_v7 }
 0x2fe   : > { %2959 = vmatpush1.bf16.msra.mxu0 %v7100_v8 }
 0x2ff   : > { %2960 = vmatprep.subr.bf16.mxu0 %v7103_v10 }
 0x300   : > { %3000 = vmatpush1.bf16.msra.mxu1 %v7106_v11 }
 0x301   : > { %3001 = vmatprep.subr.bf16.mxu1 %v7109_v12 }
 0x302   : > { %2961 = vmatpush1.bf16.msra.mxu0 %v7112_v13 }
 0x303   : > { %2962 = vmatprep.subr.bf16.mxu0 %v7115_v16 }
 0x304   : > { %3002 = vmatpush1.bf16.msra.mxu1 %v7118_v17 }
 0x305   : > { %3003 = vmatprep.subr.bf16.mxu1 %v7121_v19 }
 0x306   : > { %2963 = vmatpush1.bf16.msra.mxu0 %v7124_v20 }
 0x307   : > { %2964 = vmatprep.subr.bf16.mxu0 %v7127_v21 }
 0x308   : > { %3004 = vmatpush1.bf16.msra.mxu1 %v7130_v22 }
 0x309   : > { %3005 = vmatprep.subr.bf16.mxu1 %v7133_v23 }
 0x30a   : > { %2965 = vmatpush1.bf16.msra.mxu0 %v7136_v24 }
 0x30b   : > { %2966 = vmatprep.subr.bf16.mxu0 %v7139_v25 }
 0x30c   : > { %3006 = vmatpush1.bf16.msra.mxu1 %v7142_v26 }
 0x30d   : > { %3007 = vmatprep.subr.bf16.mxu1 %v7145_v27 }
 0x30e   : > { %2967 = vmatpush1.bf16.msra.mxu0 %v7148_v28 }
 0x30f   : > { %2968 = vmatprep.subr.bf16.mxu0 %v7151_v29 }
 0x310   : > { %3008 = vmatpush1.bf16.msra.mxu1 %v7154_v30 }
 0x311   : > { %3009 = vmatprep.subr.bf16.mxu1 %v7157_v31 }
 0x312   : > { %2969 = vmatpush2.bf16.msra.mxu0 %v7160_v32 }
 0x313   : > { %2970 = vmatprep.subr.bf16.mxu0 %v7163_v5 }
 0x314   : > { %3010 = vmatpush2.bf16.msra.mxu1 %v7167_v44 }
 0x315   : > { %3011 = vmatprep.subr.bf16.mxu1 %v7170_v0 }
 0x316   : > { %2971 = vmatpush2.bf16.msra.mxu0 %v7173_v38 }
 0x317   : > { %2972 = vmatprep.subr.bf16.mxu0 %v7180_v39 }
 0x318   : > { %3012 = vmatpush2.bf16.msra.mxu1 %v7183_v40 }
 0x319   : > { %3013 = vmatprep.subr.bf16.mxu1 %v7186_v63 }
 0x31a   : > { %2973 = vmatpush2.bf16.msra.mxu0 %v7189_v9 }
 0x31b   : > { %2974 = vmatprep.subr.bf16.mxu0 %v7194_v34 }
 0x31c   : > { %3014 = vmatpush2.bf16.msra.mxu1 %v7197_v43  ;;  %v7251_v43 = vld [vmem:[#allocation11 + $0x128] ss:$16 sps:$4 sm:$0xff]  }
 0x31d   : > { %3015 = vmatprep.subr.bf16.mxu1 %v7200_v46  ;;  %v7242_v46 = vld [vmem:[#allocation11 + $0x12c] ss:$16 sps:$4 sm:$0xff]   ;;  %8010 = vst [vmem:[#allocation50_spill] sm:$0xff] %v7251_v43 }
 0x31e   : > { %2975 = vmatpush2.bf16.msra.mxu0 %v7203_v41  ;;  %v7238_v41 = vld [vmem:[#allocation5 + $0x8] sm:$0xff]  ;;  %8007 = vst [vmem:[#allocation45_spill] sm:$0xff] %v7242_v46 }
 0x31f   : > { %2976 = vmatprep.subr.bf16.mxu0 %v7206_v45  ;;  %v7233_v45 = vld [vmem:[#allocation11 + $0x148] ss:$16 sps:$4 sm:$0xff]   ;;  %8006 = vst [vmem:[#allocation46_spill] sm:$0xff] %v7238_v41 }
 0x320   : > { %3016 = vmatpush2.bf16.msra.mxu1 %v7209_v42  ;;  %8004 = vst [vmem:[#allocation44_spill] sm:$0xff] %v7233_v45  ;;  %v7235_v42 = vld [vmem:[#allocation5] sm:$0xff] }
 0x321   : > { %3017 = vmatprep.subr.bf16.mxu1 %v7212_v14  ;;  %8005 = vst [vmem:[#allocation43_spill] sm:$0xff] %v7235_v42  ;;  %v2540_v14 = vmul.f32 %v7235_v42, %v2539_v54 }
 0x322   : > { %2977 = vmatpush2.bf16.msra.mxu0 %v7215_v48  ;;  %v2543_v48 = vmul.f32 %v7238_v41, %v2542_v57  ;;  %v7254_v57 = vld [vmem:[#allocation11 + $0x10c] ss:$16 sps:$4 sm:$0xff]  }
 0x323   : > { %2978 = vmatprep.subr.bf16.mxu0 %v7218_v49  ;;  %v7245_v49 = vld [vmem:[#allocation11 + $0x120] ss:$16 sps:$4 sm:$0xff]   ;;  %8011 = vst [vmem:[#allocation49_spill] sm:$0xff] %v7254_v57 }
 0x324   : > { %3018 = vmatpush2.bf16.msra.mxu1 %v7221_v47  ;;  %8008 = vst [vmem:[#allocation48_spill] sm:$0xff] %v7245_v49  ;;  %v7248_v47 = vld [vmem:[#allocation11 + $0x104] ss:$16 sps:$4 sm:$0xff]   ;;  %v2544_v54 = vadd.f32 %v2543_v48, %v2540_v14  ;;  %v7266_v14 = vld [vmem:[#allocation13 + $0xe0] ss:$16 sps:$4 sm:$0xff]  }
 0x325   : > { %3019 = vmatprep.subr.bf16.mxu1 %v7224_v50  ;;  %8009 = vst [vmem:[#allocation47_spill] sm:$0xff] %v7248_v47  ;;  %v7257_v50 = vld [vmem:[#allocation11 + $0x100] ss:$16 sps:$4 sm:$0xff]   ;;  %8014 = vst [vmem:[#allocation54_spill] sm:$0xff] %v7266_v14  ;;  %v7268_v48 = vld [vmem:[#allocation13 + $0xe4] ss:$16 sps:$4 sm:$0xff]  }
 0x326   : > { %2979 = vmatpush2.bf16.msra.mxu0 %v7227_v53  ;;  %8012 = vst [vmem:[#allocation52_spill] sm:$0xff] %v7257_v50  ;;  %v2545_v53 = vpack.c.bf16 %v2544_v54, %v2544_v54  ;;  %8015 = vst [vmem:[#allocation53_spill] sm:$0xff] %v7268_v48  ;;  %v7278_v54 = vld [vmem:[#allocation13 + $0xc0] ss:$16 sps:$4 sm:$0xff]  }
 0x327   : > { %2980 = vmatprep.subr.bf16.mxu0 %v7230_v18  ;;  %v7261_v18 = vld [vmem:[#allocation11 + $0x108] ss:$16 sps:$4 sm:$0xff]   ;;  %8018 = vst [vmem:[#allocation58_spill] sm:$0xff] %v7278_v54 }
 0x328   : > { %3020 = vmatpush2.bf16.msra.mxu1 %v7233_v45  ;;  %8013 = vst [vmem:[#allocation51_spill] sm:$0xff] %v7261_v18 }
 0x329   : > { %3021 = vmatprep.subr.bf16.mxu1 %v7242_v46 }
 0x32a   : > { %2981 = vmatpush2.bf16.msra.mxu0 %v7245_v49  ;;  %v7270_v49 = vld [vmem:[#allocation13 + $0xe8] ss:$16 sps:$4 sm:$0xff]  }
 0x32b   : > { %2982 = vmatprep.subr.bf16.mxu0 %v7248_v47  ;;  %8016 = vst [vmem:[#allocation57_spill] sm:$0xff] %v7270_v49  ;;  %v7272_v47 = vld [vmem:[#allocation13 + $0xec] ss:$16 sps:$4 sm:$0xff]  }
 0x32c   : > { %3022 = vmatpush2.bf16.msra.mxu1 %v7251_v43  ;;  %8017 = vst [vmem:[#allocation55_spill] sm:$0xff] %v7272_v47  ;;  %v7434_v43 = vld [vmem:[#allocation13 + $0x12c] ss:$16 sps:$4 sm:$0xff]  }
 0x32d   : > { %3023 = vmatprep.subr.bf16.mxu1 %v7254_v57  ;;  %v7418_v57 = vld [vmem:[#allocation13 + $0x144] ss:$16 sps:$4 sm:$0xff]   ;;  %8071 = vst [vmem:[#allocation110_spill] sm:$0xff] %v7434_v43 }
 0x32e   : > { %2983 = vmatpush2.bf16.msra.mxu0 %v7257_v50  ;;  %v7284_v50 = vld [vmem:[#allocation13 + $0xcc] ss:$16 sps:$4 sm:$0xff]   ;;  %8066 = vst [vmem:[#allocation105_spill] sm:$0xff] %v7418_v57 }
 0x32f   : > { %3466 = vmatprep.subr.bf16.mxu0 %v7268_v48  ;;  %8021 = vst [vmem:[#allocation59_spill] sm:$0xff] %v7284_v50  ;;  %v7297_v48 = vld [vmem:[#allocation13 + $0xa8] ss:$16 sps:$4 sm:$0xff]  }
 0x330   : > { %3024 = vmatpush2.bf16.msra.mxu1 %v7261_v18  ;;  %v7280_v18 = vld [vmem:[#allocation13 + $0xc4] ss:$16 sps:$4 sm:$0xff]   ;;  %8025 = vst [vmem:[#allocation64_spill] sm:$0xff] %v7297_v48 }
 0x331   : > { %2985 = vmatmul.mubr.bf16.vlgmr.msra.gmra.mxu0 %v2545_v53  ;;  %3507 = vmatprep.subr.bf16.mxu1 %v7272_v47  ;;  %8019 = vst [vmem:[#allocation56_spill] sm:$0xff] %v7280_v18  ;;  %v7292_v47 = vld [vmem:[#allocation13 + $0xa0] ss:$16 sps:$4 sm:$0xff]  }
 0x332   : > { %3467 = vmatpush1.bf16.msra.mxu0 %v7266_v14  ;;  %v7290_v14 = vld [vmem:[#allocation13 + $0xa4] ss:$16 sps:$4 sm:$0xff]   ;;  %8023 = vst [vmem:[#allocation61_spill] sm:$0xff] %v7292_v47 }
 0x333   : > { %3026 = vmatmul.mubr.bf16.vlgmr.msra.gmra.mxu1 %v2545_v53  ;;  %v7282_v53 = vld [vmem:[#allocation13 + $0xc8] ss:$16 sps:$4 sm:$0xff]   ;;  %3468 = vmatprep.subr.bf16.mxu0 %v7280_v18  ;;  %8022 = vst [vmem:[#allocation62_spill] sm:$0xff] %v7290_v14 }
 0x334   : > { %3508 = vmatpush1.bf16.msra.mxu1 %v7270_v49  ;;  %8020 = vst [vmem:[#allocation60_spill] sm:$0xff] %v7282_v53  ;;  %v7294_v49 = vld [vmem:[#allocation13 + $0xac] ss:$16 sps:$4 sm:$0xff]   ;;  %v7309_v18 = vld [vmem:[#allocation13 + $0x88] ss:$16 sps:$4 sm:$0xff]  }
 0x335   : > { %3509 = vmatprep.subr.bf16.mxu1 %v7284_v50  ;;  %8024 = vst [vmem:[#allocation63_spill] sm:$0xff] %v7294_v49  ;;  %v7304_v50 = vld [vmem:[#allocation13 + $0x80] ss:$16 sps:$4 sm:$0xff]   ;;  %8029 = vst [vmem:[#allocation68_spill] sm:$0xff] %v7309_v18 }
 0x336   : > { %3469 = vmatpush1.bf16.msra.mxu0 %v7278_v54  ;;  %v7302_v54 = vld [vmem:[#allocation13 + $0x84] ss:$16 sps:$4 sm:$0xff]   ;;  %8027 = vst [vmem:[#allocation65_spill] sm:$0xff] %v7304_v50 }
 0x337   : > { %3470 = vmatprep.subr.bf16.mxu0 %v7290_v14  ;;  %8026 = vst [vmem:[#allocation66_spill] sm:$0xff] %v7302_v54  ;;  %v7321_v14 = vld [vmem:[#allocation13 + $0x68] ss:$16 sps:$4 sm:$0xff]  }
 0x338   : > { %3510 = vmatpush1.bf16.msra.mxu1 %v7282_v53  ;;  %v7306_v53 = vld [vmem:[#allocation13 + $0x8c] ss:$16 sps:$4 sm:$0xff]   ;;  %8033 = vst [vmem:[#allocation72_spill] sm:$0xff] %v7321_v14 }
 0x339   : > { %3511 = vmatprep.subr.bf16.mxu1 %v7294_v49  ;;  %8028 = vst [vmem:[#allocation67_spill] sm:$0xff] %v7306_v53  ;;  %v7316_v49 = vld [vmem:[#allocation13 + $0x60] ss:$16 sps:$4 sm:$0xff]  }
 0x33a   : > { %3471 = vmatpush1.bf16.msra.mxu0 %v7292_v47  ;;  %v7314_v47 = vld [vmem:[#allocation13 + $0x64] ss:$16 sps:$4 sm:$0xff]   ;;  %8031 = vst [vmem:[#allocation70_spill] sm:$0xff] %v7316_v49 }
 0x33b   : > { %3472 = vmatprep.subr.bf16.mxu0 %v7302_v54  ;;  %8030 = vst [vmem:[#allocation69_spill] sm:$0xff] %v7314_v47  ;;  %v7333_v54 = vld [vmem:[#allocation13 + $0x48] ss:$16 sps:$4 sm:$0xff]  }
 0x33c   : > { %3512 = vmatpush1.bf16.msra.mxu1 %v7297_v48  ;;  %v7318_v48 = vld [vmem:[#allocation13 + $0x6c] ss:$16 sps:$4 sm:$0xff]   ;;  %8037 = vst [vmem:[#allocation76_spill] sm:$0xff] %v7333_v54 }
 0x33d   : > { %3513 = vmatprep.subr.bf16.mxu1 %v7306_v53  ;;  %8032 = vst [vmem:[#allocation71_spill] sm:$0xff] %v7318_v48  ;;  %v7328_v53 = vld [vmem:[#allocation13 + $0x40] ss:$16 sps:$4 sm:$0xff]  }
 0x33e   : > { %3473 = vmatpush1.bf16.msra.mxu0 %v7304_v50  ;;  %v7326_v50 = vld [vmem:[#allocation13 + $0x44] ss:$16 sps:$4 sm:$0xff]   ;;  %8035 = vst [vmem:[#allocation74_spill] sm:$0xff] %v7328_v53 }
 0x33f   : > { %3474 = vmatprep.subr.bf16.mxu0 %v7314_v47  ;;  %8034 = vst [vmem:[#allocation73_spill] sm:$0xff] %v7326_v50  ;;  %v7345_v47 = vld [vmem:[#allocation13 + $0x28] ss:$16 sps:$4 sm:$0xff]  }
 0x340   : > { %3514 = vmatpush1.bf16.msra.mxu1 %v7309_v18  ;;  %v7330_v18 = vld [vmem:[#allocation13 + $0x4c] ss:$16 sps:$4 sm:$0xff]   ;;  %8041 = vst [vmem:[#allocation80_spill] sm:$0xff] %v7345_v47 }
 0x341   : > { %3515 = vmatprep.subr.bf16.mxu1 %v7318_v48  ;;  %8036 = vst [vmem:[#allocation75_spill] sm:$0xff] %v7330_v18  ;;  %v7340_v48 = vld [vmem:[#allocation13 + $0x20] ss:$16 sps:$4 sm:$0xff]  }
 0x342   : > { %3475 = vmatpush1.bf16.msra.mxu0 %v7316_v49  ;;  %v7338_v49 = vld [vmem:[#allocation13 + $0x24] ss:$16 sps:$4 sm:$0xff]   ;;  %8039 = vst [vmem:[#allocation78_spill] sm:$0xff] %v7340_v48 }
 0x343   : > { %3476 = vmatprep.subr.bf16.mxu0 %v7326_v50  ;;  %8038 = vst [vmem:[#allocation77_spill] sm:$0xff] %v7338_v49  ;;  %v7357_v50 = vld [vmem:[#allocation13 + $0x8] ss:$16 sps:$4 sm:$0xff]  }
 0x344   : > { %3516 = vmatpush1.bf16.msra.mxu1 %v7321_v14  ;;  %v7342_v14 = vld [vmem:[#allocation13 + $0x2c] ss:$16 sps:$4 sm:$0xff]   ;;  %8045 = vst [vmem:[#allocation84_spill] sm:$0xff] %v7357_v50 }
 0x345   : > { %3517 = vmatprep.subr.bf16.mxu1 %v7330_v18  ;;  %8040 = vst [vmem:[#allocation79_spill] sm:$0xff] %v7342_v14  ;;  %v7352_v18 = vld [vmem:[#allocation13] ss:$16 sps:$4 sm:$0xff]  }
 0x346   : > { %3477 = vmatpush1.bf16.msra.mxu0 %v7328_v53  ;;  %v7350_v53 = vld [vmem:[#allocation13 + $0x4] ss:$16 sps:$4 sm:$0xff]   ;;  %8043 = vst [vmem:[#allocation82_spill] sm:$0xff] %v7352_v18 }
 0x347   : > { %3478 = vmatprep.subr.bf16.mxu0 %v7338_v49  ;;  %8042 = vst [vmem:[#allocation81_spill] sm:$0xff] %v7350_v53  ;;  %v7369_v49 = vld [vmem:[#allocation13 + $0x1e8] ss:$16 sps:$4 sm:$0xff]  }
 0x348   : > { %3518 = vmatpush1.bf16.msra.mxu1 %v7333_v54  ;;  %v7354_v54 = vld [vmem:[#allocation13 + $0xc] ss:$16 sps:$4 sm:$0xff]   ;;  %8049 = vst [vmem:[#allocation88_spill] sm:$0xff] %v7369_v49 }
 0x349   : > { %3519 = vmatprep.subr.bf16.mxu1 %v7342_v14  ;;  %8044 = vst [vmem:[#allocation83_spill] sm:$0xff] %v7354_v54  ;;  %v7364_v14 = vld [vmem:[#allocation13 + $0x1e0] ss:$16 sps:$4 sm:$0xff]  }
 0x34a   : > { %3479 = vmatpush1.bf16.msra.mxu0 %v7340_v48  ;;  %v7362_v48 = vld [vmem:[#allocation13 + $0x1e4] ss:$16 sps:$4 sm:$0xff]   ;;  %8047 = vst [vmem:[#allocation86_spill] sm:$0xff] %v7364_v14 }
 0x34b   : > { %3480 = vmatprep.subr.bf16.mxu0 %v7350_v53  ;;  %8046 = vst [vmem:[#allocation85_spill] sm:$0xff] %v7362_v48  ;;  %v7381_v53 = vld [vmem:[#allocation13 + $0x1c8] ss:$16 sps:$4 sm:$0xff]  }
 0x34c   : > { %3520 = vmatpush1.bf16.msra.mxu1 %v7345_v47  ;;  %v7366_v47 = vld [vmem:[#allocation13 + $0x1ec] ss:$16 sps:$4 sm:$0xff]   ;;  %8053 = vst [vmem:[#allocation92_spill] sm:$0xff] %v7381_v53 }
 0x34d   : > { %3521 = vmatprep.subr.bf16.mxu1 %v7354_v54  ;;  %8048 = vst [vmem:[#allocation87_spill] sm:$0xff] %v7366_v47  ;;  %v7376_v54 = vld [vmem:[#allocation13 + $0x1c0] ss:$16 sps:$4 sm:$0xff]  }
 0x34e   : > { %3481 = vmatpush1.bf16.msra.mxu0 %v7352_v18  ;;  %v7374_v18 = vld [vmem:[#allocation13 + $0x1c4] ss:$16 sps:$4 sm:$0xff]   ;;  %8051 = vst [vmem:[#allocation90_spill] sm:$0xff] %v7376_v54 }
 0x34f   : > { %3482 = vmatprep.subr.bf16.mxu0 %v7362_v48  ;;  %8050 = vst [vmem:[#allocation89_spill] sm:$0xff] %v7374_v18  ;;  %v7393_v48 = vld [vmem:[#allocation13 + $0x1a8] ss:$16 sps:$4 sm:$0xff]  }
 0x350   : > { %3522 = vmatpush1.bf16.msra.mxu1 %v7357_v50  ;;  %v7378_v50 = vld [vmem:[#allocation13 + $0x1cc] ss:$16 sps:$4 sm:$0xff]   ;;  %8057 = vst [vmem:[#allocation96_spill] sm:$0xff] %v7393_v48 }
 0x351   : > { %3523 = vmatprep.subr.bf16.mxu1 %v7366_v47  ;;  %8052 = vst [vmem:[#allocation91_spill] sm:$0xff] %v7378_v50  ;;  %v7388_v47 = vld [vmem:[#allocation13 + $0x1a0] ss:$16 sps:$4 sm:$0xff]  }
 0x352   : > { %3483 = vmatpush2.bf16.msra.mxu0 %v7364_v14  ;;  %v7386_v14 = vld [vmem:[#allocation13 + $0x1a4] ss:$16 sps:$4 sm:$0xff]   ;;  %8055 = vst [vmem:[#allocation94_spill] sm:$0xff] %v7388_v47 }
 0x353   : > { %3484 = vmatprep.subr.bf16.mxu0 %v7374_v18  ;;  %8054 = vst [vmem:[#allocation93_spill] sm:$0xff] %v7386_v14  ;;  %v7405_v18 = vld [vmem:[#allocation13 + $0x188] ss:$16 sps:$4 sm:$0xff]  }
 0x354   : > { %3524 = vmatpush2.bf16.msra.mxu1 %v7369_v49  ;;  %v7390_v49 = vld [vmem:[#allocation13 + $0x1ac] ss:$16 sps:$4 sm:$0xff]   ;;  %8061 = vst [vmem:[#allocation100_spill] sm:$0xff] %v7405_v18 }
 0x355   : > { %3525 = vmatprep.subr.bf16.mxu1 %v7378_v50  ;;  %8056 = vst [vmem:[#allocation95_spill] sm:$0xff] %v7390_v49  ;;  %v7400_v50 = vld [vmem:[#allocation13 + $0x180] ss:$16 sps:$4 sm:$0xff]  }
 0x356   : > { %3485 = vmatpush2.bf16.msra.mxu0 %v7376_v54  ;;  %v7398_v54 = vld [vmem:[#allocation13 + $0x184] ss:$16 sps:$4 sm:$0xff]   ;;  %8059 = vst [vmem:[#allocation98_spill] sm:$0xff] %v7400_v50 }
 0x357   : > { %3486 = vmatprep.subr.bf16.mxu0 %v7386_v14  ;;  %8058 = vst [vmem:[#allocation97_spill] sm:$0xff] %v7398_v54  ;;  %v7409_v14 = vld [vmem:[#allocation13 + $0x160] ss:$16 sps:$4 sm:$0xff]  }
 0x358   : > { %3526 = vmatpush2.bf16.msra.mxu1 %v7381_v53  ;;  %v7402_v53 = vld [vmem:[#allocation13 + $0x18c] ss:$16 sps:$4 sm:$0xff]   ;;  %8062 = vst [vmem:[#allocation101_spill] sm:$0xff] %v7409_v14 }
 0x359   : > { %3527 = vmatprep.subr.bf16.mxu1 %v7390_v49  ;;  %8060 = vst [vmem:[#allocation99_spill] sm:$0xff] %v7402_v53  ;;  %v7416_v49 = vld [vmem:[#allocation13 + $0x16c] ss:$16 sps:$4 sm:$0xff]  }
 0x35a   : > { %3487 = vmatpush2.bf16.msra.mxu0 %v7388_v47  ;;  %v7411_v47 = vld [vmem:[#allocation13 + $0x164] ss:$16 sps:$4 sm:$0xff]   ;;  %8065 = vst [vmem:[#allocation104_spill] sm:$0xff] %v7416_v49 }
 0x35b   : > { %3488 = vmatprep.subr.bf16.mxu0 %v7398_v54  ;;  %8063 = vst [vmem:[#allocation102_spill] sm:$0xff] %v7411_v47  ;;  %v7421_v54 = vld [vmem:[#allocation13 + $0x14c] ss:$16 sps:$4 sm:$0xff]  }
 0x35c   : > { %3528 = vmatpush2.bf16.msra.mxu1 %v7393_v48  ;;  %v7414_v48 = vld [vmem:[#allocation13 + $0x168] ss:$16 sps:$4 sm:$0xff]   ;;  %8067 = vst [vmem:[#allocation106_spill] sm:$0xff] %v7421_v54 }
 0x35d   : > { %3529 = vmatprep.subr.bf16.mxu1 %v7402_v53  ;;  %8064 = vst [vmem:[#allocation103_spill] sm:$0xff] %v7414_v48  ;;  %v7431_v53 = vld [vmem:[#allocation13 + $0x124] ss:$16 sps:$4 sm:$0xff]  }
 0x35e   : > { %3489 = vmatpush2.bf16.msra.mxu0 %v7400_v50  ;;  %v7425_v50 = vld [vmem:[#allocation13 + $0x140] ss:$16 sps:$4 sm:$0xff]   ;;  %8070 = vst [vmem:[#allocation109_spill] sm:$0xff] %v7431_v53 }
 0x35f   : > { %3490 = vmatprep.subr.bf16.mxu0 %v7411_v47  ;;  %8068 = vst [vmem:[#allocation107_spill] sm:$0xff] %v7425_v50  ;;  %v7437_v47 = vld [vmem:[#allocation13 + $0x120] ss:$16 sps:$4 sm:$0xff]  }
 0x360   : > { %3530 = vmatpush2.bf16.msra.mxu1 %v7405_v18  ;;  %v7429_v18 = vld [vmem:[#allocation13 + $0x148] ss:$16 sps:$4 sm:$0xff]   ;;  %8072 = vst [vmem:[#allocation111_spill] sm:$0xff] %v7437_v47 }
 0x361   : > { %3531 = vmatprep.subr.bf16.mxu1 %v7416_v49  ;;  %8069 = vst [vmem:[#allocation108_spill] sm:$0xff] %v7429_v18 }
 0x362   : > { %3491 = vmatpush2.bf16.msra.mxu0 %v7409_v14  ;;  %v7441_v14 = vld [vmem:[#allocation13 + $0x128] ss:$16 sps:$4 sm:$0xff]  }
 0x363   : > { %3492 = vmatprep.subr.bf16.mxu0 %v7418_v57  ;;  %8073 = vst [vmem:[#allocation112_spill] sm:$0xff] %v7441_v14  ;;  %v7446_v57 = vld [vmem:[#allocation13 + $0x10c] ss:$16 sps:$4 sm:$0xff]  }
 0x364   : > { %3532 = vmatpush2.bf16.msra.mxu1 %v7414_v48  ;;  %v7443_v48 = vld [vmem:[#allocation13 + $0x104] ss:$16 sps:$4 sm:$0xff]   ;;  %8075 = vst [vmem:[#allocation114_spill] sm:$0xff] %v7446_v57 }
 0x365   : > { %3533 = vmatprep.subr.bf16.mxu1 %v7421_v54  ;;  %8074 = vst [vmem:[#allocation113_spill] sm:$0xff] %v7443_v48  ;;  %v7449_v54 = vld [vmem:[#allocation13 + $0x100] ss:$16 sps:$4 sm:$0xff]  }
 0x366   : > { %3493 = vmatpush2.bf16.msra.mxu0 %v7425_v50  ;;  %8076 = vst [vmem:[#allocation115_spill] sm:$0xff] %v7449_v54  ;;  %v7453_v50 = vld [vmem:[#allocation13 + $0x108] ss:$16 sps:$4 sm:$0xff]  }
 0x367   : > { %3494 = vmatprep.subr.bf16.mxu0 %v7431_v53  ;;  %8077 = vst [vmem:[#allocation116_spill] sm:$0xff] %v7453_v50 }
 0x368   : > { %3534 = vmatpush2.bf16.msra.mxu1 %v7429_v18 }
 0x369   : > { %3535 = vmatprep.subr.bf16.mxu1 %v7434_v43  ;;  %v2085_v43 = vld [vmem:[%s7718_s6] sm:$0xf] }
 0x36a   : > { %3495 = vmatpush2.bf16.msra.mxu0 %v7437_v47  ;;  %v2102_v9 = vrot.slane %v2085_v43, %v6934_v33 }
 0x36b   : > { %3496 = vmatprep.subr.bf16.mxu0 %v7443_v48  ;;  %v2094_v48 = vrot.slane %v2085_v43, %v7983_v36 }
 0x36c   : > { %3536 = vmatpush2.bf16.msra.mxu1 %v7441_v14  ;;  %v2090_v14 = vrot.slane %v2085_v43, %v7982_v35 }
 0x36d   : > { %3537 = vmatprep.subr.bf16.mxu1 %v7446_v57 }
 0x36e   : > { %3497 = vmatpush2.bf16.msra.mxu0 %v7449_v54 }
 0x36f   : > { %3991 = vmatprep.subr.bf16.mxu0 %v7036_v4  ;;  %v2098_v4 = vrot.slane %v2085_v43, %v7984_v55  ;;  %v2610_v43 = vld [vmem:[%s7717_s5] sm:$0xf] }
 0x370   : > { %3538 = vmatpush2.bf16.msra.mxu1 %v7453_v50 }
 0x371   : > { %4032 = vmatprep.subr.bf16.mxu1 %v7044_v51 }
 0x3b1   : > { %v2461_v47 = vpop.f32.mrf.mxu0  ;;  %v2502_v18 = vpop.f32.mrf.mxu1 }
 0x3b2   : > { %v2462_v53 = vadd.f32 %v2461_v47, %v2090_v14  ;;  %v2503_v51 = vadd.f32 %v2502_v18, %v2098_v4 }
 0x3b3   : > { %v2463_v57 = vpop.f32.mrf.mxu0  ;;  %v2504_v49 = vpop.f32.mrf.mxu1 }
 0x3b4   : > { %v5172_v54 = vmul.f32 -1.442695, %v2462_v53  ;;  %v2464_v46 = vadd.f32 %v2463_v57, %v2094_v48  ;;  %v5174_v63 = vmul.f32 -1.442695, %v2503_v51  ;;  %v2505_v39 = vadd.f32 %v2504_v49, %v2102_v9 }
 0x3b5   : > { %v2465_v45 = vpop.f32.mrf.mxu0  ;;  %v2506_v41 = vpop.f32.mrf.mxu1  ;;  %v2619_v49 = vrot.slane %v2610_v43, %v7983_v36 }
 0x3b6   : > { %6052 = vpow2.f32 %v5172_v54  ;;  %v5173_v42 = vmul.f32 -1.442695, %v2464_v46 }
 0x3b7   : > { %v2466_v50 = vpop.f32.mrf.mxu0  ;;  %v2507_v34 = vpop.f32.mrf.mxu1 }
 0x3b8   : > { %6054 = vpow2.f32 %v5173_v42 }
 0x3b9   : > { %6056 = vpow2.f32 %v5174_v63 }
 0x3c3   : > { %v6053_v40 = vpop.eup %6052 }
 0x3c4   : > { %v2518_v47 = vadd.f32 1.0, %v6053_v40 }
 0x3c5   : > { %v6055_v14 = vpop.eup %6054 }
 0x3c6   : > { %6058 = vrcp.f32 %v2518_v47  ;;  %v2519_v57 = vadd.f32 1.0, %v6055_v14  ;;  %v6057_v41 = vpop.eup %6056 }
 0x3c7   : > { %6060 = vtanh.f32 %v2505_v39  ;;  %v2520_v42 = vadd.f32 1.0, %v6057_v41 }
 0x3c8   : > { %6062 = vrcp.f32 %v2519_v57 }
 0x3c9   : > { %6064 = vrcp.f32 %v2520_v42  ;;  %v2623_v42 = vrot.slane %v2610_v43, %v7984_v55 }
 0x3d3   : > { %v6059_v46 = vpop.eup %6058 }
 0x3d4   : > { %v6061_v45 = vpop.eup %6060 }
 0x3d5   : > { %v6063_v34 = vpop.eup %6062  ;;  %v2529_v18 = vmul.f32 %v6061_v45, %v6059_v46 }
 0x3d6   : > { %v2528_v50 = vmul.f32 %v6063_v34, %v7049_v15  ;;  %v6065_v40 = vpop.eup %6064  ;;  %v2615_v15 = vrot.slane %v2610_v43, %v7982_v35 }
 0x3d8   : > { %v7468_v48 = vadd.f32 %v2529_v18, %v2528_v50 }
 0x3da   : > { %6066 = vtanh.f32 %v7468_v48 }
 0x3e7   : > { %v6067_v9 = vpop.eup %6066 }
 0x3e8   : > { %v7471_v63 = vmul.f32 %v6067_v9, %v6065_v40  ;;  %v2627_v40 = vrot.slane %v2610_v43, %v6934_v33 }
 0x3ea   : > { %v3059_v39 = vpack.c.bf16 %v7471_v63, %v7471_v63 }
 0x3ec   : > { %3498 = vmatprep.mubr.bf16.mxu0 %v3059_v39  ;;  %3539 = vmatprep.mubr.bf16.mxu1 %v3059_v39 }
 0x3f1   : > { %v2986_v54 = vpop.f32.mrf.mxu0 }
 0x3f2   : > { %v2987_v53 = vadd.f32 %v2986_v54, %v2615_v15 }
 0x3f3   : > { %v2988_v4 = vpop.f32.mrf.mxu0  ;;  %v3027_v51 = vpop.f32.mrf.mxu1 }
 0x3f4   : > { %v5239_v47 = vmul.f32 -1.442695, %v2987_v53  ;;  %v2989_v14 = vadd.f32 %v2988_v4, %v2619_v49  ;;  %v3028_v18 = vadd.f32 %v3027_v51, %v2623_v42 }
 0x3f5   : > { %v2990_v57 = vpop.f32.mrf.mxu0  ;;  %v3029_v41 = vpop.f32.mrf.mxu1 }
 0x3f6   : > { %6068 = vpow2.f32 %v5239_v47  ;;  %v5240_v46 = vmul.f32 -1.442695, %v2989_v14  ;;  %v5241_v9 = vmul.f32 -1.442695, %v3028_v18  ;;  %v3030_v39 = vadd.f32 %v3029_v41, %v2627_v40  ;;  %v8110_v18 = vld [vmem:[#allocation59_spill] sm:$0xff]  ;;  %v8111_v40 = vld [vmem:[#allocation58_spill] sm:$0xff] }
 0x3f7   : > { %v2991_v45 = vpop.f32.mrf.mxu0  ;;  %v3031_v34 = vpop.f32.mrf.mxu1 }
 0x3f8   : > { %6070 = vpow2.f32 %v5240_v46 }
 0x3f9   : > { %v3032_v50 = vpop.f32.mrf.mxu1  ;;  %6072 = vpow2.f32 %v5241_v9  ;;  %v8112_v9 = vld [vmem:[#allocation62_spill] sm:$0xff] }
 0x3fa   : > { %6074 = vtanh.f32 %v3030_v39  ;;  %v8113_v39 = vld [vmem:[#allocation60_spill] sm:$0xff] }
 0x403   : > { %v6069_v15 = vpop.eup %6068 }
 0x404   : > { %v3043_v54 = vadd.f32 1.0, %v6069_v15  ;;  %v8114_v15 = vld [vmem:[#allocation63_spill] sm:$0xff] }
 0x405   : > { %v6071_v53 = vpop.eup %6070 }
 0x406   : > { %6076 = vrcp.f32 %v3043_v54  ;;  %v3044_v49 = vadd.f32 1.0, %v6071_v53  ;;  %v6073_v4 = vpop.eup %6072  ;;  %v8115_v54 = vld [vmem:[#allocation61_spill] sm:$0xff]  ;;  %v8116_v53 = vld [vmem:[#allocation66_spill] sm:$0xff] }
 0x407   : > { %v6075_v47 = vpop.eup %6074  ;;  %v3045_v46 = vadd.f32 1.0, %v6073_v4  ;;  %v8118_v4 = vld [vmem:[#allocation67_spill] sm:$0xff] }
 0x408   : > { %6078 = vrcp.f32 %v3044_v49  ;;  %v8117_v49 = vld [vmem:[#allocation64_spill] sm:$0xff] }
 0x409   : > { %6080 = vrcp.f32 %v3045_v46  ;;  %v8122_v46 = vld [vmem:[#allocation71_spill] sm:$0xff] }
 0x413   : > { %v6077_v14 = vpop.eup %6076 }
 0x414   : > { %v3054_v51 = vmul.f32 %v6077_v14, %v6075_v47  ;;  %v8119_v47 = vld [vmem:[#allocation65_spill] sm:$0xff] }
 0x415   : > { %v6079_v57 = vpop.eup %6078  ;;  %v8120_v14 = vld [vmem:[#allocation69_spill] sm:$0xff] }
 0x416   : > { %v3053_v45 = vmul.f32 %v6079_v57, %v7064_v52  ;;  %v6081_v43 = vpop.eup %6080  ;;  %v8078_v52 = vld [vmem:[#allocation25_spill] sm:$0xff]  ;;  %v8121_v57 = vld [vmem:[#allocation68_spill] sm:$0xff] }
 0x418   : > { %v7483_v34 = vadd.f32 %v3054_v51, %v3053_v45  ;;  %v8123_v45 = vld [vmem:[#allocation70_spill] sm:$0xff]  ;;  %v8124_v51 = vld [vmem:[#allocation73_spill] sm:$0xff] }
 0x41a   : > { %6082 = vtanh.f32 %v7483_v34 }
 0x427   : > { %v6083_v41 = vpop.eup %6082 }
 0x428   : > { %v3057_v42 = vmul.f32 %v6083_v41, %v6081_v43  ;;  %v8125_v43 = vld [vmem:[#allocation72_spill] sm:$0xff]  ;;  %v8126_v41 = vld [vmem:[#allocation75_spill] sm:$0xff] }
 0x42a   : > { %v3058_v50 = vpack.c.bf16 %v3057_v42, %v3057_v42  ;;  %v8127_v42 = vld [vmem:[#allocation74_spill] sm:$0xff] }
 0x42c   : > { %3499 = vmatmul.mubr.bf16.vlgmr.msra.gmra.mxu0 %v3058_v50  ;;  %3540 = vmatmul.mubr.bf16.vlgmr.msra.gmra.mxu1 %v3058_v50 }
 0x42d   : > { %3992 = vmatpush1.bf16.msra.mxu0 %v7067_v56  ;;  %4023 = vmatprep.mubr.bf16.mxu0 %v3058_v50  ;;  %v8079_v56 = vld [vmem:[#allocation28_spill] sm:$0xff] }
 0x42e   : > { %4064 = vmatprep.mubr.bf16.mxu1 %v3058_v50  ;;  %3993 = vmatprep.subr.bf16.mxu0 %v7069_v58  ;;  %v8080_v58 = vld [vmem:[#allocation27_spill] sm:$0xff]  ;;  %v8128_v50 = vld [vmem:[#allocation77_spill] sm:$0xff] }
 0x42f   : > { %4033 = vmatpush1.bf16.msra.mxu1 %v7071_v59  ;;  %v8081_v59 = vld [vmem:[#allocation30_spill] sm:$0xff] }
 0x430   : > { %4034 = vmatprep.subr.bf16.mxu1 %v7073_v60  ;;  %v8082_v60 = vld [vmem:[#allocation29_spill] sm:$0xff] }
 0x431   : > { %3994 = vmatpush1.bf16.msra.mxu0 %v7076_v37  ;;  %v8083_v37 = vld [vmem:[#allocation32_spill] sm:$0xff] }
 0x432   : > { %3995 = vmatprep.subr.bf16.mxu0 %v7079_v61  ;;  %v8084_v61 = vld [vmem:[#allocation31_spill] sm:$0xff] }
 0x433   : > { %4035 = vmatpush1.bf16.msra.mxu1 %v7082_v62  ;;  %v8085_v62 = vld [vmem:[#allocation34_spill] sm:$0xff] }
 0x434   : > { %4036 = vmatprep.subr.bf16.mxu1 %v7085_v1  ;;  %v8086_v1 = vld [vmem:[#allocation33_spill] sm:$0xff] }
 0x435   : > { %3996 = vmatpush1.bf16.msra.mxu0 %v7088_v2  ;;  %v8087_v2 = vld [vmem:[#allocation36_spill] sm:$0xff] }
 0x436   : > { %3997 = vmatprep.subr.bf16.mxu0 %v7091_v3  ;;  %v8088_v3 = vld [vmem:[#allocation35_spill] sm:$0xff] }
 0x437   : > { %4037 = vmatpush1.bf16.msra.mxu1 %v7094_v6  ;;  %v8089_v6 = vld [vmem:[#allocation38_spill] sm:$0xff] }
 0x438   : > { %4038 = vmatprep.subr.bf16.mxu1 %v7097_v7  ;;  %v3578_v7 = vstv %s3577_s24 }
 0x439   : > { %3998 = vmatpush1.bf16.msra.mxu0 %v7100_v8  ;;  %v3581_v8 = vstv %s3580_s29  ;;  %s7659_s29 = scalar_lea.hbm %s7721_s9, %s5457_s26 }
 0x43a   : > { %3999 = vmatprep.subr.bf16.mxu0 %v7103_v10  ;;  %v8090_v10 = vld [vmem:[#allocation37_spill] sm:$0xff] }
 0x43b   : > { %4039 = vmatpush1.bf16.msra.mxu1 %v7106_v11  ;;  %v8091_v11 = vld [vmem:[#allocation40_spill] sm:$0xff] }
 0x43c   : > { %4040 = vmatprep.subr.bf16.mxu1 %v7109_v12  ;;  %v8092_v12 = vld [vmem:[#allocation43_spill] sm:$0xff] }
 0x43d   : > { %4000 = vmatpush1.bf16.msra.mxu0 %v7112_v13  ;;  %v3579_v13 = vmul.f32 %v8092_v12, %v3578_v7  ;;  %v8141_v7 = vld [vmem:[#allocation88_spill] sm:$0xff] }
 0x43e   : > { %4001 = vmatprep.subr.bf16.mxu0 %v7115_v16  ;;  %v8093_v16 = vld [vmem:[#allocation46_spill] sm:$0xff]  ;;  %v8145_v12 = vld [vmem:[#allocation92_spill] sm:$0xff] }
 0x43f   : > { %4041 = vmatpush1.bf16.msra.mxu1 %v7118_v17  ;;  %v3582_v17 = vmul.f32 %v8093_v16, %v3581_v8  ;;  %v8142_v8 = vld [vmem:[#allocation91_spill] sm:$0xff]  ;;  %v8147_v16 = vld [vmem:[#allocation94_spill] sm:$0xff] }
 0x440   : > { %4042 = vmatprep.subr.bf16.mxu1 %v7121_v19  ;;  %v8094_v19 = vld [vmem:[#allocation39_spill] sm:$0xff] }
 0x441   : > { %4002 = vmatpush1.bf16.msra.mxu0 %v7124_v20  ;;  %v8095_v20 = vld [vmem:[#allocation42_spill] sm:$0xff] }
 0x442   : > { %4003 = vmatprep.subr.bf16.mxu0 %v7127_v21  ;;  %v8096_v21 = vld [vmem:[#allocation41_spill] sm:$0xff] }
 0x443   : > { %4043 = vmatpush1.bf16.msra.mxu1 %v7130_v22  ;;  %v8097_v22 = vld [vmem:[#allocation44_spill] sm:$0xff] }
 0x444   : > { %4044 = vmatprep.subr.bf16.mxu1 %v7133_v23  ;;  %v3583_v23 = vadd.f32 %v3582_v17, %v3579_v13  ;;  %v8146_v13 = vld [vmem:[#allocation95_spill] sm:$0xff]  ;;  %v8148_v17 = vld [vmem:[#allocation97_spill] sm:$0xff] }
 0x445   : > { %4004 = vmatpush1.bf16.msra.mxu0 %v7136_v24  ;;  %v8098_v24 = vld [vmem:[#allocation45_spill] sm:$0xff] }
 0x446   : > { %4005 = vmatprep.subr.bf16.mxu0 %v7139_v25  ;;  %v8099_v25 = vld [vmem:[#allocation48_spill] sm:$0xff] }
 0x447   : > { %4045 = vmatpush1.bf16.msra.mxu1 %v7142_v26  ;;  %v8100_v26 = vld [vmem:[#allocation47_spill] sm:$0xff] }
 0x448   : > { %4046 = vmatprep.subr.bf16.mxu1 %v7145_v27  ;;  %v8101_v27 = vld [vmem:[#allocation50_spill] sm:$0xff] }
 0x449   : > { %4006 = vmatpush1.bf16.msra.mxu0 %v7148_v28  ;;  %v3584_v28 = vpack.c.bf16 %v3583_v23, %v3583_v23  ;;  %v8153_v23 = vld [vmem:[#allocation100_spill] sm:$0xff] }
 0x44a   : > { %4007 = vmatprep.subr.bf16.mxu0 %v7151_v29  ;;  %v8102_v29 = vld [vmem:[#allocation49_spill] sm:$0xff] }
 0x44b   : > { %4047 = vmatpush1.bf16.msra.mxu1 %v7154_v30  ;;  %v8103_v30 = vld [vmem:[#allocation52_spill] sm:$0xff] }
 0x44c   : > { %4048 = vmatprep.subr.bf16.mxu1 %v7157_v31  ;;  %v8104_v31 = vld [vmem:[#allocation53_spill] sm:$0xff] }
 0x44d   : > { %4008 = vmatpush2.bf16.msra.mxu0 %v7160_v32  ;;  %v8105_v32 = vld [vmem:[#allocation51_spill] sm:$0xff] }
 0x44e   : > { %4009 = vmatprep.subr.bf16.mxu0 %v7163_v5  ;;  %v8106_v5 = vld [vmem:[#allocation55_spill] sm:$0xff] }
 0x44f   : > { %4049 = vmatpush2.bf16.msra.mxu1 %v7167_v44  ;;  %v8107_v44 = vld [vmem:[#allocation54_spill] sm:$0xff] }
 0x450   : > { %4050 = vmatprep.subr.bf16.mxu1 %v7170_v0  ;;  %v8108_v0 = vld [vmem:[#allocation56_spill] sm:$0xff] }
 0x451   : > { %4010 = vmatpush2.bf16.msra.mxu0 %v7173_v38  ;;  %v8109_v38 = vld [vmem:[#allocation57_spill] sm:$0xff] }
 0x452   : > { %4011 = vmatprep.subr.bf16.mxu0 %v8078_v52  ;;  %v8129_v52 = vld [vmem:[#allocation76_spill] sm:$0xff] }
 0x453   : > { %4051 = vmatpush2.bf16.msra.mxu1 %v8079_v56  ;;  %v8130_v56 = vld [vmem:[#allocation79_spill] sm:$0xff] }
 0x454   : > { %4052 = vmatprep.subr.bf16.mxu1 %v8080_v58  ;;  %v8131_v58 = vld [vmem:[#allocation78_spill] sm:$0xff] }
 0x455   : > { %4012 = vmatpush2.bf16.msra.mxu0 %v8081_v59  ;;  %v8132_v59 = vld [vmem:[#allocation81_spill] sm:$0xff] }
 0x456   : > { %4013 = vmatprep.subr.bf16.mxu0 %v8082_v60  ;;  %v8133_v60 = vld [vmem:[#allocation80_spill] sm:$0xff] }
 0x457   : > { %4053 = vmatpush2.bf16.msra.mxu1 %v8083_v37  ;;  %v8134_v37 = vld [vmem:[#allocation83_spill] sm:$0xff] }
 0x458   : > { %4054 = vmatprep.subr.bf16.mxu1 %v8084_v61  ;;  %v8135_v61 = vld [vmem:[#allocation82_spill] sm:$0xff] }
 0x459   : > { %4014 = vmatpush2.bf16.msra.mxu0 %v8085_v62  ;;  %v8136_v62 = vld [vmem:[#allocation85_spill] sm:$0xff] }
 0x45a   : > { %4015 = vmatprep.subr.bf16.mxu0 %v8086_v1  ;;  %v8137_v1 = vld [vmem:[#allocation84_spill] sm:$0xff] }
 0x45b   : > { %4055 = vmatpush2.bf16.msra.mxu1 %v8087_v2  ;;  %v8138_v2 = vld [vmem:[#allocation87_spill] sm:$0xff] }
 0x45c   : > { %4056 = vmatprep.subr.bf16.mxu1 %v8088_v3  ;;  %v8139_v3 = vld [vmem:[#allocation86_spill] sm:$0xff] }
 0x45d   : > { %4016 = vmatpush2.bf16.msra.mxu0 %v8089_v6  ;;  %v8140_v6 = vld [vmem:[#allocation89_spill] sm:$0xff] }
 0x45e   : > { %4017 = vmatprep.subr.bf16.mxu0 %v8090_v10  ;;  %v8143_v10 = vld [vmem:[#allocation90_spill] sm:$0xff] }
 0x45f   : > { %4057 = vmatpush2.bf16.msra.mxu1 %v8091_v11  ;;  %v8144_v11 = vld [vmem:[#allocation93_spill] sm:$0xff] }
 0x460   : > { %4058 = vmatprep.subr.bf16.mxu1 %v8094_v19  ;;  %v8149_v19 = vld [vmem:[#allocation96_spill] sm:$0xff] }
 0x461   : > { %4018 = vmatpush2.bf16.msra.mxu0 %v8095_v20  ;;  %v8150_v20 = vld [vmem:[#allocation99_spill] sm:$0xff] }
 0x462   : > { %4019 = vmatprep.subr.bf16.mxu0 %v8096_v21  ;;  %v8151_v21 = vld [vmem:[#allocation98_spill] sm:$0xff] }
 0x463   : > { %4059 = vmatpush2.bf16.msra.mxu1 %v8097_v22  ;;  %v8152_v22 = vld [vmem:[#allocation102_spill] sm:$0xff] }
 0x464   : > { %4060 = vmatprep.subr.bf16.mxu1 %v8098_v24  ;;  %v8154_v24 = vld [vmem:[#allocation104_spill] sm:$0xff] }
 0x465   : > { %4020 = vmatpush2.bf16.msra.mxu0 %v8099_v25  ;;  %v8155_v25 = vld [vmem:[#allocation101_spill] sm:$0xff] }
 0x466   : > { %4021 = vmatprep.subr.bf16.mxu0 %v8100_v26  ;;  %v8156_v26 = vld [vmem:[#allocation105_spill] sm:$0xff] }
 0x467   : > { %4061 = vmatpush2.bf16.msra.mxu1 %v8101_v27  ;;  %v8157_v27 = vld [vmem:[#allocation103_spill] sm:$0xff] }
 0x468   : > { %4062 = vmatprep.subr.bf16.mxu1 %v8102_v29  ;;  %v8159_v29 = vld [vmem:[#allocation107_spill] sm:$0xff] }
 0x469   : > { %4022 = vmatpush2.bf16.msra.mxu0 %v8103_v30  ;;  %v8160_v30 = vld [vmem:[#allocation109_spill] sm:$0xff] }
 0x46a   : > { %4505 = vmatprep.subr.bf16.mxu0 %v8104_v31  ;;  %v8161_v31 = vld [vmem:[#allocation108_spill] sm:$0xff] }
 0x46b   : > { %4063 = vmatpush2.bf16.msra.mxu1 %v8105_v32  ;;  %v8162_v32 = vld [vmem:[#allocation110_spill] sm:$0xff] }
 0x46c   : > { %4024 = vmatmul.mubr.bf16.vlgmr.msra.gmra.mxu0 %v3584_v28  ;;  %4546 = vmatprep.subr.bf16.mxu1 %v8106_v5  ;;  %v8163_v5 = vld [vmem:[#allocation111_spill] sm:$0xff] }
 0x46d   : > { %4506 = vmatpush1.bf16.msra.mxu0 %v8107_v44  ;;  %v8164_v44 = vld [vmem:[#allocation113_spill] sm:$0xff] }
 0x46e   : > { %4065 = vmatmul.mubr.bf16.vlgmr.msra.gmra.mxu1 %v3584_v28  ;;  %4507 = vmatprep.subr.bf16.mxu0 %v8108_v0  ;;  %v8158_v28 = vld [vmem:[#allocation106_spill] sm:$0xff]  ;;  %v8165_v0 = vld [vmem:[#allocation112_spill] sm:$0xff] }
 0x46f   : > { %4547 = vmatpush1.bf16.msra.mxu1 %v8109_v38  ;;  %v8166_v38 = vld [vmem:[#allocation114_spill] sm:$0xff] }
 0x470   : > { %4548 = vmatprep.subr.bf16.mxu1 %v8110_v18  ;;  %v8167_v18 = vld [vmem:[#allocation115_spill] sm:$0xff] }
 0x471   : > { %4508 = vmatpush1.bf16.msra.mxu0 %v8111_v40  ;;  %v8168_v40 = vld [vmem:[#allocation116_spill] sm:$0xff] }
 0x472   : > { %4509 = vmatprep.subr.bf16.mxu0 %v8112_v9  ;;  %v3124_v9 = vld [vmem:[%s7718_s6] sm:$0xf] }
 0x473   : > { %4549 = vmatpush1.bf16.msra.mxu1 %v8113_v39  ;;  %v3129_v39 = vrot.slane %v3124_v9, %v7982_v35 }
 0x474   : > { %4550 = vmatprep.subr.bf16.mxu1 %v8114_v15  ;;  %v3133_v15 = vrot.slane %v3124_v9, %v7983_v36 }
 0x475   : > { %4510 = vmatpush1.bf16.msra.mxu0 %v8115_v54 }
 0x476   : > { %4511 = vmatprep.subr.bf16.mxu0 %v8116_v53 }
 0x477   : > { %4551 = vmatpush1.bf16.msra.mxu1 %v8117_v49 }
 0x478   : > { %4552 = vmatprep.subr.bf16.mxu1 %v8118_v4 }
 0x479   : > { %4512 = vmatpush1.bf16.msra.mxu0 %v8119_v47 }
 0x47a   : > { %4513 = vmatprep.subr.bf16.mxu0 %v8120_v14 }
 0x47b   : > { %4553 = vmatpush1.bf16.msra.mxu1 %v8121_v57 }
 0x47c   : > { %4554 = vmatprep.subr.bf16.mxu1 %v8122_v46 }
 0x47d   : > { %4514 = vmatpush1.bf16.msra.mxu0 %v8123_v45 }
 0x47e   : > { %4515 = vmatprep.subr.bf16.mxu0 %v8124_v51 }
 0x47f   : > { %4555 = vmatpush1.bf16.msra.mxu1 %v8125_v43 }
 0x480   : > { %4556 = vmatprep.subr.bf16.mxu1 %v8126_v41 }
 0x481   : > { %4516 = vmatpush1.bf16.msra.mxu0 %v8127_v42  ;;  %v3137_v42 = vrot.slane %v3124_v9, %v7984_v55 }
 0x482   : > { %4517 = vmatprep.subr.bf16.mxu0 %v8128_v50 }
 0x483   : > { %4557 = vmatpush1.bf16.msra.mxu1 %v8129_v52  ;;  %v3141_v52 = vrot.slane %v3124_v9, %v6934_v33 }
 0x484   : > { %4558 = vmatprep.subr.bf16.mxu1 %v8130_v56 }
 0x485   : > { %4518 = vmatpush1.bf16.msra.mxu0 %v8131_v58 }
 0x486   : > { %4519 = vmatprep.subr.bf16.mxu0 %v8132_v59 }
 0x487   : > { %4559 = vmatpush1.bf16.msra.mxu1 %v8133_v60 }
 0x488   : > { %4560 = vmatprep.subr.bf16.mxu1 %v8134_v37 }
 0x489   : > { %4520 = vmatpush1.bf16.msra.mxu0 %v8135_v61 }
 0x48a   : > { %4521 = vmatprep.subr.bf16.mxu0 %v8136_v62 }
 0x48b   : > { %4561 = vmatpush1.bf16.msra.mxu1 %v8137_v1 }
 0x48c   : > { %4562 = vmatprep.subr.bf16.mxu1 %v8138_v2 }
 0x48d   : > { %4522 = vmatpush2.bf16.msra.mxu0 %v8139_v3 }
 0x48e   : > { %4523 = vmatprep.subr.bf16.mxu0 %v8140_v6 }
 0x48f   : > { %4563 = vmatpush2.bf16.msra.mxu1 %v8141_v7 }
 0x490   : > { %4564 = vmatprep.subr.bf16.mxu1 %v8142_v8 }
 0x491   : > { %4524 = vmatpush2.bf16.msra.mxu0 %v8143_v10 }
 0x492   : > { %4525 = vmatprep.subr.bf16.mxu0 %v8144_v11 }
 0x493   : > { %4565 = vmatpush2.bf16.msra.mxu1 %v8145_v12 }
 0x494   : > { %4566 = vmatprep.subr.bf16.mxu1 %v8146_v13 }
 0x495   : > { %4526 = vmatpush2.bf16.msra.mxu0 %v8147_v16 }
 0x496   : > { %4527 = vmatprep.subr.bf16.mxu0 %v8148_v17  ;;  %v3649_v17 = vld [vmem:[%s7717_s5] sm:$0xf] }
 0x497   : > { %4567 = vmatpush2.bf16.msra.mxu1 %v8149_v19  ;;  %v3658_v19 = vrot.slane %v3649_v17, %v7983_v36 }
 0x498   : > { %4568 = vmatprep.subr.bf16.mxu1 %v8150_v20 }
 0x499   : > { %4528 = vmatpush2.bf16.msra.mxu0 %v8151_v21 }
 0x49a   : > { %4529 = vmatprep.subr.bf16.mxu0 %v8152_v22 }
 0x49b   : > { %4569 = vmatpush2.bf16.msra.mxu1 %v8153_v23 }
 0x49c   : > { %4570 = vmatprep.subr.bf16.mxu1 %v8154_v24 }
 0x49d   : > { %4530 = vmatpush2.bf16.msra.mxu0 %v8155_v25 }
 0x49e   : > { %4531 = vmatprep.subr.bf16.mxu0 %v8156_v26 }
 0x49f   : > { %4571 = vmatpush2.bf16.msra.mxu1 %v8157_v27 }
 0x4a0   : > { %4572 = vmatprep.subr.bf16.mxu1 %v8158_v28 }
 0x4a1   : > { %4532 = vmatpush2.bf16.msra.mxu0 %v8159_v29 }
 0x4a2   : > { %4533 = vmatprep.subr.bf16.mxu0 %v8160_v30 }
 0x4a3   : > { %4573 = vmatpush2.bf16.msra.mxu1 %v8161_v31  ;;  %v3662_v31 = vrot.slane %v3649_v17, %v7984_v55 }
 0x4a4   : > { %4574 = vmatprep.subr.bf16.mxu1 %v8162_v32 }
 0x4a5   : > { %4534 = vmatpush2.bf16.msra.mxu0 %v8163_v5 }
 0x4a6   : > { %4535 = vmatprep.subr.bf16.mxu0 %v8164_v44  ;;  %v3666_v44 = vrot.slane %v3649_v17, %v6934_v33 }
 0x4a7   : > { %4575 = vmatpush2.bf16.msra.mxu1 %v8165_v0 }
 0x4a8   : > { %4576 = vmatprep.subr.bf16.mxu1 %v8166_v38 }
 0x4a9   : > { %4536 = vmatpush2.bf16.msra.mxu0 %v8167_v18 }
 0x4ab   : > { %4577 = vmatpush2.bf16.msra.mxu1 %v8168_v40 }
 0x4ec   : > { %v3500_v54 = vpop.f32.mrf.mxu0  ;;  %v3541_v53 = vpop.f32.mrf.mxu1 }
 0x4ed   : > { %v3501_v49 = vadd.f32 %v3500_v54, %v3129_v39  ;;  %v3542_v50 = vadd.f32 %v3541_v53, %v3137_v42 }
 0x4ee   : > { %v3502_v4 = vpop.f32.mrf.mxu0  ;;  %v3543_v47 = vpop.f32.mrf.mxu1 }
 0x4ef   : > { %v5306_v14 = vmul.f32 -1.442695, %v3501_v49  ;;  %v3503_v57 = vadd.f32 %v3502_v4, %v3133_v15  ;;  %v5308_v56 = vmul.f32 -1.442695, %v3542_v50  ;;  %v3544_v59 = vadd.f32 %v3543_v47, %v3141_v52  ;;  %v5996_v50 = vld [vmem:[#allocation14 + $0x38] sm:$0xff]   ;;  %v5998_v52 = vld [vmem:[#allocation14 + $0x28] sm:$0xff]  }
 0x4f0   : > { %v3504_v46 = vpop.f32.mrf.mxu0  ;;  %v3545_v45 = vpop.f32.mrf.mxu1  ;;  %5468 = vmatprep.subr.bf16.mxu0 %v5996_v50 }
 0x4f1   : > { %6084 = vpow2.f32 %v5306_v14  ;;  %v5307_v51 = vmul.f32 -1.442695, %v3503_v57 }
 0x4f2   : > { %v3505_v43 = vpop.f32.mrf.mxu0  ;;  %v3546_v41 = vpop.f32.mrf.mxu1 }
 0x4f3   : > { %6086 = vpow2.f32 %v5307_v51  ;;  %v8169_v41 = vld [vmem:[#allocation26_spill] sm:$0xff] }
 0x4f4   : > { %6088 = vpow2.f32 %v5308_v56  ;;  %v4621_v42 = vpack.c.bf16 %v7471_v63, %v8169_v41  ;;  %v5999_v56 = vld [vmem:[#allocation14 + $0x20] sm:$0xff]   ;;  %v6002_v63 = vld [vmem:[#allocation14 + $0x8] sm:$0xff]  }
 0x4fe   : > { %v6085_v58 = vpop.eup %6084 }
 0x4ff   : > { %v3557_v60 = vadd.f32 1.0, %v6085_v58  ;;  %v6000_v58 = vld [vmem:[#allocation14 + $0x18] sm:$0xff]  }
 0x500   : > { %v6087_v37 = vpop.eup %6086 }
 0x501   : > { %6090 = vrcp.f32 %v3557_v60  ;;  %v3558_v61 = vadd.f32 1.0, %v6087_v37  ;;  %v6089_v62 = vpop.eup %6088  ;;  %v6003_v60 = vld [vmem:[#allocation14] sm:$0xff]   ;;  %v4163_v37 = vld [vmem:[%s7718_s6] sm:$0xf] }
 0x502   : > { %6092 = vtanh.f32 %v3544_v59  ;;  %v3559_v6 = vadd.f32 1.0, %v6089_v62  ;;  %v6001_v59 = vld [vmem:[#allocation14 + $0x10] sm:$0xff]   ;;  %v4172_v62 = vrot.slane %v4163_v37, %v7983_v36 }
 0x503   : > { %6094 = vrcp.f32 %v3558_v61  ;;  %v4168_v61 = vrot.slane %v4163_v37, %v7982_v35 }
 0x504   : > { %6096 = vrcp.f32 %v3559_v6 }
 0x50e   : > { %v6091_v1 = vpop.eup %6090 }
 0x50f   : > { %v6093_v2 = vpop.eup %6092 }
 0x510   : > { %v6095_v3 = vpop.eup %6094  ;;  %v3568_v8 = vmul.f32 %v6093_v2, %v6091_v1 }
 0x511   : > { %v3567_v7 = vmul.f32 %v6095_v3, %v7468_v48  ;;  %v6097_v11 = vpop.eup %6096  ;;  %v3654_v48 = vrot.slane %v3649_v17, %v7982_v35  ;;  %v4180_v35 = vrot.slane %v4163_v37, %v6934_v33 }
 0x513   : > { %v7623_v10 = vadd.f32 %v3568_v8, %v3567_v7 }
 0x515   : > { %6098 = vtanh.f32 %v7623_v10 }
 0x522   : > { %v6099_v12 = vpop.eup %6098 }
 0x523   : > { %v7626_v13 = vmul.f32 %v6099_v12, %v6097_v11 }
 0x525   : > { %v4098_v16 = vpack.c.bf16 %v7626_v13, %v7626_v13 }
 0x527   : > { %4537 = vmatprep.mubr.bf16.mxu0 %v4098_v16  ;;  %4578 = vmatprep.mubr.bf16.mxu1 %v4098_v16 }
 0x52c   : > { %v4025_v20 = vpop.f32.mrf.mxu0 }
 0x52d   : > { %v4026_v21 = vadd.f32 %v4025_v20, %v3654_v48  ;;  %v4176_v20 = vrot.slane %v4163_v37, %v7984_v55 }
 0x52e   : > { %v4027_v22 = vpop.f32.mrf.mxu0  ;;  %v4066_v23 = vpop.f32.mrf.mxu1 }
 0x52f   : > { %v5373_v24 = vmul.f32 -1.442695, %v4026_v21  ;;  %v4028_v25 = vadd.f32 %v4027_v22, %v3658_v19  ;;  %v4067_v5 = vadd.f32 %v4066_v23, %v3662_v31 }
 0x530   : > { %v4029_v26 = vpop.f32.mrf.mxu0  ;;  %v4068_v27 = vpop.f32.mrf.mxu1 }
 0x531   : > { %6100 = vpow2.f32 %v5373_v24  ;;  %v5374_v28 = vmul.f32 -1.442695, %v4028_v25  ;;  %v5375_v0 = vmul.f32 -1.442695, %v4067_v5  ;;  %v4069_v38 = vadd.f32 %v4068_v27, %v3666_v44 }
 0x532   : > { %v4030_v29 = vpop.f32.mrf.mxu0  ;;  %v4070_v30 = vpop.f32.mrf.mxu1 }
 0x533   : > { %6102 = vpow2.f32 %v5374_v28 }
 0x534   : > { %v4071_v32 = vpop.f32.mrf.mxu1  ;;  %6104 = vpow2.f32 %v5375_v0 }
 0x535   : > { %6106 = vtanh.f32 %v4069_v38 }
 0x53e   : > { %v6101_v18 = vpop.eup %6100 }
 0x53f   : > { %v4082_v40 = vadd.f32 1.0, %v6101_v18 }
 0x540   : > { %v6103_v9 = vpop.eup %6102 }
 0x541   : > { %6108 = vrcp.f32 %v4082_v40  ;;  %v4083_v39 = vadd.f32 1.0, %v6103_v9  ;;  %v6105_v15 = vpop.eup %6104 }
 0x542   : > { %v6107_v54 = vpop.eup %6106  ;;  %v4084_v4 = vadd.f32 1.0, %v6105_v15 }
 0x543   : > { %6110 = vrcp.f32 %v4083_v39 }
 0x544   : > { %6112 = vrcp.f32 %v4084_v4 }
 0x54e   : > { %v6109_v53 = vpop.eup %6108 }
 0x54f   : > { %v4093_v14 = vmul.f32 %v6109_v53, %v6107_v54 }
 0x550   : > { %v6111_v49 = vpop.eup %6110 }
 0x551   : > { %v4092_v47 = vmul.f32 %v6111_v49, %v7483_v34  ;;  %v6113_v46 = vpop.eup %6112  ;;  %v5997_v34 = vld [vmem:[#allocation14 + $0x30] sm:$0xff]  }
 0x553   : > { %v4094_v57 = vadd.f32 %v4093_v14, %v4092_v47 }
 0x555   : > { %6114 = vtanh.f32 %v4094_v57  ;;  %4614 = vst [vmem:[#allocation3 + $0x8] sm:$0xff] %v4094_v57 }
 0x562   : > { %v6115_v45 = vpop.eup %6114 }
 0x563   : > { %v4096_v51 = vmul.f32 %v6115_v45, %v6113_v46 }
 0x565   : > { %v4097_v43 = vpack.c.bf16 %v4096_v51, %v4096_v51  ;;  %4613 = vst [vmem:[#allocation2] sm:$0xff] %v4096_v51 }
 0x567   : > { %4538 = vmatmul.mubr.bf16.vlgmr.msra.gmra.mxu0 %v4097_v43  ;;  %4579 = vmatmul.mubr.bf16.vlgmr.msra.gmra.mxu1 %v4097_v43 }
 0x568   : > { %5484 = vmatprep.mubr.bf16.mxu0 %v4621_v42  ;;  %5469 = vmatpush3.bf16.msra.mxu0 %v5996_v50 }
 0x569   : > { %5470 = vmatprep.subr.bf16.mxu0 %v5997_v34 }
 0x56c   : > { %5471 = vmatpush3.bf16.msra.mxu0 %v5997_v34 }
 0x56d   : > { %5472 = vmatprep.subr.bf16.mxu0 %v5998_v52 }
 0x570   : > { %5473 = vmatpush3.bf16.msra.mxu0 %v5998_v52 }
 0x571   : > { %5474 = vmatprep.subr.bf16.mxu0 %v5999_v56 }
 0x574   : > { %5475 = vmatpush3.bf16.msra.mxu0 %v5999_v56 }
 0x575   : > { %5476 = vmatprep.subr.bf16.mxu0 %v6000_v58 }
 0x578   : > { %5477 = vmatpush3.bf16.msra.mxu0 %v6000_v58 }
 0x579   : > { %5478 = vmatprep.subr.bf16.mxu0 %v6001_v59 }
 0x57c   : > { %5479 = vmatpush3.bf16.msra.mxu0 %v6001_v59 }
 0x57d   : > { %5480 = vmatprep.subr.bf16.mxu0 %v6002_v63 }
 0x580   : > { %5481 = vmatpush3.bf16.msra.mxu0 %v6002_v63 }
 0x581   : > { %5482 = vmatprep.subr.bf16.mxu0 %v6003_v60 }
 0x584   : > { %5483 = vmatpush3.bf16.msra.mxu0 %v6003_v60 }
 0x627   : > { %v4539_v1 = vpop.f32.mrf.mxu0  ;;  %v4580_v2 = vpop.f32.mrf.mxu1 }
 0x628   : > { %v4540_v3 = vadd.f32 %v4539_v1, %v4168_v61  ;;  %v4581_v21 = vadd.f32 %v4580_v2, %v4176_v20 }
 0x629   : > { %v4541_v6 = vpop.f32.mrf.mxu0  ;;  %v4582_v7 = vpop.f32.mrf.mxu1 }
 0x62a   : > { %v5440_v8 = vmul.f32 -1.442695, %v4540_v3  ;;  %v4542_v11 = vadd.f32 %v4541_v6, %v4172_v62  ;;  %v5442_v36 = vmul.f32 -1.442695, %v4581_v21  ;;  %v4583_v23 = vadd.f32 %v4582_v7, %v4180_v35 }
 0x62b   : > { %v4543_v12 = vpop.f32.mrf.mxu0  ;;  %v4584_v16 = vpop.f32.mrf.mxu1 }
 0x62c   : > { %6116 = vpow2.f32 %v5440_v8  ;;  %v5441_v17 = vmul.f32 -1.442695, %v4542_v11 }
 0x62d   : > { %v4544_v48 = vpop.f32.mrf.mxu0  ;;  %v4585_v19 = vpop.f32.mrf.mxu1 }
 0x62e   : > { %6118 = vpow2.f32 %v5441_v17 }
 0x62f   : > { %6120 = vpow2.f32 %v5442_v36 }
 0x639   : > { %v6117_v22 = vpop.eup %6116 }
 0x63a   : > { %v4596_v24 = vadd.f32 1.0, %v6117_v22 }
 0x63b   : > { %v6119_v25 = vpop.eup %6118 }
 0x63c   : > { %6122 = vrcp.f32 %v4596_v24  ;;  %v4597_v26 = vadd.f32 1.0, %v6119_v25  ;;  %v6121_v27 = vpop.eup %6120 }
 0x63d   : > { %6124 = vtanh.f32 %v4583_v23  ;;  %v4598_v31 = vadd.f32 1.0, %v6121_v27 }
 0x63e   : > { %6126 = vrcp.f32 %v4597_v26 }
 0x63f   : > { %6128 = vrcp.f32 %v4598_v31 }
 0x649   : > { %v6123_v28 = vpop.eup %6122 }
 0x64a   : > { %v6125_v29 = vpop.eup %6124 }
 0x64b   : > { %v6127_v30 = vpop.eup %6126  ;;  %v4607_v32 = vmul.f32 %v6125_v29, %v6123_v28 }
 0x64c   : > { %v4606_v55 = vmul.f32 %v6127_v30, %v7623_v10  ;;  %v6129_v5 = vpop.eup %6128  ;;  %v5443_v10 = vld [vmem:[%s7720_s8] ss:$0 sm:$0xff] }
 0x64e   : > { %v4608_v33 = vadd.f32 %v4607_v32, %v4606_v55 }
 0x650   : > { %6130 = vtanh.f32 %v4608_v33  ;;  %4616 = vst [vmem:[#allocation3] sm:$0xff] %v4608_v33 }
 0x65d   : > { %v6131_v44 = vpop.eup %6130 }
 0x65e   : > { %v4610_v0 = vmul.f32 %v6131_v44, %v6129_v5 }
 0x660   : > { %4615 = vst [vmem:[#allocation2 + $0x8] sm:$0xff] %v4610_v0  ;;  %v4622_v38 = vpack.c.bf16 %v4610_v0, %v7626_v13 }
 0x662   : > { %5485 = vmatmul.mubr.bf16.vlgmr.msra.gmra.mxu0 %v4622_v38 }
 0x722   : > { %v5486_v18 = vpop.f32.mrf.mxu0 }
 0x723   : > { %v4737_v40 = vadd.f32 %v5486_v18, %v5443_v10 }
 0x724   : > { %v4728_v9 = vpop.f32.mrf.mxu0 }
 0x725   : > { %4745 = vst [vmem:[%s6645_s15 + $0x10] sm:$0xff] %v4737_v40  ;;  %v4729_v39 = vadd.f32 %v5443_v10, %v4728_v9 }
 0x726   : > { %v5487_v15 = vpop.f32.mrf.mxu0 }
 0x727   : > { %4743 = vst [vmem:[%s6645_s15] sm:$0xff] %v4729_v39  ;;  %v4740_v54 = vadd.f32 %v5487_v15, %v5443_v10 }
 0x728   : > { %v4731_v13 = vpop.f32.mrf.mxu0 }
 0x729   : > { %4746 = vst [vmem:[%s6645_s15 + $0x18] sm:$0xff] %v4740_v54  ;;  %v4732_v53 = vadd.f32 %v5443_v10, %v4731_v13 }
 0x72b   : > { %4744 = vst [vmem:[%s6645_s15 + $0x8] sm:$0xff] %v4732_v53 }
 0x72c   : > { %6344 = shalt.err (!%p6341_p6)
}
 0x72d   : > { %s6345_s23 = scalar_lea.hbm %s7659_s29, 512  ;;  %s6349_s13 = scalar_lea.hbm %s7721_s9, 1024 }
 0x72e   : > { %p6346_p9 = scmp.ne.s32.totalorder %s7659_s29, %s6345_s23  ;;  %p6350_p13 = scmp.lt.s32.totalorder %s7659_s29, %s7721_s9 }
 0x72f   : > { %p6351_p0 = scmp.lt.s32.totalorder %s6349_s13, %s6345_s23 }
 0x730   : > { %p6347_p10 = pnand %p6346_p9, %p6530_p4 }
 0x731   : > { %p6352_p12 = por %p6351_p0, %p6350_p13 }
 0x732   : > { %p6348_p11 = pneg %p6347_p10 }
 0x734   : > { %p6353_p2 = pnand %p6352_p12, %p6348_p11 }
 0x736   : > { %6356 = shalt.err (!%p6353_p2)
}
 0x737   : > { %s6438_s26 = smov 128   ;;  %s6439_s16 = smov 8  }
 0x738   : > { %5512 = dma.vmem_to_hbm [thread:$0]  (%p6530_p4), %s7661_s27, 512, %s7659_s29, %s7667_s12, %s6438_s26, %s6438_s26, %s6439_s16  }
 0x739 PF: > { %p5549_p1 = scmp.ge.s32.totalorder %s6423_s14, 2  ;;  %s4777_s24 = sand.u32 1, %s6403_s30  }
 0x73a   : > { %p8170_p5 = scmp.ne.s32.totalorder %s7877_s21, 0  ;;  %s4778_s20 = scalar_lea.sflag [#allocation7], %s4777_s24 }
 0x73c   : > { %p5534_p3 = pnand %p5549_p1, %p8170_p5 }
 0x73e   : > { %p5535_p8 = pneg %p5534_p3 }
 0x740   : > { %6398 = dma.done.wait (%p5535_p8), %s4778_s20, 512  }
 0x741   : > { %6400 = vsyncadd (%p5535_p8), %s4778_s20, 4294966784  ;;  %s26_s14 = sadd.s32 1, %s6423_s14   ;;  %s8171_s1 = sld [smem:[#allocation24_spill]] }
 0x742   : > { %p23_p7 = scmp.ge.s32.totalorder %s26_s14, 4   ;;  %s8172_s12 = sld [smem:[#allocation22_spill]] }
 0x743   : > { %s8173_s13 = sld [smem:[#allocation23_spill]]  ;;  %s8174_s30 = smov %s6407_s10 }
 0x744   : > { %s8175_s10 = smov %s6411_s11  ;;  %25 = sbr.rel (!%p23_p7) target bundleno = 10 (0xa), region = 126 }
 0x747   : > { %s8176_s11 = smov %s8171_s1 }
 0x749   :  { %4783 = vsyncpa [#allocation6], 1 }
 0x74a   :  { %4785 = vsyncpa [#allocation6 + $0x1], 1 }
 0x74b   :  { %4786 = vsyncpa [#allocation9], 1 }
 0x74c   :  { %4787 = vsyncpa [#allocation12], 1 }
 0x74d   :  { %4788 = vsyncpa [#allocation15], 1 }
 0x74e   :  { %4789 = vsyncpa [#allocation7], 1 }
 0x74f   :  { %4791 = vsyncpa [#allocation7 + $0x1], 1 }

</bundles_post_ra>
